<compile_context>
chip_gen: v6e
topology: v6e:2x2x1
jax: 0.10.0
libtpu: 0.0.40
codegen_flags: <defaults>
</compile_context>

<pallas_src>
import functools

import jax
import jax.numpy as jnp
from jax import lax
from jax.experimental import pallas as pl
from jax.experimental.pallas import tpu as pltpu


def _topo_loss_kernel(y_ref, yh_ref, m_ref, lg_ref, out_ref,
                      ay_ref, by_ref, ah_ref, bh_ref, acc_ref, *,
                      tau, eps, L_orig, row_tile):
    Gn = m_ref.shape[1]
    Lp = m_ref.shape[2]
    num_tiles = Lp // row_tile

    m = m_ref[0]                                    # (G, Lp) float mask
    x = lg_ref[0]                                   # (1, Lp) logits (0 in lane pad)

    # Mask-multiply inside the kernel (reference zeroes coords outside the mask;
    # doing it here saves a full XLA pass over both (B,G,L,3) coordinate tensors).
    y = [y_ref[0, c] * m for c in range(3)]         # 3 x (G, Lp) ground truth
    yh = [yh_ref[0, c] * m for c in range(3)]       # 3 x (G, Lp) aligned prediction

    lane = lax.broadcasted_iota(jnp.int32, (1, Lp), 1)

    # Per-conformer valid length, clamped to >= 2 (as in the reference).
    Lf = jnp.maximum(jnp.sum(m, axis=-1, keepdims=True), 2.0)      # (G, 1)
    inv_L = 1.0 / Lf
    inv_pair = 1.0 / (Lf * (Lf - 1.0))

    # ---------------- RMSE term (and per-residue distance d) ----------------
    d2 = jnp.zeros((Gn, Lp), jnp.float32)
    for c in range(3):
        dc = y[c] - yh[c]
        d2 = d2 + dc * dc
    d = jnp.sqrt(d2)                                               # (G, Lp)
    rmse = jnp.sum(d, axis=-1, keepdims=True) * inv_L              # (G, 1)

    # ---------------- folding-angle term ----------------
    def cos_fold(p):  # p: list of 3 (G, Lp) slabs
        w1 = jnp.zeros((Gn, Lp), jnp.float32)
        w2 = jnp.zeros((Gn, Lp), jnp.float32)
        w12 = jnp.zeros((Gn, Lp), jnp.float32)
        for c in range(3):
            pc = p[c]
            v1 = pltpu.roll(pc, shift=1, axis=1) - pc        # p[i-1] - p[i]
            v2 = pltpu.roll(pc, shift=Lp - 1, axis=1) - pc   # p[i+1] - p[i]
            w1 = w1 + v1 * v1
            w2 = w2 + v2 * v2
            w12 = w12 + v1 * v2
        # PyTorch CosineSimilarity: num / sqrt(max(|v1|^2 * |v2|^2, eps^2))
        return w12 * lax.rsqrt(jnp.maximum(w1 * w2, eps * eps))

    m_prev = pltpu.roll(m, shift=1, axis=1)
    m_next = pltpu.roll(m, shift=Lp - 1, axis=1)
    edge = jnp.logical_and(lane >= 1, lane <= L_orig - 2).astype(jnp.float32)
    m3 = m * m_prev * m_next * edge                                # (G, Lp)
    fa = jnp.sum(jnp.abs(cos_fold(y) - cos_fold(yh)) * m3,
                 axis=-1, keepdims=True) * inv_L                   # (G, 1)

    # -------- probability term (BCE with logits vs exp(-d/tau)) --------
    valid = m > 0.5
    z = jnp.where(valid, jnp.exp(d * (-1.0 / tau)), 0.5)           # targets
    xm = jnp.where(valid, x, 0.0)                                  # masked logits (bcast over G)
    bce = jnp.maximum(xm, 0.0) - xm * z + jnp.log(1.0 + jnp.exp(-jnp.abs(xm)))
    # Positions inside the ORIGINAL tensor length contribute (invalid residues
    # contribute log 2, as in the reference); lane padding contributes 0.
    in_tensor = (lane < L_orig).astype(jnp.float32)
    pb = jnp.sum(bce * in_tensor, axis=-1, keepdims=True) * inv_L  # (G, 1)

    # ---------------- cross-distance term ----------------
    # Masked augmented matmul:  A[:,i] = m_i*[p_i, |p_i|^2, 1, 0,0,0],
    # B[:,j] = m_j*[-2 p_j, 1, |p_j|^2, 0,0,0]  =>  (A^T B)[i,j] = m_i m_j |p_i-p_j|^2.
    sq_y = jnp.zeros((Gn, Lp), jnp.float32)
    sq_h = jnp.zeros((Gn, Lp), jnp.float32)
    for c in range(3):
        sq_y = sq_y + y[c] * y[c]
        sq_h = sq_h + yh[c] * yh[c]

    lane4 = lax.broadcasted_iota(jnp.int32, (Gn, 4), 1)
    row4 = lax.broadcasted_iota(jnp.int32, (Gn, 4), 0)
    vals = (jnp.where(lane4 == 0, rmse, 0.0)
            + jnp.where(lane4 == 2, fa, 0.0)
            + jnp.where(lane4 == 3, pb, 0.0))

    # K padded 5 -> 8 with zero rows; rows written directly into VMEM scratch.
    zero3 = jnp.zeros((3, Lp), jnp.float32)
    ay_ref[5:8, :] = zero3
    by_ref[5:8, :] = zero3
    ah_ref[5:8, :] = zero3
    bh_ref[5:8, :] = zero3

    tn = (((0,), (0,)), ((), ()))                                  # A^T @ B
    for g in range(Gn):
        mg = m[g:g + 1, :]
        sqy_g = sq_y[g:g + 1, :]
        sqh_g = sq_h[g:g + 1, :]
        for c in range(3):
            ay_ref[c:c + 1, :] = y[c][g:g + 1, :]
            by_ref[c:c + 1, :] = -2.0 * y[c][g:g + 1, :]
            ah_ref[c:c + 1, :] = yh[c][g:g + 1, :]
            bh_ref[c:c + 1, :] = -2.0 * yh[c][g:g + 1, :]
        ay_ref[3:4, :] = sqy_g
        ay_ref[4:5, :] = mg
        by_ref[3:4, :] = mg
        by_ref[4:5, :] = sqy_g
        ah_ref[3:4, :] = sqh_g
        ah_ref[4:5, :] = mg
        bh_ref[3:4, :] = mg
        bh_ref[4:5, :] = sqh_g

        acc_ref[...] = jnp.zeros_like(acc_ref)

        def tile_body(r, carry):
            start = pl.multiple_of(r * row_tile, 128)
            a_y = ay_ref[:, pl.ds(start, row_tile)]                # (8, row_tile)
            a_h = ah_ref[:, pl.ds(start, row_tile)]
            d2y = jnp.maximum(
                lax.dot_general(a_y, by_ref[...], tn,
                                preferred_element_type=jnp.float32), 0.0)
            d2h = jnp.maximum(
                lax.dot_general(a_h, bh_ref[...], tn,
                                preferred_element_type=jnp.float32), 0.0)
            # (sqrt(a) - sqrt(b))^2 = a + b - 2*sqrt(a*b): one EUP sqrt per element.
            dd2 = d2y + d2h - 2.0 * jnp.sqrt(d2y * d2h)
            # Fold (row_tile, Lp) -> (8, Lp) with VPU adds only; the full XLU
            # reduce happens once after the loop (off the loop-carried chain).
            part = dd2[0:8, :]
            for s in range(1, row_tile // 8):
                part = part + dd2[s * 8:(s + 1) * 8, :]
            acc_ref[...] += part
            return carry

        lax.fori_loop(0, num_tiles, tile_body, 0, unroll=num_tiles <= 8)

        cd_g = jnp.sum(acc_ref[...])                               # unnormalized scalar
        vals = vals + jnp.where(
            jnp.logical_and(lane4 == 1, row4 == g), cd_g, 0.0) * inv_pair

    # ---------------- single consolidated (G, 4) store per batch element ----------------
    out_ref[0] = vals


def _kabsch_align(pred, gt, mask):
    """Masked Kabsch alignment. pred, gt: (B,G,L,3); mask: (B,G,L) bool."""
    # TODO(synk): kabsch_algorithm is not defined in the reference snippet; a standard
    # masked Kabsch (3x3 SVD, plain JAX — no Pallas SVD) is used here.
    m = mask[..., None].astype(jnp.float32)
    n = jnp.maximum(jnp.sum(m, axis=-2, keepdims=True), 1.0)
    cp = jnp.sum(pred * m, axis=-2, keepdims=True) / n
    cq = jnp.sum(gt * m, axis=-2, keepdims=True) / n
    P = (pred - cp) * m
    Q = (gt - cq) * m
    H = jnp.einsum('...li,...lj->...ij', P, Q)                     # (B,G,3,3)
    U, _, Vt = jnp.linalg.svd(H)
    V = jnp.swapaxes(Vt, -1, -2)
    det = jnp.linalg.det(jnp.matmul(V, jnp.swapaxes(U, -1, -2)))
    ones = jnp.ones_like(det)
    dsign = jnp.stack([ones, ones, jnp.sign(det)], axis=-1)        # (B,G,3)
    R = jnp.matmul(V * dsign[..., None, :], jnp.swapaxes(U, -1, -2))
    aligned = jnp.einsum('...li,...ji->...lj', pred - cp, R) + cq
    return aligned


def topological_loss(predicted_coords, predicted_probs, ground_truth,
                     sequence_mask, ground_truth_mask, is_synthetic,
                     rmse_weight=0.4, cross_distance_weight=0.175,
                     folding_angle_weight=0.175, probability_weight=0.25,
                     probability_temperature=1.0, eps=1e-6):
    # Mirror the PyTorch reshaping.
    gt = jnp.swapaxes(ground_truth.astype(jnp.float32), -2, -3)    # (B,G,L,3)
    mask = jnp.swapaxes(ground_truth_mask, -1, -2) & sequence_mask[..., None, :]  # (B,G,L)
    B, G, L, _ = gt.shape

    pred = jnp.broadcast_to(predicted_coords.astype(jnp.float32)[..., None, :, :], gt.shape)
    aligned = _kabsch_align(pred, gt, mask)

    # ---- lane-major layout: residue axis L on the 128-lane axis ----
    Lp = ((L + 127) // 128) * 128
    pad = Lp - L

    def to_lane_major(a):                                          # (B,G,L,3) -> (B,3,G,Lp)
        a = jnp.transpose(a, (0, 3, 1, 2))
        if pad:
            a = jnp.pad(a, ((0, 0), (0, 0), (0, 0), (0, pad)))
        return a

    y_lm = to_lane_major(gt)                                       # (B,3,G,Lp) raw gt
    yh_lm = to_lane_major(aligned)                                 # (B,3,G,Lp) raw aligned
    m_lm = mask.astype(jnp.float32)                                # (B,G,L)
    logits = jnp.swapaxes(predicted_probs.astype(jnp.float32), -1, -2)   # (B,1,L)
    if pad:
        m_lm = jnp.pad(m_lm, ((0, 0), (0, 0), (0, pad)))
        logits = jnp.pad(logits, ((0, 0), (0, 0), (0, pad)))

    # Row tile for the cross-distance accumulation.  256 matches the v6e/v7x MXU
    # depth; fall back to 128 at large Lp so the live (row_tile, Lp) temporaries
    # stay well inside the default scoped-VMEM limits (16 MiB v5e / 32 MiB v6e,v7x).
    if Lp <= 256:
        row_tile = Lp
    elif Lp % 256 == 0 and Lp < 2048:
        row_tile = 256
    else:
        row_tile = 128
    assert Lp % row_tile == 0

    kernel = functools.partial(_topo_loss_kernel,
                               tau=float(probability_temperature),
                               eps=float(eps), L_orig=L, row_tile=row_tile)

    out = pl.pallas_call(
        kernel,
        out_shape=jax.ShapeDtypeStruct((B, G, 4), jnp.float32),
        grid_spec=pltpu.PrefetchScalarGridSpec(
            num_scalar_prefetch=0,
            grid=(B,),                                             # G fused per step
            in_specs=[
                pl.BlockSpec((1, 3, G, Lp), lambda b: (b, 0, 0, 0)),   # gt
                pl.BlockSpec((1, 3, G, Lp), lambda b: (b, 0, 0, 0)),   # aligned pred
                pl.BlockSpec((1, G, Lp), lambda b: (b, 0, 0)),         # mask
                pl.BlockSpec((1, 1, Lp), lambda b: (b, 0, 0)),         # logits
            ],
            out_specs=pl.BlockSpec((1, G, 4), lambda b: (b, 0, 0)),
            scratch_shapes=[pltpu.VMEM((8, Lp), jnp.float32)] * 5,     # A_y,B_y,A_h,B_h,acc
        ),
        compiler_params=pltpu.CompilerParams(
            dimension_semantics=("parallel",)),     # B>=2 keeps both v7x TCs busy
    )(y_lm, yh_lm, m_lm, logits)

    rmse = out[..., 0]                                             # (B, G)
    cd = out[..., 1]
    fa = out[..., 2]
    pb = out[..., 3]
    per_sample = (rmse_weight * rmse + cross_distance_weight * cd
                  + folding_angle_weight * fa + probability_weight * pb)   # (B, G)

    # TODO(synk): BatchBinaryClassWeightBalancer is not defined in the reference;
    # inverse-frequency class balancing is used here.
    is_syn_f = is_synthetic.astype(jnp.float32)
    n_total = float(is_synthetic.shape[0])
    n_syn = jnp.sum(is_syn_f)
    n_exp = n_total - n_syn
    syn_w = jnp.where(n_syn > 0, n_total / (2.0 * jnp.maximum(n_syn, 1.0)), 0.0)
    exp_w = jnp.where(n_exp > 0, n_total / (2.0 * jnp.maximum(n_exp, 1.0)), 0.0)

    def aggregate(v):  # v: (B, G): weighted mean over batch, min over conformers
        w = jnp.where(is_synthetic[:, None], syn_w, exp_w)
        return jnp.min(jnp.mean(v * w, axis=0))

    loss = aggregate(per_sample)
    return (loss,
            (aggregate(rmse), aggregate(cd), aggregate(fa), aggregate(pb)),
            (rmse, cd, fa, pb))


if __name__ == "__main__":
    key = jax.random.PRNGKey(0)
    B, G, L = 2, 2, 16
    k1, k2, k3, k4 = jax.random.split(key, 4)

    predicted_coords = 2.0 * jax.random.normal(k1, (B, L, 3), jnp.float32)
    predicted_probs = jax.random.normal(k2, (B, L, 1), jnp.float32)
    ground_truth = 2.0 * jax.random.normal(k3, (B, L, G, 3), jnp.float32)   # (B, L, G, 3)
    seq_len = jnp.array([14, 12])
    idx = jnp.arange(L)
    sequence_mask = idx[None, :] < seq_len[:, None]                         # (B, L) bool
    ground_truth_mask = jax.random.uniform(k4, (B, L, G)) > 0.1             # (B, L, G) bool
    is_synthetic = jnp.array([True, False])

    fn = jax.jit(topological_loss)
    out = fn(predicted_coords, predicted_probs, ground_truth,
             sequence_mask, ground_truth_mask, is_synthetic)
    jax.block_until_ready(out)
    print("KERNEL_OK")
</pallas_src>

<mosaic_0001>
module attributes {stable_mosaic.version = 11 : i64} {
  func.func @_topo_loss_kernel(%arg0: i32, %arg1: memref<1x3x2x128xf32, #tpu.memory_space<vmem>>, %arg2: memref<1x3x2x128xf32, #tpu.memory_space<vmem>>, %arg3: memref<1x2x128xf32, #tpu.memory_space<vmem>>, %arg4: memref<1x1x128xf32, #tpu.memory_space<vmem>>, %arg5: memref<1x2x4xf32, #tpu.memory_space<vmem>>, %arg6: memref<8x128xf32, #tpu.memory_space<vmem>>, %arg7: memref<8x128xf32, #tpu.memory_space<vmem>>, %arg8: memref<8x128xf32, #tpu.memory_space<vmem>>, %arg9: memref<8x128xf32, #tpu.memory_space<vmem>>, %arg10: memref<8x128xf32, #tpu.memory_space<vmem>>) attributes {dimension_semantics = [#tpu.dimension_semantics<parallel>], iteration_bounds = array<i64: 2>, scalar_prefetch = 0 : i64, scratch_operands = 5 : i64, tpu.core_type = #tpu.core_type<tc>, window_params = [{transform_indices = @transform_0, window_bounds = array<i64: 1, 3, 2, 128>}, {transform_indices = @transform_1, window_bounds = array<i64: 1, 3, 2, 128>}, {transform_indices = @transform_2, window_bounds = array<i64: 1, 2, 128>}, {transform_indices = @transform_3, window_bounds = array<i64: 1, 1, 128>}, {transform_indices = @transform_4, window_bounds = array<i64: 1, 2, 4>}]} {
    %c0 = arith.constant 0 : index
    %c0_0 = arith.constant 0 : index
    %c0_1 = arith.constant 0 : index
    %0 = vector.load %arg3[%c0, %c0_0, %c0_1] : memref<1x2x128xf32, #tpu.memory_space<vmem>>, vector<1x2x128xf32>
    %1 = vector.shape_cast %0 : vector<1x2x128xf32> to vector<2x128xf32>
    %c0_2 = arith.constant 0 : index
    %c0_3 = arith.constant 0 : index
    %c0_4 = arith.constant 0 : index
    %2 = vector.load %arg4[%c0_2, %c0_3, %c0_4] : memref<1x1x128xf32, #tpu.memory_space<vmem>>, vector<1x1x128xf32>
    %3 = vector.shape_cast %2 : vector<1x1x128xf32> to vector<1x128xf32>
    %c0_5 = arith.constant 0 : index
    %c0_6 = arith.constant 0 : index
    %c0_7 = arith.constant 0 : index
    %c0_8 = arith.constant 0 : index
    %4 = vector.load %arg1[%c0_5, %c0_6, %c0_7, %c0_8] : memref<1x3x2x128xf32, #tpu.memory_space<vmem>>, vector<1x1x2x128xf32>
    %5 = vector.shape_cast %4 : vector<1x1x2x128xf32> to vector<2x128xf32>
    %6 = arith.mulf %5, %1 : vector<2x128xf32>
    %c0_9 = arith.constant 0 : index
    %c1 = arith.constant 1 : index
    %c0_10 = arith.constant 0 : index
    %c0_11 = arith.constant 0 : index
    %7 = vector.load %arg1[%c0_9, %c1, %c0_10, %c0_11] : memref<1x3x2x128xf32, #tpu.memory_space<vmem>>, vector<1x1x2x128xf32>
    %8 = vector.shape_cast %7 : vector<1x1x2x128xf32> to vector<2x128xf32>
    %9 = arith.mulf %8, %1 : vector<2x128xf32>
    %c0_12 = arith.constant 0 : index
    %c2 = arith.constant 2 : index
    %c0_13 = arith.constant 0 : index
    %c0_14 = arith.constant 0 : index
    %10 = vector.load %arg1[%c0_12, %c2, %c0_13, %c0_14] : memref<1x3x2x128xf32, #tpu.memory_space<vmem>>, vector<1x1x2x128xf32>
    %11 = vector.shape_cast %10 : vector<1x1x2x128xf32> to vector<2x128xf32>
    %12 = arith.mulf %11, %1 : vector<2x128xf32>
    %c0_15 = arith.constant 0 : index
    %c0_16 = arith.constant 0 : index
    %c0_17 = arith.constant 0 : index
    %c0_18 = arith.constant 0 : index
    %13 = vector.load %arg2[%c0_15, %c0_16, %c0_17, %c0_18] : memref<1x3x2x128xf32, #tpu.memory_space<vmem>>, vector<1x1x2x128xf32>
    %14 = vector.shape_cast %13 : vector<1x1x2x128xf32> to vector<2x128xf32>
    %15 = arith.mulf %14, %1 : vector<2x128xf32>
    %c0_19 = arith.constant 0 : index
    %c1_20 = arith.constant 1 : index
    %c0_21 = arith.constant 0 : index
    %c0_22 = arith.constant 0 : index
    %16 = vector.load %arg2[%c0_19, %c1_20, %c0_21, %c0_22] : memref<1x3x2x128xf32, #tpu.memory_space<vmem>>, vector<1x1x2x128xf32>
    %17 = vector.shape_cast %16 : vector<1x1x2x128xf32> to vector<2x128xf32>
    %18 = arith.mulf %17, %1 : vector<2x128xf32>
    %c0_23 = arith.constant 0 : index
    %c2_24 = arith.constant 2 : index
    %c0_25 = arith.constant 0 : index
    %c0_26 = arith.constant 0 : index
    %19 = vector.load %arg2[%c0_23, %c2_24, %c0_25, %c0_26] : memref<1x3x2x128xf32, #tpu.memory_space<vmem>>, vector<1x1x2x128xf32>
    %20 = vector.shape_cast %19 : vector<1x1x2x128xf32> to vector<2x128xf32>
    %21 = arith.mulf %20, %1 : vector<2x128xf32>
    %22 = tpu.iota {dimensions = array<i32: 1>} : vector<1x128xi32>
    %cst = arith.constant dense<0.000000e+00> : vector<2xf32>
    %23 = vector.multi_reduction <add>, %1, %cst [1] : vector<2x128xf32> to vector<2xf32>
    %24 = vector.shape_cast %23 : vector<2xf32> to vector<2x1xf32>
    %cst_27 = arith.constant 2.000000e+00 : f32
    %25 = vector.broadcast %cst_27 : f32 to vector<2x1xf32>
    %26 = arith.maximumf %24, %25 : vector<2x1xf32>
    %cst_28 = arith.constant 1.000000e+00 : f32
    %27 = vector.broadcast %cst_28 : f32 to vector<2x1xf32>
    %28 = arith.divf %27, %26 : vector<2x1xf32>
    %cst_29 = arith.constant 1.000000e+00 : f32
    %29 = vector.broadcast %cst_29 : f32 to vector<2x1xf32>
    %30 = arith.subf %26, %29 : vector<2x1xf32>
    %31 = arith.mulf %26, %30 : vector<2x1xf32>
    %cst_30 = arith.constant 1.000000e+00 : f32
    %32 = vector.broadcast %cst_30 : f32 to vector<2x1xf32>
    %33 = arith.divf %32, %31 : vector<2x1xf32>
    %cst_31 = arith.constant 0.000000e+00 : f32
    %34 = vector.broadcast %cst_31 : f32 to vector<2x128xf32>
    %35 = arith.subf %6, %15 : vector<2x128xf32>
    %36 = arith.mulf %35, %35 : vector<2x128xf32>
    %37 = arith.addf %34, %36 : vector<2x128xf32>
    %38 = arith.subf %9, %18 : vector<2x128xf32>
    %39 = arith.mulf %38, %38 : vector<2x128xf32>
    %40 = arith.addf %37, %39 : vector<2x128xf32>
    %41 = arith.subf %12, %21 : vector<2x128xf32>
    %42 = arith.mulf %41, %41 : vector<2x128xf32>
    %43 = arith.addf %40, %42 : vector<2x128xf32>
    %44 = math.sqrt %43 : vector<2x128xf32>
    %cst_32 = arith.constant dense<0.000000e+00> : vector<2xf32>
    %45 = vector.multi_reduction <add>, %44, %cst_32 [1] : vector<2x128xf32> to vector<2xf32>
    %46 = vector.shape_cast %45 : vector<2xf32> to vector<2x1xf32>
    %47 = arith.mulf %46, %28 : vector<2x1xf32>
    %c1_i32 = arith.constant 1 : i32
    %48 = tpu.dynamic_rotate %1 by %c1_i32 dim 1 : vector<2x128xf32>, i32 -> vector<2x128xf32>
    %c127_i32 = arith.constant 127 : i32
    %49 = tpu.dynamic_rotate %1 by %c127_i32 dim 1 : vector<2x128xf32>, i32 -> vector<2x128xf32>
    %c1_i32_33 = arith.constant 1 : i32
    %50 = vector.broadcast %c1_i32_33 : i32 to vector<1x128xi32>
    %51 = arith.cmpi sge, %22, %50 : vector<1x128xi32>
    %c14_i32 = arith.constant 14 : i32
    %52 = vector.broadcast %c14_i32 : i32 to vector<1x128xi32>
    %53 = arith.cmpi sle, %22, %52 : vector<1x128xi32>
    %54 = arith.andi %51, %53 : vector<1x128xi1>
    %55 = arith.extui %54 : vector<1x128xi1> to vector<1x128xi32>
    %56 = arith.sitofp %55 : vector<1x128xi32> to vector<1x128xf32>
    %57 = arith.mulf %1, %48 : vector<2x128xf32>
    %58 = arith.mulf %57, %49 : vector<2x128xf32>
    %59 = vector.broadcast %56 : vector<1x128xf32> to vector<2x128xf32>
    %60 = arith.mulf %58, %59 : vector<2x128xf32>
    %cst_34 = arith.constant 0.000000e+00 : f32
    %61 = vector.broadcast %cst_34 : f32 to vector<2x128xf32>
    %cst_35 = arith.constant 0.000000e+00 : f32
    %62 = vector.broadcast %cst_35 : f32 to vector<2x128xf32>
    %cst_36 = arith.constant 0.000000e+00 : f32
    %63 = vector.broadcast %cst_36 : f32 to vector<2x128xf32>
    %c1_i32_37 = arith.constant 1 : i32
    %64 = tpu.dynamic_rotate %6 by %c1_i32_37 dim 1 : vector<2x128xf32>, i32 -> vector<2x128xf32>
    %65 = arith.subf %64, %6 : vector<2x128xf32>
    %c127_i32_38 = arith.constant 127 : i32
    %66 = tpu.dynamic_rotate %6 by %c127_i32_38 dim 1 : vector<2x128xf32>, i32 -> vector<2x128xf32>
    %67 = arith.subf %66, %6 : vector<2x128xf32>
    %68 = arith.mulf %65, %65 : vector<2x128xf32>
    %69 = arith.addf %61, %68 : vector<2x128xf32>
    %70 = arith.mulf %67, %67 : vector<2x128xf32>
    %71 = arith.addf %62, %70 : vector<2x128xf32>
    %72 = arith.mulf %65, %67 : vector<2x128xf32>
    %73 = arith.addf %63, %72 : vector<2x128xf32>
    %c1_i32_39 = arith.constant 1 : i32
    %74 = tpu.dynamic_rotate %9 by %c1_i32_39 dim 1 : vector<2x128xf32>, i32 -> vector<2x128xf32>
    %75 = arith.subf %74, %9 : vector<2x128xf32>
    %c127_i32_40 = arith.constant 127 : i32
    %76 = tpu.dynamic_rotate %9 by %c127_i32_40 dim 1 : vector<2x128xf32>, i32 -> vector<2x128xf32>
    %77 = arith.subf %76, %9 : vector<2x128xf32>
    %78 = arith.mulf %75, %75 : vector<2x128xf32>
    %79 = arith.addf %69, %78 : vector<2x128xf32>
    %80 = arith.mulf %77, %77 : vector<2x128xf32>
    %81 = arith.addf %71, %80 : vector<2x128xf32>
    %82 = arith.mulf %75, %77 : vector<2x128xf32>
    %83 = arith.addf %73, %82 : vector<2x128xf32>
    %c1_i32_41 = arith.constant 1 : i32
    %84 = tpu.dynamic_rotate %12 by %c1_i32_41 dim 1 : vector<2x128xf32>, i32 -> vector<2x128xf32>
    %85 = arith.subf %84, %12 : vector<2x128xf32>
    %c127_i32_42 = arith.constant 127 : i32
    %86 = tpu.dynamic_rotate %12 by %c127_i32_42 dim 1 : vector<2x128xf32>, i32 -> vector<2x128xf32>
    %87 = arith.subf %86, %12 : vector<2x128xf32>
    %88 = arith.mulf %85, %85 : vector<2x128xf32>
    %89 = arith.addf %79, %88 : vector<2x128xf32>
    %90 = arith.mulf %87, %87 : vector<2x128xf32>
    %91 = arith.addf %81, %90 : vector<2x128xf32>
    %92 = arith.mulf %85, %87 : vector<2x128xf32>
    %93 = arith.addf %83, %92 : vector<2x128xf32>
    %94 = arith.mulf %89, %91 : vector<2x128xf32>
    %cst_43 = arith.constant 9.99999996E-13 : f32
    %95 = vector.broadcast %cst_43 : f32 to vector<2x128xf32>
    %96 = arith.maximumf %94, %95 : vector<2x128xf32>
    %97 = math.rsqrt %96 : vector<2x128xf32>
    %98 = arith.mulf %93, %97 : vector<2x128xf32>
    %cst_44 = arith.constant 0.000000e+00 : f32
    %99 = vector.broadcast %cst_44 : f32 to vector<2x128xf32>
    %cst_45 = arith.constant 0.000000e+00 : f32
    %100 = vector.broadcast %cst_45 : f32 to vector<2x128xf32>
    %cst_46 = arith.constant 0.000000e+00 : f32
    %101 = vector.broadcast %cst_46 : f32 to vector<2x128xf32>
    %c1_i32_47 = arith.constant 1 : i32
    %102 = tpu.dynamic_rotate %15 by %c1_i32_47 dim 1 : vector<2x128xf32>, i32 -> vector<2x128xf32>
    %103 = arith.subf %102, %15 : vector<2x128xf32>
    %c127_i32_48 = arith.constant 127 : i32
    %104 = tpu.dynamic_rotate %15 by %c127_i32_48 dim 1 : vector<2x128xf32>, i32 -> vector<2x128xf32>
    %105 = arith.subf %104, %15 : vector<2x128xf32>
    %106 = arith.mulf %103, %103 : vector<2x128xf32>
    %107 = arith.addf %99, %106 : vector<2x128xf32>
    %108 = arith.mulf %105, %105 : vector<2x128xf32>
    %109 = arith.addf %100, %108 : vector<2x128xf32>
    %110 = arith.mulf %103, %105 : vector<2x128xf32>
    %111 = arith.addf %101, %110 : vector<2x128xf32>
    %c1_i32_49 = arith.constant 1 : i32
    %112 = tpu.dynamic_rotate %18 by %c1_i32_49 dim 1 : vector<2x128xf32>, i32 -> vector<2x128xf32>
    %113 = arith.subf %112, %18 : vector<2x128xf32>
    %c127_i32_50 = arith.constant 127 : i32
    %114 = tpu.dynamic_rotate %18 by %c127_i32_50 dim 1 : vector<2x128xf32>, i32 -> vector<2x128xf32>
    %115 = arith.subf %114, %18 : vector<2x128xf32>
    %116 = arith.mulf %113, %113 : vector<2x128xf32>
    %117 = arith.addf %107, %116 : vector<2x128xf32>
    %118 = arith.mulf %115, %115 : vector<2x128xf32>
    %119 = arith.addf %109, %118 : vector<2x128xf32>
    %120 = arith.mulf %113, %115 : vector<2x128xf32>
    %121 = arith.addf %111, %120 : vector<2x128xf32>
    %c1_i32_51 = arith.constant 1 : i32
    %122 = tpu.dynamic_rotate %21 by %c1_i32_51 dim 1 : vector<2x128xf32>, i32 -> vector<2x128xf32>
    %123 = arith.subf %122, %21 : vector<2x128xf32>
    %c127_i32_52 = arith.constant 127 : i32
    %124 = tpu.dynamic_rotate %21 by %c127_i32_52 dim 1 : vector<2x128xf32>, i32 -> vector<2x128xf32>
    %125 = arith.subf %124, %21 : vector<2x128xf32>
    %126 = arith.mulf %123, %123 : vector<2x128xf32>
    %127 = arith.addf %117, %126 : vector<2x128xf32>
    %128 = arith.mulf %125, %125 : vector<2x128xf32>
    %129 = arith.addf %119, %128 : vector<2x128xf32>
    %130 = arith.mulf %123, %125 : vector<2x128xf32>
    %131 = arith.addf %121, %130 : vector<2x128xf32>
    %132 = arith.mulf %127, %129 : vector<2x128xf32>
    %cst_53 = arith.constant 9.99999996E-13 : f32
    %133 = vector.broadcast %cst_53 : f32 to vector<2x128xf32>
    %134 = arith.maximumf %132, %133 : vector<2x128xf32>
    %135 = math.rsqrt %134 : vector<2x128xf32>
    %136 = arith.mulf %131, %135 : vector<2x128xf32>
    %137 = arith.subf %98, %136 : vector<2x128xf32>
    %138 = math.absf %137 : vector<2x128xf32>
    %139 = arith.mulf %138, %60 : vector<2x128xf32>
    %cst_54 = arith.constant dense<0.000000e+00> : vector<2xf32>
    %140 = vector.multi_reduction <add>, %139, %cst_54 [1] : vector<2x128xf32> to vector<2xf32>
    %141 = vector.shape_cast %140 : vector<2xf32> to vector<2x1xf32>
    %142 = arith.mulf %141, %28 : vector<2x1xf32>
    %cst_55 = arith.constant 5.000000e-01 : f32
    %143 = vector.broadcast %cst_55 : f32 to vector<2x128xf32>
    %144 = arith.cmpf ogt, %1, %143 : vector<2x128xf32>
    %cst_56 = arith.constant -1.000000e+00 : f32
    %145 = vector.broadcast %cst_56 : f32 to vector<2x128xf32>
    %146 = arith.mulf %44, %145 : vector<2x128xf32>
    %147 = math.exp %146 : vector<2x128xf32>
    %cst_57 = arith.constant 5.000000e-01 : f32
    %148 = vector.broadcast %cst_57 : f32 to vector<2x128xf32>
    %149 = arith.select %144, %147, %148 : vector<2x128xi1>, vector<2x128xf32>
    %cst_58 = arith.constant 0.000000e+00 : f32
    %150 = vector.shape_cast %3 : vector<1x128xf32> to vector<1x128xf32>
    %151 = vector.broadcast %150 : vector<1x128xf32> to vector<2x128xf32>
    %152 = vector.broadcast %cst_58 : f32 to vector<2x128xf32>
    %153 = arith.select %144, %151, %152 : vector<2x128xi1>, vector<2x128xf32>
    %cst_59 = arith.constant 0.000000e+00 : f32
    %154 = vector.broadcast %cst_59 : f32 to vector<2x128xf32>
    %155 = arith.maximumf %153, %154 : vector<2x128xf32>
    %156 = arith.mulf %153, %149 : vector<2x128xf32>
    %157 = arith.subf %155, %156 : vector<2x128xf32>
    %158 = math.absf %153 : vector<2x128xf32>
    %cst_60 = arith.constant 0.000000e+00 : f32
    %159 = vector.broadcast %cst_60 : f32 to vector<2x128xf32>
    %160 = arith.subf %159, %158 : vector<2x128xf32>
    %161 = math.exp %160 : vector<2x128xf32>
    %cst_61 = arith.constant 1.000000e+00 : f32
    %162 = vector.broadcast %cst_61 : f32 to vector<2x128xf32>
    %163 = arith.addf %162, %161 : vector<2x128xf32>
    %164 = math.log %163 : vector<2x128xf32>
    %165 = arith.addf %157, %164 : vector<2x128xf32>
    %c16_i32 = arith.constant 16 : i32
    %166 = vector.broadcast %c16_i32 : i32 to vector<1x128xi32>
    %167 = arith.cmpi slt, %22, %166 : vector<1x128xi32>
    %168 = arith.extui %167 : vector<1x128xi1> to vector<1x128xi32>
    %169 = arith.sitofp %168 : vector<1x128xi32> to vector<1x128xf32>
    %170 = vector.broadcast %169 : vector<1x128xf32> to vector<2x128xf32>
    %171 = arith.mulf %165, %170 : vector<2x128xf32>
    %cst_62 = arith.constant dense<0.000000e+00> : vector<2xf32>
    %172 = vector.multi_reduction <add>, %171, %cst_62 [1] : vector<2x128xf32> to vector<2xf32>
    %173 = vector.shape_cast %172 : vector<2xf32> to vector<2x1xf32>
    %174 = arith.mulf %173, %28 : vector<2x1xf32>
    %cst_63 = arith.constant 0.000000e+00 : f32
    %175 = vector.broadcast %cst_63 : f32 to vector<2x128xf32>
    %cst_64 = arith.constant 0.000000e+00 : f32
    %176 = vector.broadcast %cst_64 : f32 to vector<2x128xf32>
    %177 = arith.mulf %6, %6 : vector<2x128xf32>
    %178 = arith.addf %175, %177 : vector<2x128xf32>
    %179 = arith.mulf %15, %15 : vector<2x128xf32>
    %180 = arith.addf %176, %179 : vector<2x128xf32>
    %181 = arith.mulf %9, %9 : vector<2x128xf32>
    %182 = arith.addf %178, %181 : vector<2x128xf32>
    %183 = arith.mulf %18, %18 : vector<2x128xf32>
    %184 = arith.addf %180, %183 : vector<2x128xf32>
    %185 = arith.mulf %12, %12 : vector<2x128xf32>
    %186 = arith.addf %182, %185 : vector<2x128xf32>
    %187 = arith.mulf %21, %21 : vector<2x128xf32>
    %188 = arith.addf %184, %187 : vector<2x128xf32>
    %189 = tpu.iota {dimensions = array<i32: 1>} : vector<2x4xi32>
    %190 = tpu.iota {dimensions = array<i32: 0>} : vector<2x4xi32>
    %c0_i32 = arith.constant 0 : i32
    %191 = vector.broadcast %c0_i32 : i32 to vector<2x4xi32>
    %192 = arith.cmpi eq, %189, %191 : vector<2x4xi32>
    %cst_65 = arith.constant 0.000000e+00 : f32
    %193 = vector.shape_cast %47 : vector<2x1xf32> to vector<2x1xf32>
    %194 = vector.broadcast %193 : vector<2x1xf32> to vector<2x4xf32>
    %195 = vector.broadcast %cst_65 : f32 to vector<2x4xf32>
    %196 = arith.select %192, %194, %195 : vector<2x4xi1>, vector<2x4xf32>
    %c2_i32 = arith.constant 2 : i32
    %197 = vector.broadcast %c2_i32 : i32 to vector<2x4xi32>
    %198 = arith.cmpi eq, %189, %197 : vector<2x4xi32>
    %cst_66 = arith.constant 0.000000e+00 : f32
    %199 = vector.shape_cast %142 : vector<2x1xf32> to vector<2x1xf32>
    %200 = vector.broadcast %199 : vector<2x1xf32> to vector<2x4xf32>
    %201 = vector.broadcast %cst_66 : f32 to vector<2x4xf32>
    %202 = arith.select %198, %200, %201 : vector<2x4xi1>, vector<2x4xf32>
    %203 = arith.addf %196, %202 : vector<2x4xf32>
    %c3_i32 = arith.constant 3 : i32
    %204 = vector.broadcast %c3_i32 : i32 to vector<2x4xi32>
    %205 = arith.cmpi eq, %189, %204 : vector<2x4xi32>
    %cst_67 = arith.constant 0.000000e+00 : f32
    %206 = vector.shape_cast %174 : vector<2x1xf32> to vector<2x1xf32>
    %207 = vector.broadcast %206 : vector<2x1xf32> to vector<2x4xf32>
    %208 = vector.broadcast %cst_67 : f32 to vector<2x4xf32>
    %209 = arith.select %205, %207, %208 : vector<2x4xi1>, vector<2x4xf32>
    %210 = arith.addf %203, %209 : vector<2x4xf32>
    %cst_68 = arith.constant 0.000000e+00 : f32
    %211 = vector.broadcast %cst_68 : f32 to vector<3x128xf32>
    %c5 = arith.constant 5 : index
    %c0_69 = arith.constant 0 : index
    %212 = vector.load %arg6[%c5, %c0_69] : memref<8x128xf32, #tpu.memory_space<vmem>>, vector<3x128xf32>
    tpu.vector_store %arg6[%c5, %c0_69], %211 {strides = array<i32>} : memref<8x128xf32, #tpu.memory_space<vmem>>, vector<3x128xf32>,
    %c5_70 = arith.constant 5 : index
    %c0_71 = arith.constant 0 : index
    %213 = vector.load %arg7[%c5_70, %c0_71] : memref<8x128xf32, #tpu.memory_space<vmem>>, vector<3x128xf32>
    tpu.vector_store %arg7[%c5_70, %c0_71], %211 {strides = array<i32>} : memref<8x128xf32, #tpu.memory_space<vmem>>, vector<3x128xf32>,
    %c5_72 = arith.constant 5 : index
    %c0_73 = arith.constant 0 : index
    %214 = vector.load %arg8[%c5_72, %c0_73] : memref<8x128xf32, #tpu.memory_space<vmem>>, vector<3x128xf32>
    tpu.vector_store %arg8[%c5_72, %c0_73], %211 {strides = array<i32>} : memref<8x128xf32, #tpu.memory_space<vmem>>, vector<3x128xf32>,
    %c5_74 = arith.constant 5 : index
    %c0_75 = arith.constant 0 : index
    %215 = vector.load %arg9[%c5_74, %c0_75] : memref<8x128xf32, #tpu.memory_space<vmem>>, vector<3x128xf32>
    tpu.vector_store %arg9[%c5_74, %c0_75], %211 {strides = array<i32>} : memref<8x128xf32, #tpu.memory_space<vmem>>, vector<3x128xf32>,
    %216 = vector.extract_strided_slice %1 {offsets = [0, 0], sizes = [1, 128], strides = [1, 1]} : vector<2x128xf32> to vector<1x128xf32>
    %217 = vector.extract_strided_slice %186 {offsets = [0, 0], sizes = [1, 128], strides = [1, 1]} : vector<2x128xf32> to vector<1x128xf32>
    %218 = vector.extract_strided_slice %188 {offsets = [0, 0], sizes = [1, 128], strides = [1, 1]} : vector<2x128xf32> to vector<1x128xf32>
    %219 = vector.extract_strided_slice %6 {offsets = [0, 0], sizes = [1, 128], strides = [1, 1]} : vector<2x128xf32> to vector<1x128xf32>
    %c0_76 = arith.constant 0 : index
    %c0_77 = arith.constant 0 : index
    %220 = vector.load %arg6[%c0_76, %c0_77] : memref<8x128xf32, #tpu.memory_space<vmem>>, vector<1x128xf32>
    tpu.vector_store %arg6[%c0_76, %c0_77], %219 {strides = array<i32>} : memref<8x128xf32, #tpu.memory_space<vmem>>, vector<1x128xf32>,
    %221 = vector.extract_strided_slice %6 {offsets = [0, 0], sizes = [1, 128], strides = [1, 1]} : vector<2x128xf32> to vector<1x128xf32>
    %cst_78 = arith.constant -2.000000e+00 : f32
    %222 = vector.broadcast %cst_78 : f32 to vector<1x128xf32>
    %223 = arith.mulf %222, %221 : vector<1x128xf32>
    %c0_79 = arith.constant 0 : index
    %c0_80 = arith.constant 0 : index
    %224 = vector.load %arg7[%c0_79, %c0_80] : memref<8x128xf32, #tpu.memory_space<vmem>>, vector<1x128xf32>
    tpu.vector_store %arg7[%c0_79, %c0_80], %223 {strides = array<i32>} : memref<8x128xf32, #tpu.memory_space<vmem>>, vector<1x128xf32>,
    %225 = vector.extract_strided_slice %15 {offsets = [0, 0], sizes = [1, 128], strides = [1, 1]} : vector<2x128xf32> to vector<1x128xf32>
    %c0_81 = arith.constant 0 : index
    %c0_82 = arith.constant 0 : index
    %226 = vector.load %arg8[%c0_81, %c0_82] : memref<8x128xf32, #tpu.memory_space<vmem>>, vector<1x128xf32>
    tpu.vector_store %arg8[%c0_81, %c0_82], %225 {strides = array<i32>} : memref<8x128xf32, #tpu.memory_space<vmem>>, vector<1x128xf32>,
    %227 = vector.extract_strided_slice %15 {offsets = [0, 0], sizes = [1, 128], strides = [1, 1]} : vector<2x128xf32> to vector<1x128xf32>
    %cst_83 = arith.constant -2.000000e+00 : f32
    %228 = vector.broadcast %cst_83 : f32 to vector<1x128xf32>
    %229 = arith.mulf %228, %227 : vector<1x128xf32>
    %c0_84 = arith.constant 0 : index
    %c0_85 = arith.constant 0 : index
    %230 = vector.load %arg9[%c0_84, %c0_85] : memref<8x128xf32, #tpu.memory_space<vmem>>, vector<1x128xf32>
    tpu.vector_store %arg9[%c0_84, %c0_85], %229 {strides = array<i32>} : memref<8x128xf32, #tpu.memory_space<vmem>>, vector<1x128xf32>,
    %231 = vector.extract_strided_slice %9 {offsets = [0, 0], sizes = [1, 128], strides = [1, 1]} : vector<2x128xf32> to vector<1x128xf32>
    %c1_86 = arith.constant 1 : index
    %c0_87 = arith.constant 0 : index
    %232 = vector.load %arg6[%c1_86, %c0_87] : memref<8x128xf32, #tpu.memory_space<vmem>>, vector<1x128xf32>
    tpu.vector_store %arg6[%c1_86, %c0_87], %231 {strides = array<i32>} : memref<8x128xf32, #tpu.memory_space<vmem>>, vector<1x128xf32>,
    %233 = vector.extract_strided_slice %9 {offsets = [0, 0], sizes = [1, 128], strides = [1, 1]} : vector<2x128xf32> to vector<1x128xf32>
    %cst_88 = arith.constant -2.000000e+00 : f32
    %234 = vector.broadcast %cst_88 : f32 to vector<1x128xf32>
    %235 = arith.mulf %234, %233 : vector<1x128xf32>
    %c1_89 = arith.constant 1 : index
    %c0_90 = arith.constant 0 : index
    %236 = vector.load %arg7[%c1_89, %c0_90] : memref<8x128xf32, #tpu.memory_space<vmem>>, vector<1x128xf32>
    tpu.vector_store %arg7[%c1_89, %c0_90], %235 {strides = array<i32>} : memref<8x128xf32, #tpu.memory_space<vmem>>, vector<1x128xf32>,
    %237 = vector.extract_strided_slice %18 {offsets = [0, 0], sizes = [1, 128], strides = [1, 1]} : vector<2x128xf32> to vector<1x128xf32>
    %c1_91 = arith.constant 1 : index
    %c0_92 = arith.constant 0 : index
    %238 = vector.load %arg8[%c1_91, %c0_92] : memref<8x128xf32, #tpu.memory_space<vmem>>, vector<1x128xf32>
    tpu.vector_store %arg8[%c1_91, %c0_92], %237 {strides = array<i32>} : memref<8x128xf32, #tpu.memory_space<vmem>>, vector<1x128xf32>,
    %239 = vector.extract_strided_slice %18 {offsets = [0, 0], sizes = [1, 128], strides = [1, 1]} : vector<2x128xf32> to vector<1x128xf32>
    %cst_93 = arith.constant -2.000000e+00 : f32
    %240 = vector.broadcast %cst_93 : f32 to vector<1x128xf32>
    %241 = arith.mulf %240, %239 : vector<1x128xf32>
    %c1_94 = arith.constant 1 : index
    %c0_95 = arith.constant 0 : index
    %242 = vector.load %arg9[%c1_94, %c0_95] : memref<8x128xf32, #tpu.memory_space<vmem>>, vector<1x128xf32>
    tpu.vector_store %arg9[%c1_94, %c0_95], %241 {strides = array<i32>} : memref<8x128xf32, #tpu.memory_space<vmem>>, vector<1x128xf32>,
    %243 = vector.extract_strided_slice %12 {offsets = [0, 0], sizes = [1, 128], strides = [1, 1]} : vector<2x128xf32> to vector<1x128xf32>
    %c2_96 = arith.constant 2 : index
    %c0_97 = arith.constant 0 : index
    %244 = vector.load %arg6[%c2_96, %c0_97] : memref<8x128xf32, #tpu.memory_space<vmem>>, vector<1x128xf32>
    tpu.vector_store %arg6[%c2_96, %c0_97], %243 {strides = array<i32>} : memref<8x128xf32, #tpu.memory_space<vmem>>, vector<1x128xf32>,
    %245 = vector.extract_strided_slice %12 {offsets = [0, 0], sizes = [1, 128], strides = [1, 1]} : vector<2x128xf32> to vector<1x128xf32>
    %cst_98 = arith.constant -2.000000e+00 : f32
    %246 = vector.broadcast %cst_98 : f32 to vector<1x128xf32>
    %247 = arith.mulf %246, %245 : vector<1x128xf32>
    %c2_99 = arith.constant 2 : index
    %c0_100 = arith.constant 0 : index
    %248 = vector.load %arg7[%c2_99, %c0_100] : memref<8x128xf32, #tpu.memory_space<vmem>>, vector<1x128xf32>
    tpu.vector_store %arg7[%c2_99, %c0_100], %247 {strides = array<i32>} : memref<8x128xf32, #tpu.memory_space<vmem>>, vector<1x128xf32>,
    %249 = vector.extract_strided_slice %21 {offsets = [0, 0], sizes = [1, 128], strides = [1, 1]} : vector<2x128xf32> to vector<1x128xf32>
    %c2_101 = arith.constant 2 : index
    %c0_102 = arith.constant 0 : index
    %250 = vector.load %arg8[%c2_101, %c0_102] : memref<8x128xf32, #tpu.memory_space<vmem>>, vector<1x128xf32>
    tpu.vector_store %arg8[%c2_101, %c0_102], %249 {strides = array<i32>} : memref<8x128xf32, #tpu.memory_space<vmem>>, vector<1x128xf32>,
    %251 = vector.extract_strided_slice %21 {offsets = [0, 0], sizes = [1, 128], strides = [1, 1]} : vector<2x128xf32> to vector<1x128xf32>
    %cst_103 = arith.constant -2.000000e+00 : f32
    %252 = vector.broadcast %cst_103 : f32 to vector<1x128xf32>
    %253 = arith.mulf %252, %251 : vector<1x128xf32>
    %c2_104 = arith.constant 2 : index
    %c0_105 = arith.constant 0 : index
    %254 = vector.load %arg9[%c2_104, %c0_105] : memref<8x128xf32, #tpu.memory_space<vmem>>, vector<1x128xf32>
    tpu.vector_store %arg9[%c2_104, %c0_105], %253 {strides = array<i32>} : memref<8x128xf32, #tpu.memory_space<vmem>>, vector<1x128xf32>,
    %c3 = arith.constant 3 : index
    %c0_106 = arith.constant 0 : index
    %255 = vector.load %arg6[%c3, %c0_106] : memref<8x128xf32, #tpu.memory_space<vmem>>, vector<1x128xf32>
    tpu.vector_store %arg6[%c3, %c0_106], %217 {strides = array<i32>} : memref<8x128xf32, #tpu.memory_space<vmem>>, vector<1x128xf32>,
    %c4 = arith.constant 4 : index
    %c0_107 = arith.constant 0 : index
    %256 = vector.load %arg6[%c4, %c0_107] : memref<8x128xf32, #tpu.memory_space<vmem>>, vector<1x128xf32>
    tpu.vector_store %arg6[%c4, %c0_107], %216 {strides = array<i32>} : memref<8x128xf32, #tpu.memory_space<vmem>>, vector<1x128xf32>,
    %c3_108 = arith.constant 3 : index
    %c0_109 = arith.constant 0 : index
    %257 = vector.load %arg7[%c3_108, %c0_109] : memref<8x128xf32, #tpu.memory_space<vmem>>, vector<1x128xf32>
    tpu.vector_store %arg7[%c3_108, %c0_109], %216 {strides = array<i32>} : memref<8x128xf32, #tpu.memory_space<vmem>>, vector<1x128xf32>,
    %c4_110 = arith.constant 4 : index
    %c0_111 = arith.constant 0 : index
    %258 = vector.load %arg7[%c4_110, %c0_111] : memref<8x128xf32, #tpu.memory_space<vmem>>, vector<1x128xf32>
    tpu.vector_store %arg7[%c4_110, %c0_111], %217 {strides = array<i32>} : memref<8x128xf32, #tpu.memory_space<vmem>>, vector<1x128xf32>,
    %c3_112 = arith.constant 3 : index
    %c0_113 = arith.constant 0 : index
    %259 = vector.load %arg8[%c3_112, %c0_113] : memref<8x128xf32, #tpu.memory_space<vmem>>, vector<1x128xf32>
    tpu.vector_store %arg8[%c3_112, %c0_113], %218 {strides = array<i32>} : memref<8x128xf32, #tpu.memory_space<vmem>>, vector<1x128xf32>,
    %c4_114 = arith.constant 4 : index
    %c0_115 = arith.constant 0 : index
    %260 = vector.load %arg8[%c4_114, %c0_115] : memref<8x128xf32, #tpu.memory_space<vmem>>, vector<1x128xf32>
    tpu.vector_store %arg8[%c4_114, %c0_115], %216 {strides = array<i32>} : memref<8x128xf32, #tpu.memory_space<vmem>>, vector<1x128xf32>,
    %c3_116 = arith.constant 3 : index
    %c0_117 = arith.constant 0 : index
    %261 = vector.load %arg9[%c3_116, %c0_117] : memref<8x128xf32, #tpu.memory_space<vmem>>, vector<1x128xf32>
    tpu.vector_store %arg9[%c3_116, %c0_117], %216 {strides = array<i32>} : memref<8x128xf32, #tpu.memory_space<vmem>>, vector<1x128xf32>,
    %c4_118 = arith.constant 4 : index
    %c0_119 = arith.constant 0 : index
    %262 = vector.load %arg9[%c4_118, %c0_119] : memref<8x128xf32, #tpu.memory_space<vmem>>, vector<1x128xf32>
    tpu.vector_store %arg9[%c4_118, %c0_119], %218 {strides = array<i32>} : memref<8x128xf32, #tpu.memory_space<vmem>>, vector<1x128xf32>,
    %cst_120 = arith.constant 0.000000e+00 : f32
    %263 = vector.broadcast %cst_120 : f32 to vector<8x128xf32>
    %c0_121 = arith.constant 0 : index
    %c0_122 = arith.constant 0 : index
    %264 = vector.load %arg10[%c0_121, %c0_122] : memref<8x128xf32, #tpu.memory_space<vmem>>, vector<8x128xf32>
    tpu.vector_store %arg10[%c0_121, %c0_122], %263 {strides = array<i32>} : memref<8x128xf32, #tpu.memory_space<vmem>>, vector<8x128xf32>,
    %c0_i32_123 = arith.constant 0 : i32
    %c128_i32 = arith.constant 128 : i32
    %265 = arith.muli %c0_i32_123, %c128_i32 : i32
    %266 = tpu.assume_multiple %265, 128 : i32
    %c0_124 = arith.constant 0 : index
    %267 = arith.index_cast %266 : i32 to index
    %268 = vector.load %arg6[%c0_124, %267] : memref<8x128xf32, #tpu.memory_space<vmem>>, vector<8x128xf32>
    %c0_125 = arith.constant 0 : index
    %269 = arith.index_cast %266 : i32 to index
    %270 = vector.load %arg8[%c0_125, %269] : memref<8x128xf32, #tpu.memory_space<vmem>>, vector<8x128xf32>
    %c0_126 = arith.constant 0 : index
    %c0_127 = arith.constant 0 : index
    %271 = vector.load %arg7[%c0_126, %c0_127] : memref<8x128xf32, #tpu.memory_space<vmem>>, vector<8x128xf32>
    %cst_128 = arith.constant dense<0.000000e+00> : vector<128x128xf32>
    %272 = tpu.matmul %268, %271, %cst_128 {dimension_numbers = #tpu.dot_dimension_numbers<[0], [0], [1], [1], [0, 1, 1, 1], [], []>} : vector<8x128xf32>, vector<8x128xf32>, vector<128x128xf32> -> vector<128x128xf32>
    %cst_129 = arith.constant 0.000000e+00 : f32
    %273 = vector.broadcast %cst_129 : f32 to vector<128x128xf32>
    %274 = arith.maximumf %272, %273 : vector<128x128xf32>
    %c0_130 = arith.constant 0 : index
    %c0_131 = arith.constant 0 : index
    %275 = vector.load %arg9[%c0_130, %c0_131] : memref<8x128xf32, #tpu.memory_space<vmem>>, vector<8x128xf32>
    %cst_132 = arith.constant dense<0.000000e+00> : vector<128x128xf32>
    %276 = tpu.matmul %270, %275, %cst_132 {dimension_numbers = #tpu.dot_dimension_numbers<[0], [0], [1], [1], [0, 1, 1, 1], [], []>} : vector<8x128xf32>, vector<8x128xf32>, vector<128x128xf32> -> vector<128x128xf32>
    %cst_133 = arith.constant 0.000000e+00 : f32
    %277 = vector.broadcast %cst_133 : f32 to vector<128x128xf32>
    %278 = arith.maximumf %276, %277 : vector<128x128xf32>
    %279 = arith.addf %274, %278 : vector<128x128xf32>
    %280 = arith.mulf %274, %278 : vector<128x128xf32>
    %281 = math.sqrt %280 : vector<128x128xf32>
    %cst_134 = arith.constant 2.000000e+00 : f32
    %282 = vector.broadcast %cst_134 : f32 to vector<128x128xf32>
    %283 = arith.mulf %282, %281 : vector<128x128xf32>
    %284 = arith.subf %279, %283 : vector<128x128xf32>
    %285 = vector.extract_strided_slice %284 {offsets = [0, 0], sizes = [8, 128], strides = [1, 1]} : vector<128x128xf32> to vector<8x128xf32>
    %286 = vector.extract_strided_slice %284 {offsets = [8, 0], sizes = [8, 128], strides = [1, 1]} : vector<128x128xf32> to vector<8x128xf32>
    %287 = arith.addf %285, %286 : vector<8x128xf32>
    %288 = vector.extract_strided_slice %284 {offsets = [16, 0], sizes = [8, 128], strides = [1, 1]} : vector<128x128xf32> to vector<8x128xf32>
    %289 = arith.addf %287, %288 : vector<8x128xf32>
    %290 = vector.extract_strided_slice %284 {offsets = [24, 0], sizes = [8, 128], strides = [1, 1]} : vector<128x128xf32> to vector<8x128xf32>
    %291 = arith.addf %289, %290 : vector<8x128xf32>
    %292 = vector.extract_strided_slice %284 {offsets = [32, 0], sizes = [8, 128], strides = [1, 1]} : vector<128x128xf32> to vector<8x128xf32>
    %293 = arith.addf %291, %292 : vector<8x128xf32>
    %294 = vector.extract_strided_slice %284 {offsets = [40, 0], sizes = [8, 128], strides = [1, 1]} : vector<128x128xf32> to vector<8x128xf32>
    %295 = arith.addf %293, %294 : vector<8x128xf32>
    %296 = vector.extract_strided_slice %284 {offsets = [48, 0], sizes = [8, 128], strides = [1, 1]} : vector<128x128xf32> to vector<8x128xf32>
    %297 = arith.addf %295, %296 : vector<8x128xf32>
    %298 = vector.extract_strided_slice %284 {offsets = [56, 0], sizes = [8, 128], strides = [1, 1]} : vector<128x128xf32> to vector<8x128xf32>
    %299 = arith.addf %297, %298 : vector<8x128xf32>
    %300 = vector.extract_strided_slice %284 {offsets = [64, 0], sizes = [8, 128], strides = [1, 1]} : vector<128x128xf32> to vector<8x128xf32>
    %301 = arith.addf %299, %300 : vector<8x128xf32>
    %302 = vector.extract_strided_slice %284 {offsets = [72, 0], sizes = [8, 128], strides = [1, 1]} : vector<128x128xf32> to vector<8x128xf32>
    %303 = arith.addf %301, %302 : vector<8x128xf32>
    %304 = vector.extract_strided_slice %284 {offsets = [80, 0], sizes = [8, 128], strides = [1, 1]} : vector<128x128xf32> to vector<8x128xf32>
    %305 = arith.addf %303, %304 : vector<8x128xf32>
    %306 = vector.extract_strided_slice %284 {offsets = [88, 0], sizes = [8, 128], strides = [1, 1]} : vector<128x128xf32> to vector<8x128xf32>
    %307 = arith.addf %305, %306 : vector<8x128xf32>
    %308 = vector.extract_strided_slice %284 {offsets = [96, 0], sizes = [8, 128], strides = [1, 1]} : vector<128x128xf32> to vector<8x128xf32>
    %309 = arith.addf %307, %308 : vector<8x128xf32>
    %310 = vector.extract_strided_slice %284 {offsets = [104, 0], sizes = [8, 128], strides = [1, 1]} : vector<128x128xf32> to vector<8x128xf32>
    %311 = arith.addf %309, %310 : vector<8x128xf32>
    %312 = vector.extract_strided_slice %284 {offsets = [112, 0], sizes = [8, 128], strides = [1, 1]} : vector<128x128xf32> to vector<8x128xf32>
    %313 = arith.addf %311, %312 : vector<8x128xf32>
    %314 = vector.extract_strided_slice %284 {offsets = [120, 0], sizes = [8, 128], strides = [1, 1]} : vector<128x128xf32> to vector<8x128xf32>
    %315 = arith.addf %313, %314 : vector<8x128xf32>
    %c0_135 = arith.constant 0 : index
    %c0_136 = arith.constant 0 : index
    %316 = vector.load %arg10[%c0_135, %c0_136] : memref<8x128xf32, #tpu.memory_space<vmem>>, vector<8x128xf32>
    %317 = arith.addf %316, %315 : vector<8x128xf32>
    %c0_137 = arith.constant 0 : index
    %c0_138 = arith.constant 0 : index
    %318 = vector.load %arg10[%c0_137, %c0_138] : memref<8x128xf32, #tpu.memory_space<vmem>>, vector<8x128xf32>
    tpu.vector_store %arg10[%c0_137, %c0_138], %317 {strides = array<i32>} : memref<8x128xf32, #tpu.memory_space<vmem>>, vector<8x128xf32>,
    %c1_i32_139 = arith.constant 1 : i32
    %c0_140 = arith.constant 0 : index
    %c0_141 = arith.constant 0 : index
    %319 = vector.load %arg10[%c0_140, %c0_141] : memref<8x128xf32, #tpu.memory_space<vmem>>, vector<8x128xf32>
    %320 = vector.shape_cast %319 : vector<8x128xf32> to vector<1x8x128xf32>
    %cst_142 = arith.constant dense<0.000000e+00> : vector<1xf32>
    %321 = vector.multi_reduction <add>, %320, %cst_142 [1, 2] : vector<1x8x128xf32> to vector<1xf32>
    %322 = vector.shape_cast %321 : vector<1xf32> to vector<1x1x1xf32>
    %323 = vector.extract %322[0, 0, 0] : f32 from vector<1x1x1xf32>
    %c1_i32_143 = arith.constant 1 : i32
    %324 = vector.broadcast %c1_i32_143 : i32 to vector<2x4xi32>
    %325 = arith.cmpi eq, %189, %324 : vector<2x4xi32>
    %c0_i32_144 = arith.constant 0 : i32
    %326 = vector.broadcast %c0_i32_144 : i32 to vector<2x4xi32>
    %327 = arith.cmpi eq, %190, %326 : vector<2x4xi32>
    %328 = arith.andi %325, %327 : vector<2x4xi1>
    %cst_145 = arith.constant 0.000000e+00 : f32
    %329 = vector.broadcast %323 : f32 to vector<2x4xf32>
    %330 = vector.broadcast %cst_145 : f32 to vector<2x4xf32>
    %331 = arith.select %328, %329, %330 : vector<2x4xi1>, vector<2x4xf32>
    %332 = vector.broadcast %33 : vector<2x1xf32> to vector<2x4xf32>
    %333 = arith.mulf %331, %332 : vector<2x4xf32>
    %334 = arith.addf %210, %333 : vector<2x4xf32>
    %335 = vector.extract_strided_slice %1 {offsets = [1, 0], sizes = [1, 128], strides = [1, 1]} : vector<2x128xf32> to vector<1x128xf32>
    %336 = vector.extract_strided_slice %186 {offsets = [1, 0], sizes = [1, 128], strides = [1, 1]} : vector<2x128xf32> to vector<1x128xf32>
    %337 = vector.extract_strided_slice %188 {offsets = [1, 0], sizes = [1, 128], strides = [1, 1]} : vector<2x128xf32> to vector<1x128xf32>
    %338 = vector.extract_strided_slice %6 {offsets = [1, 0], sizes = [1, 128], strides = [1, 1]} : vector<2x128xf32> to vector<1x128xf32>
    %c0_146 = arith.constant 0 : index
    %c0_147 = arith.constant 0 : index
    %339 = vector.load %arg6[%c0_146, %c0_147] : memref<8x128xf32, #tpu.memory_space<vmem>>, vector<1x128xf32>
    tpu.vector_store %arg6[%c0_146, %c0_147], %338 {strides = array<i32>} : memref<8x128xf32, #tpu.memory_space<vmem>>, vector<1x128xf32>,
    %340 = vector.extract_strided_slice %6 {offsets = [1, 0], sizes = [1, 128], strides = [1, 1]} : vector<2x128xf32> to vector<1x128xf32>
    %cst_148 = arith.constant -2.000000e+00 : f32
    %341 = vector.broadcast %cst_148 : f32 to vector<1x128xf32>
    %342 = arith.mulf %341, %340 : vector<1x128xf32>
    %c0_149 = arith.constant 0 : index
    %c0_150 = arith.constant 0 : index
    %343 = vector.load %arg7[%c0_149, %c0_150] : memref<8x128xf32, #tpu.memory_space<vmem>>, vector<1x128xf32>
    tpu.vector_store %arg7[%c0_149, %c0_150], %342 {strides = array<i32>} : memref<8x128xf32, #tpu.memory_space<vmem>>, vector<1x128xf32>,
    %344 = vector.extract_strided_slice %15 {offsets = [1, 0], sizes = [1, 128], strides = [1, 1]} : vector<2x128xf32> to vector<1x128xf32>
    %c0_151 = arith.constant 0 : index
    %c0_152 = arith.constant 0 : index
    %345 = vector.load %arg8[%c0_151, %c0_152] : memref<8x128xf32, #tpu.memory_space<vmem>>, vector<1x128xf32>
    tpu.vector_store %arg8[%c0_151, %c0_152], %344 {strides = array<i32>} : memref<8x128xf32, #tpu.memory_space<vmem>>, vector<1x128xf32>,
    %346 = vector.extract_strided_slice %15 {offsets = [1, 0], sizes = [1, 128], strides = [1, 1]} : vector<2x128xf32> to vector<1x128xf32>
    %cst_153 = arith.constant -2.000000e+00 : f32
    %347 = vector.broadcast %cst_153 : f32 to vector<1x128xf32>
    %348 = arith.mulf %347, %346 : vector<1x128xf32>
    %c0_154 = arith.constant 0 : index
    %c0_155 = arith.constant 0 : index
    %349 = vector.load %arg9[%c0_154, %c0_155] : memref<8x128xf32, #tpu.memory_space<vmem>>, vector<1x128xf32>
    tpu.vector_store %arg9[%c0_154, %c0_155], %348 {strides = array<i32>} : memref<8x128xf32, #tpu.memory_space<vmem>>, vector<1x128xf32>,
    %350 = vector.extract_strided_slice %9 {offsets = [1, 0], sizes = [1, 128], strides = [1, 1]} : vector<2x128xf32> to vector<1x128xf32>
    %c1_156 = arith.constant 1 : index
    %c0_157 = arith.constant 0 : index
    %351 = vector.load %arg6[%c1_156, %c0_157] : memref<8x128xf32, #tpu.memory_space<vmem>>, vector<1x128xf32>
    tpu.vector_store %arg6[%c1_156, %c0_157], %350 {strides = array<i32>} : memref<8x128xf32, #tpu.memory_space<vmem>>, vector<1x128xf32>,
    %352 = vector.extract_strided_slice %9 {offsets = [1, 0], sizes = [1, 128], strides = [1, 1]} : vector<2x128xf32> to vector<1x128xf32>
    %cst_158 = arith.constant -2.000000e+00 : f32
    %353 = vector.broadcast %cst_158 : f32 to vector<1x128xf32>
    %354 = arith.mulf %353, %352 : vector<1x128xf32>
    %c1_159 = arith.constant 1 : index
    %c0_160 = arith.constant 0 : index
    %355 = vector.load %arg7[%c1_159, %c0_160] : memref<8x128xf32, #tpu.memory_space<vmem>>, vector<1x128xf32>
    tpu.vector_store %arg7[%c1_159, %c0_160], %354 {strides = array<i32>} : memref<8x128xf32, #tpu.memory_space<vmem>>, vector<1x128xf32>,
    %356 = vector.extract_strided_slice %18 {offsets = [1, 0], sizes = [1, 128], strides = [1, 1]} : vector<2x128xf32> to vector<1x128xf32>
    %c1_161 = arith.constant 1 : index
    %c0_162 = arith.constant 0 : index
    %357 = vector.load %arg8[%c1_161, %c0_162] : memref<8x128xf32, #tpu.memory_space<vmem>>, vector<1x128xf32>
    tpu.vector_store %arg8[%c1_161, %c0_162], %356 {strides = array<i32>} : memref<8x128xf32, #tpu.memory_space<vmem>>, vector<1x128xf32>,
    %358 = vector.extract_strided_slice %18 {offsets = [1, 0], sizes = [1, 128], strides = [1, 1]} : vector<2x128xf32> to vector<1x128xf32>
    %cst_163 = arith.constant -2.000000e+00 : f32
    %359 = vector.broadcast %cst_163 : f32 to vector<1x128xf32>
    %360 = arith.mulf %359, %358 : vector<1x128xf32>
    %c1_164 = arith.constant 1 : index
    %c0_165 = arith.constant 0 : index
    %361 = vector.load %arg9[%c1_164, %c0_165] : memref<8x128xf32, #tpu.memory_space<vmem>>, vector<1x128xf32>
    tpu.vector_store %arg9[%c1_164, %c0_165], %360 {strides = array<i32>} : memref<8x128xf32, #tpu.memory_space<vmem>>, vector<1x128xf32>,
    %362 = vector.extract_strided_slice %12 {offsets = [1, 0], sizes = [1, 128], strides = [1, 1]} : vector<2x128xf32> to vector<1x128xf32>
    %c2_166 = arith.constant 2 : index
    %c0_167 = arith.constant 0 : index
    %363 = vector.load %arg6[%c2_166, %c0_167] : memref<8x128xf32, #tpu.memory_space<vmem>>, vector<1x128xf32>
    tpu.vector_store %arg6[%c2_166, %c0_167], %362 {strides = array<i32>} : memref<8x128xf32, #tpu.memory_space<vmem>>, vector<1x128xf32>,
    %364 = vector.extract_strided_slice %12 {offsets = [1, 0], sizes = [1, 128], strides = [1, 1]} : vector<2x128xf32> to vector<1x128xf32>
    %cst_168 = arith.constant -2.000000e+00 : f32
    %365 = vector.broadcast %cst_168 : f32 to vector<1x128xf32>
    %366 = arith.mulf %365, %364 : vector<1x128xf32>
    %c2_169 = arith.constant 2 : index
    %c0_170 = arith.constant 0 : index
    %367 = vector.load %arg7[%c2_169, %c0_170] : memref<8x128xf32, #tpu.memory_space<vmem>>, vector<1x128xf32>
    tpu.vector_store %arg7[%c2_169, %c0_170], %366 {strides = array<i32>} : memref<8x128xf32, #tpu.memory_space<vmem>>, vector<1x128xf32>,
    %368 = vector.extract_strided_slice %21 {offsets = [1, 0], sizes = [1, 128], strides = [1, 1]} : vector<2x128xf32> to vector<1x128xf32>
    %c2_171 = arith.constant 2 : index
    %c0_172 = arith.constant 0 : index
    %369 = vector.load %arg8[%c2_171, %c0_172] : memref<8x128xf32, #tpu.memory_space<vmem>>, vector<1x128xf32>
    tpu.vector_store %arg8[%c2_171, %c0_172], %368 {strides = array<i32>} : memref<8x128xf32, #tpu.memory_space<vmem>>, vector<1x128xf32>,
    %370 = vector.extract_strided_slice %21 {offsets = [1, 0], sizes = [1, 128], strides = [1, 1]} : vector<2x128xf32> to vector<1x128xf32>
    %cst_173 = arith.constant -2.000000e+00 : f32
    %371 = vector.broadcast %cst_173 : f32 to vector<1x128xf32>
    %372 = arith.mulf %371, %370 : vector<1x128xf32>
    %c2_174 = arith.constant 2 : index
    %c0_175 = arith.constant 0 : index
    %373 = vector.load %arg9[%c2_174, %c0_175] : memref<8x128xf32, #tpu.memory_space<vmem>>, vector<1x128xf32>
    tpu.vector_store %arg9[%c2_174, %c0_175], %372 {strides = array<i32>} : memref<8x128xf32, #tpu.memory_space<vmem>>, vector<1x128xf32>,
    %c3_176 = arith.constant 3 : index
    %c0_177 = arith.constant 0 : index
    %374 = vector.load %arg6[%c3_176, %c0_177] : memref<8x128xf32, #tpu.memory_space<vmem>>, vector<1x128xf32>
    tpu.vector_store %arg6[%c3_176, %c0_177], %336 {strides = array<i32>} : memref<8x128xf32, #tpu.memory_space<vmem>>, vector<1x128xf32>,
    %c4_178 = arith.constant 4 : index
    %c0_179 = arith.constant 0 : index
    %375 = vector.load %arg6[%c4_178, %c0_179] : memref<8x128xf32, #tpu.memory_space<vmem>>, vector<1x128xf32>
    tpu.vector_store %arg6[%c4_178, %c0_179], %335 {strides = array<i32>} : memref<8x128xf32, #tpu.memory_space<vmem>>, vector<1x128xf32>,
    %c3_180 = arith.constant 3 : index
    %c0_181 = arith.constant 0 : index
    %376 = vector.load %arg7[%c3_180, %c0_181] : memref<8x128xf32, #tpu.memory_space<vmem>>, vector<1x128xf32>
    tpu.vector_store %arg7[%c3_180, %c0_181], %335 {strides = array<i32>} : memref<8x128xf32, #tpu.memory_space<vmem>>, vector<1x128xf32>,
    %c4_182 = arith.constant 4 : index
    %c0_183 = arith.constant 0 : index
    %377 = vector.load %arg7[%c4_182, %c0_183] : memref<8x128xf32, #tpu.memory_space<vmem>>, vector<1x128xf32>
    tpu.vector_store %arg7[%c4_182, %c0_183], %336 {strides = array<i32>} : memref<8x128xf32, #tpu.memory_space<vmem>>, vector<1x128xf32>,
    %c3_184 = arith.constant 3 : index
    %c0_185 = arith.constant 0 : index
    %378 = vector.load %arg8[%c3_184, %c0_185] : memref<8x128xf32, #tpu.memory_space<vmem>>, vector<1x128xf32>
    tpu.vector_store %arg8[%c3_184, %c0_185], %337 {strides = array<i32>} : memref<8x128xf32, #tpu.memory_space<vmem>>, vector<1x128xf32>,
    %c4_186 = arith.constant 4 : index
    %c0_187 = arith.constant 0 : index
    %379 = vector.load %arg8[%c4_186, %c0_187] : memref<8x128xf32, #tpu.memory_space<vmem>>, vector<1x128xf32>
    tpu.vector_store %arg8[%c4_186, %c0_187], %335 {strides = array<i32>} : memref<8x128xf32, #tpu.memory_space<vmem>>, vector<1x128xf32>,
    %c3_188 = arith.constant 3 : index
    %c0_189 = arith.constant 0 : index
    %380 = vector.load %arg9[%c3_188, %c0_189] : memref<8x128xf32, #tpu.memory_space<vmem>>, vector<1x128xf32>
    tpu.vector_store %arg9[%c3_188, %c0_189], %335 {strides = array<i32>} : memref<8x128xf32, #tpu.memory_space<vmem>>, vector<1x128xf32>,
    %c4_190 = arith.constant 4 : index
    %c0_191 = arith.constant 0 : index
    %381 = vector.load %arg9[%c4_190, %c0_191] : memref<8x128xf32, #tpu.memory_space<vmem>>, vector<1x128xf32>
    tpu.vector_store %arg9[%c4_190, %c0_191], %337 {strides = array<i32>} : memref<8x128xf32, #tpu.memory_space<vmem>>, vector<1x128xf32>,
    %cst_192 = arith.constant 0.000000e+00 : f32
    %382 = vector.broadcast %cst_192 : f32 to vector<8x128xf32>
    %c0_193 = arith.constant 0 : index
    %c0_194 = arith.constant 0 : index
    %383 = vector.load %arg10[%c0_193, %c0_194] : memref<8x128xf32, #tpu.memory_space<vmem>>, vector<8x128xf32>
    tpu.vector_store %arg10[%c0_193, %c0_194], %382 {strides = array<i32>} : memref<8x128xf32, #tpu.memory_space<vmem>>, vector<8x128xf32>,
    %c0_i32_195 = arith.constant 0 : i32
    %c128_i32_196 = arith.constant 128 : i32
    %384 = arith.muli %c0_i32_195, %c128_i32_196 : i32
    %385 = tpu.assume_multiple %384, 128 : i32
    %c0_197 = arith.constant 0 : index
    %386 = arith.index_cast %385 : i32 to index
    %387 = vector.load %arg6[%c0_197, %386] : memref<8x128xf32, #tpu.memory_space<vmem>>, vector<8x128xf32>
    %c0_198 = arith.constant 0 : index
    %388 = arith.index_cast %385 : i32 to index
    %389 = vector.load %arg8[%c0_198, %388] : memref<8x128xf32, #tpu.memory_space<vmem>>, vector<8x128xf32>
    %c0_199 = arith.constant 0 : index
    %c0_200 = arith.constant 0 : index
    %390 = vector.load %arg7[%c0_199, %c0_200] : memref<8x128xf32, #tpu.memory_space<vmem>>, vector<8x128xf32>
    %cst_201 = arith.constant dense<0.000000e+00> : vector<128x128xf32>
    %391 = tpu.matmul %387, %390, %cst_201 {dimension_numbers = #tpu.dot_dimension_numbers<[0], [0], [1], [1], [0, 1, 1, 1], [], []>} : vector<8x128xf32>, vector<8x128xf32>, vector<128x128xf32> -> vector<128x128xf32>
    %cst_202 = arith.constant 0.000000e+00 : f32
    %392 = vector.broadcast %cst_202 : f32 to vector<128x128xf32>
    %393 = arith.maximumf %391, %392 : vector<128x128xf32>
    %c0_203 = arith.constant 0 : index
    %c0_204 = arith.constant 0 : index
    %394 = vector.load %arg9[%c0_203, %c0_204] : memref<8x128xf32, #tpu.memory_space<vmem>>, vector<8x128xf32>
    %cst_205 = arith.constant dense<0.000000e+00> : vector<128x128xf32>
    %395 = tpu.matmul %389, %394, %cst_205 {dimension_numbers = #tpu.dot_dimension_numbers<[0], [0], [1], [1], [0, 1, 1, 1], [], []>} : vector<8x128xf32>, vector<8x128xf32>, vector<128x128xf32> -> vector<128x128xf32>
    %cst_206 = arith.constant 0.000000e+00 : f32
    %396 = vector.broadcast %cst_206 : f32 to vector<128x128xf32>
    %397 = arith.maximumf %395, %396 : vector<128x128xf32>
    %398 = arith.addf %393, %397 : vector<128x128xf32>
    %399 = arith.mulf %393, %397 : vector<128x128xf32>
    %400 = math.sqrt %399 : vector<128x128xf32>
    %cst_207 = arith.constant 2.000000e+00 : f32
    %401 = vector.broadcast %cst_207 : f32 to vector<128x128xf32>
    %402 = arith.mulf %401, %400 : vector<128x128xf32>
    %403 = arith.subf %398, %402 : vector<128x128xf32>
    %404 = vector.extract_strided_slice %403 {offsets = [0, 0], sizes = [8, 128], strides = [1, 1]} : vector<128x128xf32> to vector<8x128xf32>
    %405 = vector.extract_strided_slice %403 {offsets = [8, 0], sizes = [8, 128], strides = [1, 1]} : vector<128x128xf32> to vector<8x128xf32>
    %406 = arith.addf %404, %405 : vector<8x128xf32>
    %407 = vector.extract_strided_slice %403 {offsets = [16, 0], sizes = [8, 128], strides = [1, 1]} : vector<128x128xf32> to vector<8x128xf32>
    %408 = arith.addf %406, %407 : vector<8x128xf32>
    %409 = vector.extract_strided_slice %403 {offsets = [24, 0], sizes = [8, 128], strides = [1, 1]} : vector<128x128xf32> to vector<8x128xf32>
    %410 = arith.addf %408, %409 : vector<8x128xf32>
    %411 = vector.extract_strided_slice %403 {offsets = [32, 0], sizes = [8, 128], strides = [1, 1]} : vector<128x128xf32> to vector<8x128xf32>
    %412 = arith.addf %410, %411 : vector<8x128xf32>
    %413 = vector.extract_strided_slice %403 {offsets = [40, 0], sizes = [8, 128], strides = [1, 1]} : vector<128x128xf32> to vector<8x128xf32>
    %414 = arith.addf %412, %413 : vector<8x128xf32>
    %415 = vector.extract_strided_slice %403 {offsets = [48, 0], sizes = [8, 128], strides = [1, 1]} : vector<128x128xf32> to vector<8x128xf32>
    %416 = arith.addf %414, %415 : vector<8x128xf32>
    %417 = vector.extract_strided_slice %403 {offsets = [56, 0], sizes = [8, 128], strides = [1, 1]} : vector<128x128xf32> to vector<8x128xf32>
    %418 = arith.addf %416, %417 : vector<8x128xf32>
    %419 = vector.extract_strided_slice %403 {offsets = [64, 0], sizes = [8, 128], strides = [1, 1]} : vector<128x128xf32> to vector<8x128xf32>
    %420 = arith.addf %418, %419 : vector<8x128xf32>
    %421 = vector.extract_strided_slice %403 {offsets = [72, 0], sizes = [8, 128], strides = [1, 1]} : vector<128x128xf32> to vector<8x128xf32>
    %422 = arith.addf %420, %421 : vector<8x128xf32>
    %423 = vector.extract_strided_slice %403 {offsets = [80, 0], sizes = [8, 128], strides = [1, 1]} : vector<128x128xf32> to vector<8x128xf32>
    %424 = arith.addf %422, %423 : vector<8x128xf32>
    %425 = vector.extract_strided_slice %403 {offsets = [88, 0], sizes = [8, 128], strides = [1, 1]} : vector<128x128xf32> to vector<8x128xf32>
    %426 = arith.addf %424, %425 : vector<8x128xf32>
    %427 = vector.extract_strided_slice %403 {offsets = [96, 0], sizes = [8, 128], strides = [1, 1]} : vector<128x128xf32> to vector<8x128xf32>
    %428 = arith.addf %426, %427 : vector<8x128xf32>
    %429 = vector.extract_strided_slice %403 {offsets = [104, 0], sizes = [8, 128], strides = [1, 1]} : vector<128x128xf32> to vector<8x128xf32>
    %430 = arith.addf %428, %429 : vector<8x128xf32>
    %431 = vector.extract_strided_slice %403 {offsets = [112, 0], sizes = [8, 128], strides = [1, 1]} : vector<128x128xf32> to vector<8x128xf32>
    %432 = arith.addf %430, %431 : vector<8x128xf32>
    %433 = vector.extract_strided_slice %403 {offsets = [120, 0], sizes = [8, 128], strides = [1, 1]} : vector<128x128xf32> to vector<8x128xf32>
    %434 = arith.addf %432, %433 : vector<8x128xf32>
    %c0_208 = arith.constant 0 : index
    %c0_209 = arith.constant 0 : index
    %435 = vector.load %arg10[%c0_208, %c0_209] : memref<8x128xf32, #tpu.memory_space<vmem>>, vector<8x128xf32>
    %436 = arith.addf %435, %434 : vector<8x128xf32>
    %c0_210 = arith.constant 0 : index
    %c0_211 = arith.constant 0 : index
    %437 = vector.load %arg10[%c0_210, %c0_211] : memref<8x128xf32, #tpu.memory_space<vmem>>, vector<8x128xf32>
    tpu.vector_store %arg10[%c0_210, %c0_211], %436 {strides = array<i32>} : memref<8x128xf32, #tpu.memory_space<vmem>>, vector<8x128xf32>,
    %c1_i32_212 = arith.constant 1 : i32
    %c0_213 = arith.constant 0 : index
    %c0_214 = arith.constant 0 : index
    %438 = vector.load %arg10[%c0_213, %c0_214] : memref<8x128xf32, #tpu.memory_space<vmem>>, vector<8x128xf32>
    %439 = vector.shape_cast %438 : vector<8x128xf32> to vector<1x8x128xf32>
    %cst_215 = arith.constant dense<0.000000e+00> : vector<1xf32>
    %440 = vector.multi_reduction <add>, %439, %cst_215 [1, 2] : vector<1x8x128xf32> to vector<1xf32>
    %441 = vector.shape_cast %440 : vector<1xf32> to vector<1x1x1xf32>
    %442 = vector.extract %441[0, 0, 0] : f32 from vector<1x1x1xf32>
    %c1_i32_216 = arith.constant 1 : i32
    %443 = vector.broadcast %c1_i32_216 : i32 to vector<2x4xi32>
    %444 = arith.cmpi eq, %189, %443 : vector<2x4xi32>
    %c1_i32_217 = arith.constant 1 : i32
    %445 = vector.broadcast %c1_i32_217 : i32 to vector<2x4xi32>
    %446 = arith.cmpi eq, %190, %445 : vector<2x4xi32>
    %447 = arith.andi %444, %446 : vector<2x4xi1>
    %cst_218 = arith.constant 0.000000e+00 : f32
    %448 = vector.broadcast %442 : f32 to vector<2x4xf32>
    %449 = vector.broadcast %cst_218 : f32 to vector<2x4xf32>
    %450 = arith.select %447, %448, %449 : vector<2x4xi1>, vector<2x4xf32>
    %451 = vector.broadcast %33 : vector<2x1xf32> to vector<2x4xf32>
    %452 = arith.mulf %450, %451 : vector<2x4xf32>
    %453 = arith.addf %334, %452 : vector<2x4xf32>
    %c0_219 = arith.constant 0 : index
    %c0_220 = arith.constant 0 : index
    %c0_221 = arith.constant 0 : index
    %454 = vector.load %arg5[%c0_219, %c0_220, %c0_221] : memref<1x2x4xf32, #tpu.memory_space<vmem>>, vector<1x2x4xf32>
    %455 = vector.shape_cast %454 : vector<1x2x4xf32> to vector<2x4xf32>
    %456 = vector.shape_cast %453 : vector<2x4xf32> to vector<1x2x4xf32>
    tpu.vector_store %arg5[%c0_219, %c0_220, %c0_221], %456 {strides = array<i32>} : memref<1x2x4xf32, #tpu.memory_space<vmem>>, vector<1x2x4xf32>,
    return
  }
  func.func @transform_0(%arg0: i32) -> (i32, i32, i32, i32) {
    %c0_i32 = arith.constant 0 : i32
    %c0_i32_0 = arith.constant 0 : i32
    %c0_i32_1 = arith.constant 0 : i32
    %c0_i32_2 = arith.constant 0 : i32
    return %arg0, %c0_i32, %c0_i32_0, %c0_i32_1 : i32, i32, i32, i32
  }
  func.func @transform_1(%arg0: i32) -> (i32, i32, i32, i32) {
    %c0_i32 = arith.constant 0 : i32
    %c0_i32_0 = arith.constant 0 : i32
    %c0_i32_1 = arith.constant 0 : i32
    %c0_i32_2 = arith.constant 0 : i32
    return %arg0, %c0_i32, %c0_i32_0, %c0_i32_1 : i32, i32, i32, i32
  }
  func.func @transform_2(%arg0: i32) -> (i32, i32, i32) {
    %c0_i32 = arith.constant 0 : i32
    %c0_i32_0 = arith.constant 0 : i32
    %c0_i32_1 = arith.constant 0 : i32
    return %arg0, %c0_i32, %c0_i32_0 : i32, i32, i32
  }
  func.func @transform_3(%arg0: i32) -> (i32, i32, i32) {
    %c0_i32 = arith.constant 0 : i32
    %c0_i32_0 = arith.constant 0 : i32
    %c0_i32_1 = arith.constant 0 : i32
    return %arg0, %c0_i32, %c0_i32_0 : i32, i32, i32
  }
  func.func @transform_4(%arg0: i32) -> (i32, i32, i32) {
    %c0_i32 = arith.constant 0 : i32
    %c0_i32_0 = arith.constant 0 : i32
    %c0_i32_1 = arith.constant 0 : i32
    return %arg0, %c0_i32, %c0_i32_0 : i32, i32, i32
  }
}

</mosaic_0001>

<bundles_post_ra>
// kernel: custom-call.57
= control target key start
LH: loop header
LB: loop body
LE: loop exit
PB: predicated region body
PF: predicated region fallthrough
CT: control target
= control target key end

     0   :  { %s710_s9 = smov 0   ;;  %s712_s10 = smov 0   ;;  %s885_s0 = inlined_call_operand.vmem [shape: f32[2,2,6,3], index: 0, kind: input, shape index: {}]   ;;  %s886_s1 = inlined_call_operand.vmem [shape: f32[2,2,6,3], index: 1, kind: output, shape index: {0}]   ;;  %s887_s2 = inlined_call_operand.vmem [shape: f32[2,2,3], index: 2, kind: output, shape index: {1}]  }
   0x1   :  { %s714_s11 = smov 0   ;;  %s716_s12 = smov 0  }
   0x2   :  { %s718_s13 = smov 0   ;;  %s720_s14 = smov 0  }
   0x3   :  { %s722_s15 = smov 0  }
   0x4 LB: > { %s31_s16 = sadd.s32 1, %s679_s13  ;;  %s35_s17 = sadd.s32 1, %s683_s14  ;;  %s687_s15 = sphi %s722_s15, %s9_s15   ;;  %s683_s14 = sphi %s720_s14, %s896_s14   ;;  %s679_s13 = sphi %s718_s13, %s895_s13   ;;  %s675_s12 = sphi %s716_s12, %s894_s12   ;;  %s671_s11 = sphi %s714_s11, %s893_s11   ;;  %s667_s10 = sphi %s712_s10, %s892_s10   ;;  %s663_s9 = sphi %s710_s9, %s891_s9  }
   0x5   : > { %p33_p0 = scmp.ge.s32.totalorder %s31_s16, 2  ;;  %s40_s18 = ssub.s32 0, %s679_s13 }
   0x6   : > { %s533_s19 = smin.u32 %s679_s13, %s40_s18  ;;  %s531_s22 = sadd.s32 4294967295, %s687_s15  }
   0x7   : > { %s898_s16 = smov (%p33_p0, %s31_s16), 0  ;;  %s900_s17 = smov (!%p33_p0, %s35_s17), %s683_s14 }
   0x8   : > { %p37_p1 = scmp.ge.s32.totalorder %s900_s17, 2  ;;  %s42_s20 = sshrl.u32 %s533_s19, 3 }
   0x9   : > { %s46_s21 = ssub.s32 0, %s898_s16  ;;  %p66_p2 = scmp.ne.s32.totalorder %s667_s10, %s663_s9 }
   0xa   : > { %s902_s17 = smov (%p37_p1, %s900_s17), 0  ;;  %s534_s23 = smin.u32 %s46_s21, %s898_s16 }
   0xb   : > { %s48_s24 = sshrl.u32 %s534_s23, 3  ;;  %s51_s25 = ssub.s32 %s683_s14, %s902_s17 }
   0xc   : > { %p67_p3 = scmp.eq.s32.totalorder %s531_s22, 3  ;;  %s52_s26 = ssub.s32 %s42_s20, %s48_s24 }
   0xd   : > { %s56_s27 = sadd.s32 1, %s667_s10  ;;  %s53_s28 = sor.u32 %s52_s26, %s51_s25 }
   0xe   : > { %p762_p4 = por %p67_p3, %p66_p2  ;;  %p54_p5 = scmp.eq.s32.totalorder %s53_s28, 0 }
   0xf   : > { %p536_p6 = scmp.ge.s32.totalorder %s687_s15, 4 }
  0x10   : > { %s767_s30 = scalar_select %p54_p5, %s667_s10, %s56_s27  }
  0x11   : > { %89 = sbr.rel (%p536_p6) target bundleno = 24 (0x18), region = 16  ;;  %s91_s3 = sand.u32 (!%p536_p6), 1, %s687_s15  }
  0x12   : > { %s538_s4 = sshll.u32 (!%p536_p6), %s683_s14, 1  ;;  %s537_s5 = sshll.u32 (!%p536_p6), %s91_s3, 3 }
  0x13   : > { %s97_s6 = sadd.s32 (!%p536_p6), %s679_s13, %s538_s4  ;;  %s93_s20 = scalar_lea.vmem (!%p536_p6), [#allocation0], %s537_s5 }
  0x14   : > { %s539_s7 = sshll.u32 (!%p536_p6), %s97_s6, 3 }
  0x15   : > { %s99_s19 = scalar_lea.vmem (!%p536_p6), %s885_s0, %s539_s7 }
  0x16   : > { %v128_v0 = vld [vmem:[%s99_s19] sm:$0xff] }
  0x17   : > { %129 = vst [vmem:[%s93_s20] sm:$0xff] %v128_v0 }
  0x18 PF: > { %p540_p7 = scmp.ge.s32.totalorder %s687_s15, 1  ;;  %p134_p8 = scmp.lt.s32.totalorder %s687_s15, 5 }
  0x1a   : > { %p135_p9 = pnand %p540_p7, %p134_p8 }
  0x1c   : > { %138 = sbr.rel (%p135_p9) target bundleno = 342 (0x156), region = 54 }
  0x21   : > { %s141_s21 = sand.u32 1, %s531_s22   ;;  %s155_s23 = sand.u32 1, %s663_s9   ;;  %v693_v2 = vmov 0.0  }
  0x22   : > { %s541_s24 = sshll.u32 %s141_s21, 3  ;;  %s779_s25 = sshll.u32 %s155_s23, 1 }
  0x23   : > { %s164_s26 = sand.u32 7, %s671_s11   ;;  %s143_s27 = scalar_lea.vmem [#allocation0], %s541_s24 }
  0x24   : > { %v166_v1 = vld [vmem:[%s143_s27] sm:$0xff]  ;;  %s782_s28 = scalar_lea.vmem [#allocation1], %s541_s24  ;;  %s785_s3 = scalar_lea.vmem [#allocation2], %s164_s26 }
  0x25   : > { %167 = vst [vmem:[%s782_s28] sm:$0xff] %v166_v1  ;;  %168 = vst [vmem:[%s785_s3] sm:$0x1] %v693_v2  ;;  %s157_s22 = scalar_lea.vmem [#allocation3], %s779_s25  ;;  %s789_s4 = smov 0  }
  0x26 LB: >> { %v176_v3 = vlaneseq  ;;  %v798_v5 = vstv %s691_s4  ;;  %s203_s9 = scalar_lea.vmem %s782_s28, %s691_s4 [#allocation1]  ;;  %s261_s5 = scalar_lea.vmem [#allocation4], %s691_s4  ;;  %v694_v59 = vmov 1.0   ;;  %s691_s4 = sphi %s789_s4, %s174_s4  }
  0x27   : >> { %s278_s6 = smov [#allocation4] }
  0x28   : >> { %v795_v4 = vshrl.u32 %v176_v3, 7  ;;  %v255_v48 = vand.u32 127, %v176_v3 }
  0x2a   : >> { %vm180_vm0 = vcmp.gt.s32.totalorder %v795_v4, %v798_v5  ;;  %vm181_vm1 = vcmp.lt.s32.totalorder %v795_v4, 6  ;;  %v242_v4 = vmov %v795_v4  ;;  %vm816_vm12 = vcmp.eq.s32.totalorder %v255_v48, %v798_v5 }
  0x2b   : >> { %vm182_vm2 = vmand %vm180_vm0, %vm181_vm1  ;;  %vm246_vm9 = vcmp.gt.s32.totalorder %v242_v4, %v798_v5  ;;  %vm247_vm10 = vcmp.lt.s32.totalorder %v242_v4, 6  ;;  %v281_v4 = vmov %v795_v4  ;;  %vm307_vm15 = vcmp.gt.s32.totalorder %v255_v48, %v798_v5 }
  0x2c   : >> { %v175_v6 = vld [vmem:[%s782_s28] sm:$0xff]  ;;  %v204_v15 = vld [vmem:[%s203_s9] ss:$0 sm:$0xff]  ;;  %s239_s28 = smov %s782_s28  ;;  %vm248_vm11 = vmand %vm246_vm9, %vm247_vm10  ;;  %vm286_vm13 = vcmp.lt.s32.totalorder %v281_v4, 6  ;;  %v298_v4 = vmov %v795_v4 }
  0x2d   : >> { %v183_v7 = vsel %vm182_vm2, %v175_v6, 0.0  ;;  %v205_v16 = vand.u32 2147483647, %v204_v15  ;;  %vm230_vm8 = vcmp.lt.f32.partialorder %v204_v15, 0.0  ;;  %v243_v45 = vld [vmem:[%s239_s28] sm:$0xff]  ;;  %s277_s28 = smov %s782_s28  ;;  %vm315_vm14 = vcmp.ge.s32.totalorder %v298_v4, %v798_v5 }
  0x2e   : >> { %v184_v8 = vmul.f32 %v183_v7, %v183_v7  ;;  %v249_v49 = vsel %vm248_vm11, %v243_v45, 0.0  ;;  %v274_v60 = vld [vmem:[%s785_s3] ss:$0 sm:$0xff]  ;;  %vm316_vm0 = vmand %vm816_vm12, %vm315_vm14 }
  0x2f   : >> { %v206_v21 = vmax.f32 %v205_v16, 0.0  ;;  %v284_v63 = vld [vmem:[%s277_s28] sm:$0xff]  ;;  %s294_s28 = smov %s277_s28 }
  0x30   : >> { %v185_v9 = vrot.slane %v184_v8, 4  ;;  %s319_s7 = scalar_lea.vmem %s294_s28, %s691_s4  ;;  %s174_s4 = sadd.s32 1, %s691_s4  }
  0x31   : >> { %p171_p10 = scmp.ge.s32.totalorder %s174_s4, 3  }
  0x32   : >> { %v186_v10 = vadd.f32 %v185_v9, %v184_v8  ;;  %s547_s8 = sshll.u32 (%p171_p10), %s675_s12, 1 }
  0x33   : > { %s346_s18 = sadd.s32 (%p171_p10), %s671_s11, %s547_s8 }
  0x34   : >> { %v187_v11 = vrot.slane %v186_v10, 2  ;;  %s548_s19 = sshll.u32 (%p171_p10), %s346_s18, 3 }
  0x35   : > { %s348_s23 = scalar_lea.vmem (%p171_p10), %s886_s1, %s548_s19 }
  0x36   : >> { %v188_v12 = vadd.f32 %v187_v11, %v186_v10 }
  0x38   : >> { %v189_v13 = vrot.slane %v188_v12, 1 }
  0x3a   : >> { %v190_v14 = vadd.f32 %v189_v13, %v188_v12  ;;  %v305_v13 = vld [vmem:[%s294_s28] sm:$0xff] }
  0x3c   : >> { %619 = vrsqrt.f32 %v190_v14  ;;  %vm193_vm3 = vcmp.eq.f32.partialorder %v190_v14, inf  ;;  %v196_v18 = vand.u32 2147483648, %v190_v14  ;;  %vm195_vm4 = vcmp.eq.f32.partialorder %v190_v14, 0.0 }
  0x49   : >> { %v620_v17 = vpop.eup %619 }
  0x4a   : >> { %v192_v19 = vmul.f32 %v620_v17, %v190_v14 }
  0x4c   : >> { %v194_v20 = vsel %vm193_vm3, %v190_v14, %v192_v19 }
  0x4d   : >> { %v197_v22 = vsel %vm195_vm4, %v196_v18, %v194_v20 }
  0x4e   : >> { %v207_v23 = vand.u32 2147483647, %v197_v22 }
  0x50   : >> { %v208_v24 = vmax.f32 %v206_v21, %v207_v23 }
  0x52   : >> { %621 = vrcp.f32 %v208_v24  ;;  %vm220_vm7 = vcmp.eq.f32.partialorder %v208_v24, 0.0 }
  0x5f   : >> { %v622_v25 = vpop.eup %621 }
  0x60   : >> { %v210_v26 = vmul.f32 %v622_v25, %v205_v16  ;;  %v213_v27 = vmul.f32 0.0, %v622_v25  ;;  %v217_v28 = vmul.f32 %v622_v25, %v207_v23 }
  0x62   : >> { %v211_v29 = vmul.f32 %v210_v26, %v210_v26  ;;  %v214_v30 = vmul.f32 %v213_v27, %v213_v27  ;;  %v218_v31 = vmul.f32 %v217_v28, %v217_v28 }
  0x64   : >> { %v215_v32 = vadd.f32 %v214_v30, %v211_v29 }
  0x66   : >> { %v219_v33 = vadd.f32 %v218_v31, %v215_v32 }
  0x68   : >> { %623 = vrsqrt.f32 %v219_v33  ;;  %vm223_vm5 = vcmp.eq.f32.partialorder %v219_v33, inf  ;;  %v226_v35 = vand.u32 2147483648, %v219_v33  ;;  %vm225_vm6 = vcmp.eq.f32.partialorder %v219_v33, 0.0 }
  0x75   : >> { %v624_v34 = vpop.eup %623 }
  0x76   : >> { %v222_v36 = vmul.f32 %v624_v34, %v219_v33 }
  0x78   : >> { %v224_v37 = vsel %vm223_vm5, %v219_v33, %v222_v36 }
  0x79   : >> { %v227_v38 = vsel %vm225_vm6, %v226_v35, %v224_v37 }
  0x7a   : >> { %v228_v39 = vmul.f32 %v227_v38, %v208_v24 }
  0x7c   : >> { %v229_v40 = vsel %vm220_vm7, 0.0, %v228_v39 }
  0x7d   : >> { %v231_v41 = vxor.u32 2147483648, %v229_v40 }
  0x7f   : >> { %v232_v42 = vsel %vm230_vm8, %v229_v40, %v231_v41 }
  0x80   : >> { %v808_v43 = vsel %vm195_vm4, %v204_v15, %v232_v42  ;;  %625 = vrcp.f32 %v232_v42  ;;  %v233_v46 = vsub.f32 %v232_v42, %v204_v15 }
  0x81   : >> { %v238_v44 = vsub.f32 %v204_v15, %v808_v43 }
  0x83   : >> { %627 = vrcp.f32 %v238_v44 }
  0x8d   : >> { %v626_v47 = vpop.eup %625 }
  0x8e   : >> { %v235_v50 = vmul.f32 %v626_v47, %v233_v46 }
  0x90   : >> { %v628_v51 = vpop.eup %627  ;;  %v237_v55 = vsel %vm195_vm4, 0.0, %v235_v50 }
  0x91   : >> { %v251_v52 = vmul.f32 %v628_v51, %v249_v49  ;;  %v267_v57 = vsel %vm816_vm12, %v237_v55, 0.0 }
  0x93   : >> { %v252_v54 = vsel %vm195_vm4, 0.0, %v251_v52 }
  0x94   : >> { %v257_v56 = vsel %vm816_vm12, %v252_v54, 0.0 }
  0x95   : >> { %258 = vadd.xlane.f32.xlu0 %v257_v56 }
  0x99   : >> { %268 = vadd.xlane.f32.xlu0 %v267_v57 }
 0x11e   : >> { %v259_v58 = vpop.xlane.xlu0 %258 }
 0x11f   : >> { %260 = vst [vmem:[#allocation4] sm:$0xff] %v259_v58 }
 0x120   : >> { %262 = vst [vmem:[%s261_s5] sm:$0x1] %v694_v59 }
 0x122   : >> { %v269_v61 = vpop.xlane.xlu0 %268 }
 0x123   : >> { %v275_v62 = vsel %vm816_vm12, %v269_v61, %v274_v60 }
 0x124   : >> { %276 = vst [vmem:[%s785_s3] sm:$0x1] %v275_v62 }
 0x127   : >> { %v283_v0 = vld [vmem:[%s278_s6] sm:$0xff]  ;;  %s295_s6 = smov %s278_s6 }
 0x128   : >> { %v285_v1 = vmul.f32 %v284_v63, %v283_v0  ;;  %v303_v12 = vld [vmem:[%s295_s6] sm:$0xff] }
 0x12a   : >> { %v287_v2 = vsel %vm286_vm13, %v285_v1, 0.0 }
 0x12b   : >> { %v288_v3 = vrot.slane %v287_v2, 4  ;;  %v331_v4 = vld [vmem:[#allocation2] sm:$0x3] (%p171_p10) }
 0x12c   : > { %334 = vst [vmem:[%s157_s22] sm:$0x3] (%p171_p10), %v331_v4 }
 0x12d   : >> { %v289_v6 = vadd.f32 %v288_v3, %v287_v2 }
 0x12f   : >> { %v290_v7 = vrot.slane %v289_v6, 2 }
 0x131   : >> { %v291_v8 = vadd.f32 %v290_v7, %v289_v6 }
 0x133   : >> { %v292_v9 = vrot.slane %v291_v8, 1 }
 0x135   : >> { %v293_v10 = vadd.f32 %v292_v9, %v291_v8 }
 0x137   : >> { %v299_v11 = vmul.f32 %v293_v10, %v269_v61 }
 0x139   : >> { %v304_v14 = vmul.f32 %v303_v12, %v299_v11 }
 0x13b   : >> { %v308_v15 = vsub.f32 %v305_v13, %v304_v14 }
 0x13d   : >> { %v309_v16 = vsel %vm307_vm15, %v308_v15, %v305_v13 }
 0x13e   : >> { %v317_v17 = vsel %vm316_vm0, %v303_v12, %v309_v16 }
 0x13f   : >> { %318 = vst [vmem:[%s294_s28] sm:$0xff] %v317_v17 }
 0x144   : > { %173 = sbr.rel (!%p171_p10) target bundleno = 38 (0x26), region = 175 }
 0x146   : >> { %v320_v18 = vld [vmem:[%s319_s7] ss:$0 sm:$0xff] }
 0x147   : >> { %v325_v19 = vsel %vm816_vm12, %v808_v43, %v320_v18 }
 0x148   : >> { %326 = vst [vmem:[%s319_s7] sm:$0x1] %v325_v19 }
 0x149   : > { %p385_p11 = scmp.lt.s32.totalorder (%p762_p4), %s671_s11, 0  ;;  %s386_s24 = ssub.s32 (%p762_p4), 0, %s671_s11  ;;  %v410_v20 = vld [vmem:[%s157_s22] sm:$0x3] (%p762_p4) }
 0x14a   : > { %s549_s26 = smin.u32 (%p762_p4), %s671_s11, %s386_s24 }
 0x14b   : > { %s388_s27 = sshrl.u32 (%p762_p4), %s549_s26, 3 }
 0x14c   : > { %384 = sbr.rel (!%p762_p4) target bundleno = 342 (0x156), region = 99  ;;  %s389_s3 = ssub.s32 (%p762_p4), 0, %s388_s27 }
 0x14f   : > { %v377_v5 = vld [vmem:[%s782_s28] sm:$0xff] }
 0x150   : > { %378 = vst [vmem:[%s348_s23] sm:$0xff] %v377_v5 }
 0x151   : > { %s904_s3 = smov (!%p385_p11, %s389_s3), %s388_s27 }
 0x152   : > { %s391_s28 = sadd.s32 %s675_s12, %s904_s3 }
 0x153   : > { %s550_s4 = sshll.u32 %s391_s28, 1 }
 0x154   : > { %s393_s29 = scalar_lea.vmem %s887_s2, %s550_s4 }
 0x155   : > { %411 = vst [vmem:[%s393_s29] sm:$0x3] %v410_v20 }
 0x156 PF: > { %s9_s15 = sadd.s32 1, %s687_s15   ;;  %s891_s9 = smov %s667_s10 }
 0x157   : > { %p6_p12 = scmp.ge.s32.totalorder %s9_s15, 6   ;;  %s892_s10 = smov %s767_s30 }
 0x158   : > { %s893_s11 = smov %s679_s13  ;;  %s894_s12 = smov %s683_s14 }
 0x159   : > { %s895_s13 = smov %s898_s16  ;;  %s896_s14 = smov %s902_s17 }
 0x15a   :  { %8 = sbr.rel (!%p6_p12) target bundleno = 4 (0x4), region = 186 }

// kernel: custom-call.58
= control target key start
LH: loop header
LB: loop body
LE: loop exit
PB: predicated region body
PF: predicated region fallthrough
CT: control target
= control target key end

     0   :  { %s341_s6 = smov 0   ;;  %s343_s7 = smov 0   ;;  %s410_s0 = inlined_call_operand.vmem [shape: f32[2,2,3,3], index: 0, kind: input, shape index: {}]   ;;  %s411_s1 = inlined_call_operand.vmem [shape: f32[2,2,3,3], index: 1, kind: output, shape index: {}]  }
   0x1   :  { %s345_s8 = smov 0   ;;  %s347_s9 = smov 0  }
   0x2   :  { %s349_s10 = smov 0  }
   0x3 LB: > { %s237_s11 = sadd.s32 4294967295, %s329_s10   ;;  %s16_s12 = sadd.s32 1, %s321_s8  ;;  %s329_s10 = sphi %s349_s10, %s7_s10   ;;  %s325_s9 = sphi %s347_s9, %s415_s9   ;;  %s321_s8 = sphi %s345_s8, %s414_s8   ;;  %s317_s7 = sphi %s343_s7, %s413_s7   ;;  %s313_s6 = sphi %s341_s6, %s412_s6  }
   0x4   : > { %p17_p0 = scmp.ge.s32.totalorder %s16_s12, 2  ;;  %s19_s13 = sadd.s32 1, %s325_s9 }
   0x5   : > { %p239_p2 = scmp.ge.s32.totalorder %s329_s10, 4 }
   0x6   : > { %s417_s12 = smov (%p17_p0, %s16_s12), 0  ;;  %s419_s13 = smov (!%p17_p0, %s19_s13), %s325_s9 }
   0x7   : > { %p21_p1 = scmp.ge.s32.totalorder %s419_s13, 2  ;;  %33 = sbr.rel (%p239_p2) target bundleno = 15 (0xf), region = 16 }
   0x8   : > { %s35_s14 = sand.u32 (!%p239_p2), 1, %s329_s10   ;;  %s241_s15 = sshll.u32 (!%p239_p2), %s325_s9, 1 }
   0x9   : > { %s421_s13 = smov (%p21_p1, %s419_s13), 0  ;;  %s240_s16 = sshll.u32 (!%p239_p2), %s35_s14, 2 }
   0xa   : > { %s39_s17 = sadd.s32 (!%p239_p2), %s321_s8, %s241_s15  ;;  %s37_s22 = scalar_lea.vmem (!%p239_p2), [#allocation1], %s240_s16 }
   0xb   : > { %s242_s18 = sshll.u32 (!%p239_p2), %s39_s17, 2 }
   0xc   : > { %s41_s21 = scalar_lea.vmem %s410_s0, %s242_s18 }
   0xd   : > { %v58_v0 = vld [vmem:[%s41_s21] sm:$0xf] }
   0xe   : > { %59 = vst [vmem:[%s37_s22] sm:$0xf] %v58_v0 }
   0xf PF: > { %p243_p3 = scmp.ge.s32.totalorder %s329_s10, 1  ;;  %p76_p4 = scmp.lt.s32.totalorder %s329_s10, 5 }
  0x11   : > { %p77_p5 = pnand %p243_p3, %p76_p4 }
  0x12   : > { %s383_s23 = sand.u32 (!%p77_p5), 1, %s237_s11   ;;  %s247_s26 = sshll.u32 (!%p77_p5), %s317_s7, 1 }
  0x13   : > { %80 = sbr.rel (%p77_p5) target bundleno = 334 (0x14e), region = 50  ;;  %s244_s24 = sshll.u32 (!%p77_p5), %s383_s23, 2 }
  0x14   : > { %s89_s25 = scalar_lea.vmem (!%p77_p5), [#allocation1], %s244_s24  ;;  %s147_s27 = sadd.s32 (!%p77_p5), %s313_s6, %s247_s26 }
  0x15   : > { %s93_s28 = scalar_lea.vmem (!%p77_p5), [#allocation3], %s244_s24  ;;  %s248_s29 = sshll.u32 (!%p77_p5), %s147_s27, 2 }
  0x16   : > { %s149_s3 = scalar_lea.vmem (!%p77_p5), %s411_s1, %s248_s29 }
  0x18   : > { %v99_v1 = vlaneseq  ;;  %v97_v2 = vld [vmem:[%s89_s25] sm:$0xf]  ;;  %vm113_vm1 = vcmask 23552  }
  0x19   : > { %98 = vst [vmem:[#allocation0] sm:$0xf] %v97_v2 }
  0x1a   : > { %v100_v3 = vand.u32 127, %v99_v1  ;;  %v102_v4 = vshrl.u32 %v99_v1, 7 }
  0x1c   : > { %vm108_vm0 = vcmp.eq.s32.totalorder %v100_v3, 0  ;;  %vm104_vm2 = vcmp.eq.s32.totalorder %v100_v3, %v102_v4  ;;  %vm117_vm3 = vcmp.eq.s32.totalorder %v100_v3, 1  ;;  %vm128_vm4 = vcmp.eq.s32.totalorder %v100_v3, 2 }
  0x20   : > { %v105_v5 = vld [vmem:[#allocation0] sm:$0xff] }
  0x21   : > { %v112_v6 = vld [vmem:[#allocation0 + $0x1] ss:$0 sm:$0xff]  ;;  %v109_v7 = vsel %vm108_vm0, %v105_v5, 1.0  ;;  %v123_v11 = vld [vmem:[#allocation0 + $0x2] ss:$0 sm:$0xff] }
  0x22   : > { %v114_v8 = vsel %vm113_vm1, %v112_v6, 0.0  ;;  %v110_v9 = vsel %vm104_vm2, %v109_v7, 0.0  ;;  %v125_v12 = vsel %vm113_vm1, %v123_v11, 0.0 }
  0x23   : > { %v118_v10 = vmul.f32 %v114_v8, %v110_v9 }
  0x25   : > { %119 = vadd.xlane.f32.xlu0 %v118_v10 }
  0xae   : > { %v120_v13 = vpop.xlane.xlu0 %119 }
  0xaf   : > { %v121_v14 = vsel %vm117_vm3, %v120_v13, %v110_v9 }
  0xb0   : > { %v129_v15 = vmul.f32 %v125_v12, %v121_v14 }
  0xb2   : > { %130 = vadd.xlane.f32.xlu0 %v129_v15 }
 0x13b   : > { %v131_v16 = vpop.xlane.xlu0 %130 }
 0x13c   : > { %v132_v17 = vsel %vm128_vm4, %v131_v16, %v121_v14 }
 0x13d   : > { %133 = vst [vmem:[#allocation2] sm:$0xff] %v132_v17 }
 0x144   : > { %v138_v18 = vld [vmem:[#allocation2] sm:$0xf] }
 0x145   : > { %141 = vst [vmem:[%s93_s28] sm:$0xf] %v138_v18 }
 0x14c   : > { %v166_v19 = vld [vmem:[%s93_s28] sm:$0xf] }
 0x14d   : > { %167 = vst [vmem:[%s149_s3] sm:$0xf] %v166_v19 }
 0x14e PF: > { %s7_s10 = sadd.s32 1, %s329_s10   ;;  %s412_s6 = smov %s321_s8 }
 0x14f   : > { %p4_p6 = scmp.ge.s32.totalorder %s7_s10, 6   ;;  %s413_s7 = smov %s325_s9 }
 0x150   : > { %s414_s8 = smov %s417_s12  ;;  %s415_s9 = smov %s421_s13 }
 0x151   :  { %6 = sbr.rel (!%p4_p6) target bundleno = 3 (0x3), region = 112 }

// kernel: custom-call.50
= control target key start
LH: loop header
LB: loop body
LE: loop exit
PB: predicated region body
PF: predicated region fallthrough
CT: control target
= control target key end

     0   :  { %s6_s0 = inlined_call_operand.hbm [shape: pred[2,2], index: 0, kind: output, shape index: {}]  }

// kernel: custom-call.55
= control target key start
LH: loop header
LB: loop body
LE: loop exit
PB: predicated region body
PF: predicated region fallthrough
CT: control target
= control target key end

     0   :  { %s405_s6 = smov 0   ;;  %s407_s7 = smov 0   ;;  %s474_s0 = inlined_call_operand.vmem [shape: f32[2,2,3,3], index: 0, kind: input, shape index: {}]   ;;  %s475_s1 = inlined_call_operand.vmem [shape: f32[2,2,3,3], index: 1, kind: output, shape index: {}]  }
   0x1   :  { %s409_s8 = smov 0   ;;  %s411_s9 = smov 0  }
   0x2   :  { %s413_s10 = smov 0  }
   0x3 LB: > { %s293_s11 = sadd.s32 4294967295, %s392_s10   ;;  %s29_s12 = sadd.s32 1, %s384_s8  ;;  %s392_s10 = sphi %s413_s10, %s7_s10   ;;  %s388_s9 = sphi %s411_s9, %s479_s9   ;;  %s384_s8 = sphi %s409_s8, %s478_s8   ;;  %s380_s7 = sphi %s407_s7, %s477_s7   ;;  %s376_s6 = sphi %s405_s6, %s476_s6  }
   0x4   : > { %p31_p0 = scmp.ge.s32.totalorder %s29_s12, 2  ;;  %s33_s13 = sadd.s32 1, %s388_s9 }
   0x5   : > { %p295_p2 = scmp.ge.s32.totalorder %s392_s10, 4 }
   0x6   : > { %s481_s12 = smov (%p31_p0, %s29_s12), 0  ;;  %s483_s13 = smov (!%p31_p0, %s33_s13), %s388_s9 }
   0x7   : > { %p35_p1 = scmp.ge.s32.totalorder %s483_s13, 2  ;;  %47 = sbr.rel (%p295_p2) target bundleno = 15 (0xf), region = 16 }
   0x8   : > { %s49_s14 = sand.u32 (!%p295_p2), 1, %s392_s10   ;;  %s297_s15 = sshll.u32 (!%p295_p2), %s388_s9, 1 }
   0x9   : > { %s485_s13 = smov (%p35_p1, %s483_s13), 0  ;;  %s296_s16 = sshll.u32 (!%p295_p2), %s49_s14, 2 }
   0xa   : > { %s55_s17 = sadd.s32 (!%p295_p2), %s384_s8, %s297_s15  ;;  %s51_s22 = scalar_lea.vmem (!%p295_p2), [#allocation1], %s296_s16 }
   0xb   : > { %s298_s18 = sshll.u32 (!%p295_p2), %s55_s17, 2 }
   0xc   : > { %s57_s21 = scalar_lea.vmem %s474_s0, %s298_s18 }
   0xd   : > { %v74_v0 = vld [vmem:[%s57_s21] sm:$0xf] }
   0xe   : > { %75 = vst [vmem:[%s51_s22] sm:$0xf] %v74_v0 }
   0xf PF: > { %p299_p3 = scmp.ge.s32.totalorder %s392_s10, 1  ;;  %p92_p4 = scmp.lt.s32.totalorder %s392_s10, 5 }
  0x11   : > { %p93_p5 = pnand %p299_p3, %p92_p4 }
  0x12   : > { %s447_s23 = sand.u32 (!%p93_p5), 1, %s293_s11   ;;  %s303_s26 = sshll.u32 (!%p93_p5), %s380_s7, 1 }
  0x13   : > { %96 = sbr.rel (%p93_p5) target bundleno = 547 (0x223), region = 50  ;;  %s300_s24 = sshll.u32 (!%p93_p5), %s447_s23, 2 }
  0x14   : > { %s105_s25 = scalar_lea.vmem (!%p93_p5), [#allocation1], %s300_s24  ;;  %s193_s27 = sadd.s32 (!%p93_p5), %s376_s6, %s303_s26 }
  0x15   : > { %s109_s28 = scalar_lea.vmem (!%p93_p5), [#allocation3], %s300_s24  ;;  %s304_s29 = sshll.u32 (!%p93_p5), %s193_s27, 2 }
  0x16   : > { %s195_s3 = scalar_lea.vmem (!%p93_p5), %s475_s1, %s304_s29 }
  0x18   : > { %v394_v1 = vmov 0.0   ;;  %v113_v5 = vld [vmem:[%s105_s25] sm:$0xf]  ;;  %vm116_vm0 = vcmask 7168   ;;  %vm134_vm1 = vcmask 15368   ;;  %vm151_vm2 = vcmask 1047553  }
  0x19   : > { %115 = vst [vmem:[#allocation2] sm:$0xff] %v394_v1  ;;  %114 = vst [vmem:[#allocation0] sm:$0xf] %v113_v5  ;;  %vm156_vm4 = vcmask 23568   ;;  %vm173_vm5 = vcmask 1047554  }
  0x1a   : > { %vm152_vm3 = vmand %vm134_vm1, %vm151_vm2 }
  0x1b   : > { %vm174_vm6 = vmand %vm156_vm4, %vm173_vm5 }
  0x20   : > { %v117_v2 = vld [vmem:[#allocation2] ss:$0 sm:$0xff]  ;;  %v118_v6 = vld [vmem:[#allocation0] ss:$0 sm:$0xff]  ;;  %v138_v18 = vld [vmem:[#allocation0 + $0x1] ss:$0 sm:$0xff] }
  0x21   : > { %v119_v3 = vmul.f32 %v117_v2, %v117_v2  ;;  %v126_v4 = vmul.f32 0.0, %v117_v2  ;;  %v124_v10 = vld [vmem:[#allocation0] sm:$0xff] }
  0x22   : > { %v160_v30 = vld [vmem:[#allocation0 + $0x2] ss:$0 sm:$0xff] }
  0x23   : > { %120 = vadd.xlane.f32.xlu0 %v119_v3 }
  0x27   : > { %127 = vadd.xlane.f32.xlu0 %v126_v4 }
  0xac   : > { %v121_v7 = vpop.xlane.xlu0 %120 }
  0xad   : > { %v122_v8 = vsub.f32 %v118_v6, %v121_v7 }
  0xaf   : > { %348 = vrsqrt.f32 %v122_v8 }
  0xb0   : > { %v128_v9 = vpop.xlane.xlu0 %127 }
  0xb1   : > { %v129_v11 = vsub.f32 %v124_v10, %v128_v9 }
  0xbc   : > { %v349_v12 = vpop.eup %348 }
  0xbd   : > { %v130_v13 = vmul.f32 %v349_v12, %v129_v11 }
  0xbf   : > { %v131_v14 = vsel %vm116_vm0, %v130_v13, 0.0 }
  0xc0   : > { %133 = vst [vmem:[#allocation2] sm:$0xff] %v131_v14 }
  0xc7   : > { %v136_v15 = vld [vmem:[#allocation2 + $0x1] ss:$0 sm:$0xff] }
  0xc8   : > { %v139_v16 = vmul.f32 %v136_v15, %v136_v15  ;;  %v146_v17 = vmul.f32 %v136_v15, %v131_v14 }
  0xca   : > { %140 = vadd.xlane.f32.xlu1 %v139_v16 }
  0xce   : > { %147 = vadd.xlane.f32.xlu1 %v146_v17 }
 0x153   : > { %v141_v19 = vpop.xlane.xlu1 %140 }
 0x154   : > { %v142_v20 = vsub.f32 %v138_v18, %v141_v19 }
 0x156   : > { %350 = vrsqrt.f32 %v142_v20 }
 0x157   : > { %v148_v21 = vpop.xlane.xlu1 %147 }
 0x158   : > { %v149_v22 = vsub.f32 %v124_v10, %v148_v21 }
 0x163   : > { %v351_v23 = vpop.eup %350 }
 0x164   : > { %v150_v24 = vmul.f32 %v351_v23, %v149_v22 }
 0x166   : > { %v153_v25 = vsel %vm152_vm3, %v150_v24, 0.0 }
 0x167   : > { %v154_v26 = vadd.f32 %v153_v25, %v131_v14 }
 0x169   : > { %155 = vst [vmem:[#allocation2] sm:$0xff] %v154_v26 }
 0x170   : > { %v158_v27 = vld [vmem:[#allocation2 + $0x2] ss:$0 sm:$0xff] }
 0x171   : > { %v168_v28 = vmul.f32 %v158_v27, %v154_v26  ;;  %v161_v29 = vmul.f32 %v158_v27, %v158_v27 }
 0x173   : > { %169 = vadd.xlane.f32.xlu1 %v168_v28  ;;  %162 = vadd.xlane.f32.xlu0 %v161_v29 }
 0x1fc   : > { %v163_v31 = vpop.xlane.xlu0 %162  ;;  %v170_v33 = vpop.xlane.xlu1 %169 }
 0x1fd   : > { %v164_v32 = vsub.f32 %v160_v30, %v163_v31  ;;  %v171_v34 = vsub.f32 %v124_v10, %v170_v33 }
 0x1ff   : > { %352 = vrsqrt.f32 %v164_v32 }
 0x20c   : > { %v353_v35 = vpop.eup %352 }
 0x20d   : > { %v172_v36 = vmul.f32 %v353_v35, %v171_v34 }
 0x20f   : > { %v175_v37 = vsel %vm174_vm6, %v172_v36, 0.0 }
 0x210   : > { %v176_v38 = vadd.f32 %v175_v37, %v154_v26 }
 0x212   : > { %177 = vst [vmem:[#allocation2] sm:$0xff] %v176_v38 }
 0x219   : > { %v182_v39 = vld [vmem:[#allocation2] sm:$0xf] }
 0x21a   : > { %185 = vst [vmem:[%s109_s28] sm:$0xf] %v182_v39 }
 0x221   : > { %v212_v40 = vld [vmem:[%s109_s28] sm:$0xf] }
 0x222   : > { %213 = vst [vmem:[%s195_s3] sm:$0xf] %v212_v40 }
 0x223 PF: > { %s7_s10 = sadd.s32 1, %s392_s10   ;;  %s476_s6 = smov %s384_s8 }
 0x224   : > { %p4_p6 = scmp.ge.s32.totalorder %s7_s10, 6   ;;  %s477_s7 = smov %s388_s9 }
 0x225   : > { %s478_s8 = smov %s481_s12  ;;  %s479_s9 = smov %s485_s13 }
 0x226   :  { %6 = sbr.rel (!%p4_p6) target bundleno = 3 (0x3), region = 114 }

// kernel: custom-call.56
= control target key start
LH: loop header
LB: loop body
LE: loop exit
PB: predicated region body
PF: predicated region fallthrough
CT: control target
= control target key end

     0   :  { %s405_s6 = smov 0   ;;  %s407_s7 = smov 0   ;;  %s474_s0 = inlined_call_operand.vmem [shape: f32[2,2,1,3,3], index: 0, kind: input, shape index: {}]   ;;  %s475_s1 = inlined_call_operand.vmem [shape: f32[2,2,1,3,3], index: 1, kind: output, shape index: {}]  }
   0x1   :  { %s409_s8 = smov 0   ;;  %s411_s9 = smov 0  }
   0x2   :  { %s413_s10 = smov 0  }
   0x3 LB: > { %s297_s11 = sadd.s32 4294967295, %s392_s10   ;;  %s36_s12 = sadd.s32 1, %s384_s8  ;;  %s392_s10 = sphi %s413_s10, %s7_s10   ;;  %s388_s9 = sphi %s411_s9, %s479_s9   ;;  %s384_s8 = sphi %s409_s8, %s478_s8   ;;  %s380_s7 = sphi %s407_s7, %s477_s7   ;;  %s376_s6 = sphi %s405_s6, %s476_s6  }
   0x4   : > { %p38_p0 = scmp.ge.s32.totalorder %s36_s12, 2  ;;  %s40_s13 = sadd.s32 1, %s388_s9 }
   0x5   : > { %p299_p2 = scmp.ge.s32.totalorder %s392_s10, 4 }
   0x6   : > { %s481_s12 = smov (%p38_p0, %s36_s12), 0  ;;  %s483_s13 = smov (!%p38_p0, %s40_s13), %s388_s9 }
   0x7   : > { %p42_p1 = scmp.ge.s32.totalorder %s483_s13, 2  ;;  %54 = sbr.rel (%p299_p2) target bundleno = 15 (0xf), region = 16 }
   0x8   : > { %s56_s14 = sand.u32 (!%p299_p2), 1, %s392_s10   ;;  %s301_s15 = sshll.u32 (!%p299_p2), %s388_s9, 1 }
   0x9   : > { %s485_s13 = smov (%p42_p1, %s483_s13), 0  ;;  %s300_s16 = sshll.u32 (!%p299_p2), %s56_s14, 2 }
   0xa   : > { %s63_s17 = sadd.s32 (!%p299_p2), %s384_s8, %s301_s15  ;;  %s58_s22 = scalar_lea.vmem (!%p299_p2), [#allocation1], %s300_s16 }
   0xb   : > { %s302_s18 = sshll.u32 (!%p299_p2), %s63_s17, 2 }
   0xc   : > { %s65_s21 = scalar_lea.vmem %s474_s0, %s302_s18 }
   0xd   : > { %v82_v0 = vld [vmem:[%s65_s21] sm:$0xf] }
   0xe   : > { %83 = vst [vmem:[%s58_s22] sm:$0xf] %v82_v0 }
   0xf PF: > { %p303_p3 = scmp.ge.s32.totalorder %s392_s10, 1  ;;  %p100_p4 = scmp.lt.s32.totalorder %s392_s10, 5 }
  0x11   : > { %p101_p5 = pnand %p303_p3, %p100_p4 }
  0x13   : > { %104 = sbr.rel (%p101_p5) target bundleno = 503 (0x1f7), region = 50 }
  0x18   : > { %s447_s23 = sand.u32 1, %s297_s11   ;;  %v123_v1 = vlaneseq  ;;  %v394_v11 = vmov -1.0   ;;  %s307_s26 = sshll.u32 %s380_s7, 1 }
  0x19   : > { %s304_s24 = sshll.u32 %s447_s23, 2  ;;  %s192_s27 = sadd.s32 %s376_s6, %s307_s26 }
  0x1a   : > { %s113_s25 = scalar_lea.vmem [#allocation1], %s304_s24  ;;  %v124_v3 = vand.u32 127, %v123_v1  ;;  %v127_v4 = vshrl.u32 %v123_v1, 7  ;;  %s117_s28 = scalar_lea.vmem [#allocation3], %s304_s24 }
  0x1b   : > { %v121_v2 = vld [vmem:[%s113_s25] sm:$0xf]  ;;  %s308_s29 = sshll.u32 %s192_s27, 2 }
  0x1c   : > { %122 = vst [vmem:[#allocation0] sm:$0xf] %v121_v2  ;;  %vm125_vm0 = vcmp.lt.s32.totalorder %v124_v3, 3  ;;  %vm134_vm1 = vcmp.ge.s32.totalorder %v127_v4, %v124_v3  ;;  %vm129_vm2 = vcmp.eq.s32.totalorder %v127_v4, %v124_v3  ;;  %vm148_vm4 = vcmp.eq.s32.totalorder %v124_v3, 0  ;;  %s194_s3 = scalar_lea.vmem %s475_s1, %s308_s29 }
  0x1d   : > { %vm135_vm3 = vmand %vm134_vm1, %vm125_vm0  ;;  %vm145_vm5 = vcmp.eq.s32.totalorder %v124_v3, %v127_v4  ;;  %v149_v12 = vsel %vm148_vm4, 1.0, %v394_v11  ;;  %vm156_vm6 = vcmp.eq.s32.totalorder %v124_v3, 1  ;;  %vm166_vm7 = vcmp.eq.s32.totalorder %v124_v3, 2 }
  0x1e   : > { %v150_v13 = vsel %vm145_vm5, %v149_v12, 0.0 }
  0x23   : > { %v130_v5 = vld [vmem:[#allocation0] sm:$0xff] }
  0x24   : > { %v131_v6 = vsel %vm129_vm2, %v130_v5, 0.0  ;;  %v136_v7 = vsel %vm135_vm3, %v130_v5, 0.0 }
  0x25   : > { %132 = vadd.xlane.f32.xlu0 %v131_v6 }
  0xae   : > { %v133_v8 = vpop.xlane.xlu0 %132 }
  0xaf   : > { %352 = vrcp.f32 %v133_v8  ;;  %vm173_vm8 = vweird.f32 %v133_v8 }
  0xbc   : > { %v353_v9 = vpop.eup %352 }
  0xbd   : > { %v138_v10 = vmul.f32 %v353_v9, %v136_v7 }
  0xbf   : > { %139 = vst [vmem:[#allocation4] sm:$0xff] %v138_v10 }
  0xc6   : > { %v152_v14 = vld [vmem:[#allocation4 + $0x1] ss:$0 sm:$0xff]  ;;  %v162_v17 = vld [vmem:[#allocation4 + $0x2] ss:$0 sm:$0xff] }
  0xc7   : > { %v153_v15 = vxor.u32 2147483648, %v152_v14  ;;  %v163_v19 = vxor.u32 2147483648, %v162_v17 }
  0xc9   : > { %v157_v16 = vmul.f32 %v153_v15, %v150_v13 }
  0xcb   : > { %158 = vadd.xlane.f32.xlu0 %v157_v16 }
 0x154   : > { %v159_v18 = vpop.xlane.xlu0 %158 }
 0x155   : > { %v160_v20 = vsel %vm156_vm6, %v159_v18, %v150_v13 }
 0x156   : > { %v167_v21 = vmul.f32 %v163_v19, %v160_v20 }
 0x158   : > { %168 = vadd.xlane.f32.xlu1 %v167_v21 }
 0x1e1   : > { %v169_v22 = vpop.xlane.xlu1 %168 }
 0x1e2   : > { %v170_v23 = vsel %vm166_vm7, %v169_v22, %v160_v20 }
 0x1e3   : > { %v172_v24 = vmul.f32 %v353_v9, %v170_v23 }
 0x1e5   : > { %v174_v25 = vsel %vm173_vm8, %v170_v23, %v172_v24 }
 0x1e6   : > { %175 = vst [vmem:[#allocation2] sm:$0xff] %v174_v25 }
 0x1ed   : > { %v180_v26 = vld [vmem:[#allocation2] sm:$0xf] }
 0x1ee   : > { %183 = vst [vmem:[%s117_s28] sm:$0xf] %v180_v26 }
 0x1f5   : > { %v211_v27 = vld [vmem:[%s117_s28] sm:$0xf] }
 0x1f6   : > { %212 = vst [vmem:[%s194_s3] sm:$0xf] %v211_v27 }
 0x1f7 PF: > { %s7_s10 = sadd.s32 1, %s392_s10   ;;  %s476_s6 = smov %s384_s8 }
 0x1f8   : > { %p4_p6 = scmp.ge.s32.totalorder %s7_s10, 6   ;;  %s477_s7 = smov %s388_s9 }
 0x1f9   : > { %s478_s8 = smov %s481_s12  ;;  %s479_s9 = smov %s485_s13 }
 0x1fa   :  { %6 = sbr.rel (!%p4_p6) target bundleno = 3 (0x3), region = 112 }

// kernel: reverse
= control target key start
LH: loop header
LB: loop body
LE: loop exit
PB: predicated region body
PF: predicated region fallthrough
CT: control target
= control target key end

     0   :  { %v2_v0 = vlaneseq  ;;  %s139_s0 = inlined_call_operand.vmem [shape: f32[2,2,3], index: 0, kind: input, shape index: {}]   ;;  %s140_s1 = inlined_call_operand.vmem [shape: f32[2,2,3], index: 1, kind: output, shape index: {}]  }
   0x2   :  { %v3_v1 = vsub.s32 2, %v2_v0 }
   0x4   :  { %4 = vset.pattern.permute.xlu0 %v3_v1 }
   0x5   :  { %v21_v2 = vld [vmem:[%s139_s0] sm:$0xf]  }
   0x6   :  { %22 = vst [vmem:[#allocation1] sm:$0xf] %v21_v2  }
   0xd   :  { %v49_v3 = vld [vmem:[#allocation1] sm:$0x3]  ;;  %v46_v4 = vld [vmem:[#allocation1 + $0x2] sm:$0x3] }
   0xe   :  { %50 = vst [vmem:[#allocation0] sm:$0x3] %v49_v3  ;;  %48 = vst [vmem:[#allocation0 + $0x8] sm:$0x3] %v46_v4 }
  0x15   :  { %v51_v5 = vld [vmem:[#allocation0] sm:$0xff]  ;;  %v57_v6 = vld [vmem:[#allocation0 + $0x8] sm:$0xff] }
  0x16   :  { %52 = vperm.xlu0 %4, %v51_v5  }
  0x1a   :  { %58 = vperm.xlu0 %4, %v57_v6  }
  0x91   :  { %v53_v7 = vpop.permute.xlu0 %52 }
  0x92   :  { %54 = vst [vmem:[#allocation2 + $0x8] sm:$0xff] %v53_v7 }
  0x95   :  { %v59_v8 = vpop.permute.xlu0 %58 }
  0x96   :  { %60 = vst [vmem:[#allocation2] sm:$0xff] %v59_v8 }
  0x99   :  { %v65_v9 = vld [vmem:[#allocation2 + $0x8] sm:$0x3] }
  0x9a   :  { %68 = vst [vmem:[#allocation3] sm:$0x3] %v65_v9 }
  0x9d   :  { %v70_v10 = vld [vmem:[#allocation2] sm:$0x3] }
  0x9e   :  { %74 = vst [vmem:[#allocation3 + $0x2] sm:$0x3] %v70_v10 }
  0xa1   :  { %v91_v11 = vld [vmem:[#allocation3] sm:$0x3] }
  0xa2   :  { %92 = vst [vmem:[%s140_s1] sm:$0x3] %v91_v11 }
  0xa5   :  { %v93_v12 = vld [vmem:[#allocation3 + $0x2] sm:$0x3] }
  0xa6   :  { %94 = vst [vmem:[%s140_s1 + $0x2] sm:$0x3] %v93_v12 }

// kernel: custom-call.22
= control target key start
LH: loop header
LB: loop body
LE: loop exit
PB: predicated region body
PF: predicated region fallthrough
CT: control target
= control target key end

     0   :  { %s2243_s0 = inlined_call_operand.vmem [shape: f32[2,2,2,2], index: 0, kind: input, shape index: {}]   ;;  %s2244_s1 = inlined_call_operand.vmem [shape: f32[2,2,2,2], index: 1, kind: input, shape index: {}]   ;;  %s2245_s2 = inlined_call_operand.vmem [shape: f32[2,2,2,2], index: 2, kind: input, shape index: {}]   ;;  %s2246_s3 = inlined_call_operand.vmem [shape: f32[2,2,2,2], index: 3, kind: input, shape index: {}]   ;;  %s2247_s4 = inlined_call_operand.vmem [shape: f32[2,2,2], index: 4, kind: output, shape index: {0}]   ;;  %s2248_s5 = inlined_call_operand.vmem [shape: f32[2,2,2], index: 5, kind: output, shape index: {1}]   ;;  %s2249_s6 = inlined_call_operand.vmem [shape: f32[2,2,2,2], index: 6, kind: output, shape index: {2}]   ;;  %s2250_s7 = inlined_call_operand.vmem [shape: f32[2,2,2,2], index: 7, kind: output, shape index: {3}]   ;;  %s2251_s8 = inlined_call_operand.vmem [shape: f32[2,2,2,2], index: 8, kind: output, shape index: {4}]   ;;  %s2252_s9 = inlined_call_operand.vmem [shape: f32[2,2,2,2], index: 9, kind: output, shape index: {5}]  }
   0x1   :  { %2258 = sst [smem:[#allocation38_spill]] %s2252_s9 }
   0x2   :  { %s1876_s30 = smov 0   ;;  %s1878_s10 = smov 0  }
   0x3   :  { %s1880_s11 = smov 0   ;;  %s1882_s12 = smov 0  }
   0x4   :  { %s1884_s13 = smov 0   ;;  %s1886_s14 = smov 0  }
   0x5   :  { %s1888_s15 = smov 0  }
   0x6 LB: > { %2259 = sst [smem:[#allocation33_spill]] %s1793_s10  ;;  %s25_s16 = sadd.s32 1, %s1805_s13  ;;  %s1813_s15 = sphi %s1888_s15, %s16_s15   ;;  %s1809_s14 = sphi %s1886_s14, %s2284_s14   ;;  %s1805_s13 = sphi %s1884_s13, %s2286_s13   ;;  %s1801_s12 = sphi %s1882_s12, %s2282_s12   ;;  %s1797_s11 = sphi %s1880_s11, %s2285_s11   ;;  %s1793_s10 = sphi %s1878_s10, %s2281_s10   ;;  %s1789_s30 = sphi %s1876_s30, %s2280_s30  }
   0x7   : > { %2260 = sst [smem:[#allocation34_spill]] %s1809_s14  ;;  %p26_p0 = scmp.ge.s32.totalorder %s25_s16, 2 }
   0x8   : > { %s28_s17 = sadd.s32 1, %s1809_s14  ;;  %s2253_s18 = sadd.s32 4294967295, %s1813_s15  }
   0x9   : > { %s32_s19 = sshrl.u32 %s1805_s13, 3  ;;  %s2288_s16 = smov (%p26_p0, %s25_s16), 0 }
   0xa   : > { %2261 = sst [smem:[#allocation35_spill]] %s2288_s16  ;;  %s2290_s17 = smov (!%p26_p0, %s28_s17), %s1809_s14 }
   0xb   : > { %s33_s20 = sshrl.u32 %s2288_s16, 3  ;;  %p49_p1 = scmp.ne.s32.totalorder %s1793_s10, %s1789_s30 }
   0xc   : > { %p30_p2 = scmp.ge.s32.totalorder %s2290_s17, 2  ;;  %s35_s21 = ssub.s32 %s32_s19, %s33_s20 }
   0xd   : > { %p50_p3 = scmp.eq.s32.totalorder %s2253_s18, 3  ;;  %s39_s25 = sadd.s32 1, %s1793_s10 }
   0xe   : > { %s2292_s17 = smov (%p30_p2, %s2290_s17), 0  ;;  %p1602_p6 = scmp.ge.s32.totalorder %s1813_s15, 4 }
   0xf   : > { %2262 = sst [smem:[#allocation36_spill]] %s2292_s17  ;;  %p1925_p4 = por %p50_p3, %p49_p1 }
  0x10   : > { %s34_s23 = ssub.s32 %s1809_s14, %s2292_s17  ;;  %s104_s27 = sand.u32 (!%p1602_p6), 1, %s1813_s15  }
  0x11   : > { %s36_s24 = sor.u32 %s35_s21, %s34_s23  ;;  %s1604_s28 = sshll.u32 (!%p1602_p6), %s1809_s14, 1 }
  0x12   : > { %p37_p5 = scmp.eq.s32.totalorder %s36_s24, 0  ;;  %102 = sbr.rel (%p1602_p6) target bundleno = 28 (0x1c), region = 16 }
  0x13   : > { %s1603_s29 = sshll.u32 (!%p1602_p6), %s104_s27, 1  ;;  %s108_s19 = sadd.s32 (!%p1602_p6), %s1805_s13, %s1604_s28 }
  0x14   : > { %s1933_s26 = scalar_select %p37_p5, %s1793_s10, %s39_s25  }
  0x15   : > { %s1605_s20 = sshll.u32 (!%p1602_p6), %s108_s19, 1  ;;  %s106_s25 = scalar_lea.vmem (!%p1602_p6), [#allocation1], %s1603_s29 }
  0x16   : > { %2264 = sst [smem:[#allocation37_spill]] %s1933_s26  ;;  %s110_s17 = scalar_lea.vmem (!%p1602_p6), %s2243_s0, %s1605_s20 }
  0x17   : > { %v127_v0 = vld [vmem:[%s110_s17] sm:$0x3]  ;;  %s151_s24 = scalar_lea.vmem %s2244_s1, %s1605_s20  ;;  %s192_s9 = scalar_lea.vmem %s2245_s2, %s1605_s20 }
  0x18   : > { %128 = vst [vmem:[%s106_s25] sm:$0x3] %v127_v0  ;;  %v168_v1 = vld [vmem:[%s151_s24] sm:$0x3]  ;;  %s147_s14 = scalar_lea.vmem [#allocation3], %s1603_s29  ;;  %s233_s16 = scalar_lea.vmem %s2246_s3, %s1605_s20 }
  0x19   : > { %169 = vst [vmem:[%s147_s14] sm:$0x3] %v168_v1  ;;  %v209_v2 = vld [vmem:[%s192_s9] sm:$0x3]  ;;  %s188_s18 = scalar_lea.vmem [#allocation5], %s1603_s29  ;;  %s229_s17 = scalar_lea.vmem [#allocation7], %s1603_s29 }
  0x1a   : > { %210 = vst [vmem:[%s188_s18] sm:$0x3] %v209_v2  ;;  %v250_v3 = vld [vmem:[%s233_s16] sm:$0x3] }
  0x1b   : > { %251 = vst [vmem:[%s229_s17] sm:$0x3] %v250_v3 }
  0x1c PF: > { %p1615_p7 = scmp.ge.s32.totalorder %s1813_s15, 1  ;;  %p268_p8 = scmp.lt.s32.totalorder %s1813_s15, 5 }
  0x1e   : > { %p269_p9 = pnand %p1615_p7, %p268_p8 }
  0x20   : > { %272 = sbr.rel (%p269_p9) target bundleno = 1012 (0x3f4), region = 140 }
  0x25   : > { %s2265_s10 = sadd.s32 4294967295, %s1813_s15   ;;  %s309_s14 = sand.u32 1, %s1789_s30   ;;  %v373_v4 = vlaneseq  ;;  %v1823_v5 = vmov 0.0  }
  0x26   : > { %s291_s9 = sand.u32 1, %s2265_s10   ;;  %s1958_s29 = sshll.u32 %s309_s14, 1  ;;  %368 = vst [vmem:[#allocation12] sm:$0xff] %v1823_v5  ;;  %369 = vst [vmem:[#allocation14] sm:$0xff] %v1823_v5 }
  0x27   : > { %s1956_s26 = sshll.u32 %s291_s9, 1  ;;  %370 = vst [vmem:[#allocation16] sm:$0xff] %v1823_v5  ;;  %371 = vst [vmem:[#allocation18] sm:$0xff] %v1823_v5  ;;  %v1960_v6 = vand.u32 127, %v373_v4  ;;  %v1962_v7 = vshrl.u32 %v373_v4, 7  ;;  %s356_s23 = smov [#allocation20] }
  0x28   : > { %s293_s19 = scalar_lea.vmem [#allocation1], %s1956_s26  ;;  %s297_s30 = scalar_lea.vmem [#allocation3], %s1956_s26 }
  0x29   : > { %v337_v8 = vld [vmem:[%s293_s19] sm:$0x3]  ;;  %v342_v9 = vld [vmem:[%s297_s30] sm:$0x3]  ;;  %s301_s20 = scalar_lea.vmem [#allocation5], %s1956_s26  ;;  %s305_s21 = scalar_lea.vmem [#allocation7], %s1956_s26  ;;  %v375_v6 = vmov %v1960_v6  ;;  %v378_v7 = vmov %v1962_v7 }
  0x2a   : > { %338 = vst [vmem:[#allocation0] sm:$0x3] %v337_v8  ;;  %343 = vst [vmem:[#allocation2] sm:$0x3] %v342_v9  ;;  %v347_v10 = vld [vmem:[%s301_s20] sm:$0x3]  ;;  %v388_v6 = vmov %v1960_v6  ;;  %v391_v7 = vmov %v1962_v7  ;;  %vm382_vm0 = vcmp.eq.s32.totalorder %v378_v7, %v375_v6 }
  0x2b   : > { %v352_v11 = vld [vmem:[%s305_s21] sm:$0x3]  ;;  %348 = vst [vmem:[#allocation4] sm:$0x3] %v347_v10  ;;  %s359_s24 = smov [#allocation21]  ;;  %vm395_vm1 = vcmp.eq.s32.totalorder %v391_v7, %v388_v6  ;;  %s372_s25 = smov [#allocation12]  ;;  %v1474_v7 = vmov %v1962_v7 }
  0x2c   : > { %353 = vst [vmem:[#allocation6] sm:$0x3] %v352_v11  ;;  %s385_s27 = smov [#allocation18]  ;;  %s362_s28 = smov [#allocation22]  ;;  %vm1479_vm2 = vcmp.lt.s32.totalorder %v1960_v6, 2  ;;  %v1471_v6 = vmov %v1960_v6 }
  0x2d   : > { %s365_s16 = smov [#allocation23]  ;;  %v379_v12 = vld [vmem:[%s372_s25] sm:$0x3]  ;;  %s1475_s30 = smov [#allocation20]  ;;  %vm1484_vm3 = vcmp.eq.s32.totalorder %v1474_v7, %v1471_v6  ;;  %v1522_v6 = vmov %v1960_v6  ;;  %v1491_v7 = vmov %v1962_v7 }
  0x2e   : > { %v392_v13 = vld [vmem:[%s385_s27] sm:$0x3]  ;;  %v383_v16 = vsel %vm382_vm0, 1.0, %v379_v12  ;;  %s1492_s20 = smov [#allocation21]  ;;  %s1509_s21 = smov [#allocation22]  ;;  %v1488_v6 = vmov %v1960_v6  ;;  %v1525_v7 = vmov %v1962_v7 }
  0x2f   : > { %v396_v17 = vsel %vm395_vm1, 1.0, %v392_v13  ;;  %384 = vst [vmem:[%s372_s25] sm:$0x3] %v383_v16  ;;  %v1505_v6 = vmov %v1960_v6  ;;  %v1508_v7 = vmov %v1962_v7  ;;  %vm1535_vm4 = vcmp.eq.s32.totalorder %v1525_v7, %v1522_v6 }
  0x30   : > { %397 = vst [vmem:[%s385_s27] sm:$0x3] %v396_v17 }
  0x31   : > { %v357_v14 = vld [vmem:[#allocation0] sm:$0xff]  ;;  %v360_v15 = vld [vmem:[#allocation2] sm:$0xff] }
  0x32   : > { %358 = vst [vmem:[%s356_s23] sm:$0xff] %v357_v14  ;;  %361 = vst [vmem:[%s359_s24] sm:$0xff] %v360_v15  ;;  %v363_v18 = vld [vmem:[#allocation4] sm:$0xff]  ;;  %s1526_s23 = smov [#allocation23] }
  0x33   : > { %v366_v19 = vld [vmem:[#allocation6] sm:$0xff]  ;;  %364 = vst [vmem:[%s362_s28] sm:$0xff] %v363_v18 }
  0x34   : > { %367 = vst [vmem:[%s365_s16] sm:$0xff] %v366_v19 }
  0x39   : > { %v1481_v20 = vld [vmem:[%s1475_s30] sm:$0x3] }
  0x3a   : > { %v1498_v21 = vld [vmem:[%s1492_s20] sm:$0x3]  ;;  %v1482_v22 = vsel %vm1479_vm2, %v1481_v20, 0.0 }
  0x3b   : > { %v1499_v23 = vsel %vm1479_vm2, %v1498_v21, 0.0  ;;  %v1515_v24 = vld [vmem:[%s1509_s21] sm:$0x3]  ;;  %v1483_v26 = vmul.f32 %v1482_v22, %v1482_v22 }
  0x3c   : > { %v1532_v25 = vld [vmem:[%s1526_s23] sm:$0x3]  ;;  %v1500_v27 = vmul.f32 %v1499_v23, %v1499_v23  ;;  %v1516_v28 = vsel %vm1479_vm2, %v1515_v24, 0.0 }
  0x3d   : > { %v1533_v29 = vsel %vm1479_vm2, %v1532_v25, 0.0  ;;  %v1517_v30 = vmul.f32 %v1516_v28, %v1516_v28  ;;  %v1485_v33 = vsel %vm1484_vm3, 0.0, %v1483_v26 }
  0x3e   : > { %v1502_v31 = vadd.f32 %v1500_v27, %v1483_v26  ;;  %v1534_v32 = vmul.f32 %v1533_v29, %v1533_v29  ;;  %v1501_v34 = vadd.f32 %v1500_v27, %v1485_v33 }
  0x40   : > { %v1519_v35 = vadd.f32 %v1517_v30, %v1502_v31  ;;  %v1518_v36 = vadd.f32 %v1517_v30, %v1501_v34  ;;  %v1536_v37 = vsel %vm1535_vm4, 0.0, %v1534_v32 }
  0x42   : > { %v1538_v38 = vadd.f32 %v1534_v32, %v1519_v35  ;;  %v1537_v39 = vadd.f32 %v1536_v37, %v1518_v36 }
  0x44   : > { %1539 = vadd.xlane.f32.xlu0 %v1538_v38 }
  0x48   : > { %1547 = vadd.xlane.f32.xlu0 %v1537_v39 }
  0xcd   : > { %v1540_v40 = vpop.xlane.xlu0 %1539 }
  0xce   : > { %v1541_v41 = vrot.slane %v1540_v40, 4 }
  0xd0   : > { %v1542_v42 = vadd.f32 %v1541_v41, %v1540_v40 }
  0xd1   : > { %v1548_v43 = vpop.xlane.xlu0 %1547 }
  0xd2   : > { %v1543_v44 = vrot.slane %v1542_v42, 2  ;;  %v1549_v45 = vrot.slane %v1548_v43, 4 }
  0xd4   : > { %v1550_v46 = vadd.f32 %v1549_v45, %v1548_v43  ;;  %v1544_v47 = vadd.f32 %v1543_v44, %v1542_v42 }
  0xd6   : > { %v1551_v48 = vrot.slane %v1550_v46, 2  ;;  %v1545_v50 = vrot.slane %v1544_v47, 1 }
  0xd8   : > { %v1552_v49 = vadd.f32 %v1551_v48, %v1550_v46  ;;  %v1546_v53 = vadd.f32 %v1545_v50, %v1544_v47 }
  0xda   : > { %v1553_v51 = vrot.slane %v1552_v49, 1 }
  0xdc   : > { %v1554_v52 = vadd.f32 %v1553_v51, %v1552_v49 }
  0xde   : > { %1660 = vpush %v1554_v52 }
  0xdf   : > { %1662 = vpush %v1546_v53 }
 0x10f   : > { %s1661_s24 = spop %1660 }
 0x110   : > { %s1663_s25 = spop %1662 }
 0x111   : > { %s1557_s27 = smul.f32 1e-10, %s1663_s25 }
 0x113   : > { %p1558_p10 = scmp.le.f32.partialorder %s1661_s24, %s1557_s27 }
 0x114   : > { %s1996_s28 = smov (!%p1558_p10), 0  }
 0x115   : > { %1561 = sbr.rel (%p1558_p10) target bundleno = 959 (0x3bf), region = 467 }
 0x11a LB: >> { %s2001_s16 = smov 0   ;;  %s1817_s28 = sphi %s1996_s28, %s2266_s28  }
 0x11b LB: >>> { %s502_s30 = smov [#allocation20]  ;;  %v506_v6 = vmov %v1960_v6  ;;  %v509_v7 = vmov %v1962_v7  ;;  %s522_s20 = smov [#allocation21]  ;;  %vm825_vm14 = vcmp.eq.s32.totalorder %v1962_v7, 0  ;;  %vm837_vm15 = vcmp.eq.s32.totalorder %v1962_v7, 1  ;;  %s1821_s16 = sphi %s2001_s16, %s501_s16  }
 0x11c   : >>> { %v526_v6 = vmov %v1960_v6  ;;  %v529_v7 = vmov %v1962_v7  ;;  %v510_v54 = vld [vmem:[%s502_s30] sm:$0x3]  ;;  %vm513_vm5 = vcmp.eq.s32.totalorder %v509_v7, %v506_v6  ;;  %s542_s21 = smov [#allocation23]  ;;  %s503_s23 = smov [#allocation24] }
 0x11d   : >>> { %vm533_vm6 = vcmp.eq.s32.totalorder %v529_v7, %v526_v6  ;;  %v546_v6 = vmov %v1960_v6  ;;  %v549_v7 = vmov %v1962_v7  ;;  %v514_v55 = vsel %vm513_vm5, %v510_v54, 0.0  ;;  %v530_v56 = vld [vmem:[%s522_s20] sm:$0x3]  ;;  %s523_s24 = smov [#allocation25]  ;;  %s543_s25 = smov [#allocation26] }
 0x11e   : >>> { %vm553_vm7 = vcmp.eq.s32.totalorder %v549_v7, %v546_v6  ;;  %v515_v57 = vrot.slane %v514_v55, 4  ;;  %v534_v58 = vsel %vm533_vm6, %v530_v56, 0.0  ;;  %v550_v59 = vld [vmem:[%s542_s21] sm:$0x3]  ;;  %s566_s27 = smov [#allocation25]  ;;  %s564_s30 = smov [#allocation24]  ;;  %v615_v6 = vmov %v1960_v6 }
 0x11f   : >>> { %v535_v60 = vrot.slane %v534_v58, 4  ;;  %v554_v61 = vsel %vm553_vm7, %v550_v59, 0.0  ;;  %s568_s20 = smov [#allocation26]  ;;  %s603_s21 = smov [#allocation27]  ;;  %v618_v7 = vmov %v1962_v7  ;;  %v630_v6 = vmov %v1960_v6 }
 0x120   : >>> { %v516_v62 = vadd.f32 %v515_v57, %v514_v55  ;;  %v555_v63 = vrot.slane %v554_v61, 4  ;;  %v633_v7 = vmov %v1962_v7  ;;  %vm620_vm12 = vcmp.eq.s32.totalorder %v618_v7, %v615_v6  ;;  %s2020_s17 = smov [#allocation22]  ;;  %s2026_s18 = smov [#allocation14] }
 0x121   : >>> { %v536_v0 = vadd.f32 %v535_v60, %v534_v58  ;;  %vm635_vm13 = vcmp.eq.s32.totalorder %v633_v7, %v630_v6  ;;  %s865_s19 = smov [#allocation31]  ;;  %s2032_s14 = smov [#allocation18]  ;;  %v651_v55 = vld [vmem:[%s2020_s17] sm:$0x3]  ;;  %v728_v6 = vmov %v1960_v6  ;;  %v731_v7 = vmov %v1962_v7 }
 0x122   : >>> { %v517_v1 = vrot.slane %v516_v62, 2  ;;  %v556_v2 = vadd.f32 %v555_v63, %v554_v61  ;;  %v874_v58 = vld [vmem:[%s2026_s18] sm:$0x3]  ;;  %s643_s9 = smov [#allocation32]  ;;  %s867_s10 = smov [#allocation32]  ;;  %v742_v6 = vmov %v1960_v6  ;;  %v745_v7 = vmov %v1962_v7 }
 0x123   : >>> { %v537_v3 = vrot.slane %v536_v0, 2  ;;  %v876_v61 = vld [vmem:[%s2032_s14] sm:$0x3]  ;;  %vm735_vm0 = vcmp.eq.s32.totalorder %v731_v7, %v728_v6  ;;  %v701_v6 = vmov %v1960_v6  ;;  %v704_v7 = vmov %v1962_v7  ;;  %s501_s16 = sadd.s32 1, %s1821_s16  }
 0x124   : >>> { %v518_v4 = vadd.f32 %v517_v1, %v516_v62  ;;  %v557_v5 = vrot.slane %v556_v2, 2  ;;  %v715_v6 = vmov %v1960_v6  ;;  %v718_v7 = vmov %v1962_v7  ;;  %p498_p11 = scmp.ge.s32.totalorder %s501_s16, 3  }
 0x125   : >>> { %v538_v8 = vadd.f32 %v537_v3, %v536_v0  ;;  %vm750_vm1 = vcmp.eq.s32.totalorder %v745_v7, %v742_v6  ;;  %vm709_vm3 = vcmp.eq.s32.totalorder %v704_v7, %v701_v6  ;;  %vm722_vm4 = vcmp.eq.s32.totalorder %v718_v7, %v715_v6 }
 0x126   : >>> { %v519_v9 = vrot.slane %v518_v4, 1  ;;  %v558_v10 = vadd.f32 %v557_v5, %v556_v2  ;;  %vm764_vm5 = vcmp.eq.s32.totalorder %v1960_v6, 0  ;;  %vm768_vm6 = vcmp.eq.s32.totalorder %v1960_v6, 1 }
 0x127   : >>> { %v539_v11 = vrot.slane %v538_v8, 1  ;;  %v402_v6 = vmov (%p498_p11), %v1960_v6  ;;  %v405_v7 = vmov (%p498_p11), %v1962_v7 }
 0x128   : >>> { %v520_v12 = vadd.f32 %v519_v9, %v518_v4  ;;  %v559_v13 = vrot.slane %v558_v10, 1  ;;  %v455_v6 = vmov (%p498_p11), %v1960_v6  ;;  %vm417_vm7 = vcmp.eq.s32.totalorder (%p498_p11), %v405_v7, %v402_v6 }
 0x129   : >>> { %v540_v14 = vadd.f32 %v539_v11, %v538_v8  ;;  %v458_v7 = vmov (%p498_p11), %v1962_v7  ;;  %v421_v6 = vmov (%p498_p11), %v1960_v6 }
 0x12a   : >>> { %521 = vst [vmem:[%s503_s23] sm:$0x1] %v520_v12  ;;  %v560_v15 = vadd.f32 %v559_v13, %v558_v10  ;;  %s605_s23 = smov [#allocation28]  ;;  %v424_v7 = vmov (%p498_p11), %v1962_v7  ;;  %v438_v6 = vmov (%p498_p11), %v1960_v6 }
 0x12b   : >>> { %541 = vst [vmem:[%s523_s24] sm:$0x1] %v540_v14  ;;  %s562_s24 = smov [#allocation29]  ;;  %v441_v7 = vmov (%p498_p11), %v1962_v7 }
 0x12c   : >>> { %561 = vst [vmem:[%s543_s25] sm:$0x1] %v560_v15  ;;  %s563_s25 = smov [#allocation30]  ;;  %s607_s24 = smov %s562_s24 }
 0x12d   : >>> { %s609_s25 = smov %s563_s25 }
 0x131   : >>> { %v565_v18 = vld [vmem:[%s564_s30] sm:$0xff]  ;;  %s626_s30 = smov [#allocation30] }
 0x132   : >>> { %v567_v16 = vld [vmem:[%s566_s27] sm:$0xff]  ;;  %v588_v33 = vand.u32 2147483647, %v565_v18  ;;  %s611_s27 = smov [#allocation29] }
 0x133   : >>> { %v571_v17 = vmul.f32 2.0, %v567_v16  ;;  %v569_v19 = vld [vmem:[%s568_s20] sm:$0xff]  ;;  %v589_v36 = vand.u32 2147483647, %v567_v16  ;;  %s624_s20 = smov [#allocation31] }
 0x134   : >>> { %v570_v20 = vsub.f32 %v569_v19, %v565_v18  ;;  %v590_v34 = vand.u32 2147483647, %v569_v19 }
 0x135   : >>> { %1743 = vrcp.f32 %v571_v17 }
 0x136   : >>> { %v591_v35 = vmin.f32 %v588_v33, %v590_v34 }
 0x138   : >>> { %v592_v37 = vmul.f32 1.1920929e-08, %v591_v35 }
 0x13a   : >>> { %vm593_vm11 = vcmp.le.f32.partialorder %v589_v36, %v592_v37 }
 0x142   : >>> { %v1744_v21 = vpop.eup %1743 }
 0x143   : >>> { %v573_v22 = vmul.f32 %v1744_v21, %v570_v20 }
 0x145   : >>> { %v575_v23 = vmul.f32 %v573_v22, %v573_v22  ;;  %vm574_vm10 = vcmp.ge.f32.partialorder %v573_v22, 0.0 }
 0x147   : >>> { %v576_v24 = vadd.f32 1.0, %v575_v23 }
 0x149   : >>> { %1745 = vrsqrt.f32 %v576_v24  ;;  %vm579_vm8 = vcmp.eq.f32.partialorder %v576_v24, inf  ;;  %v582_v26 = vand.u32 2147483648, %v576_v24  ;;  %vm581_vm9 = vcmp.eq.f32.partialorder %v576_v24, 0.0 }
 0x156   : >>> { %v1746_v25 = vpop.eup %1745 }
 0x157   : >>> { %v578_v27 = vmul.f32 %v1746_v25, %v576_v24 }
 0x159   : >>> { %v580_v28 = vsel %vm579_vm8, %v576_v24, %v578_v27  ;;  %vm470_vm8 = vcmp.eq.s32.totalorder (%p498_p11), %v458_v7, %v455_v6 }
 0x15a   : >>> { %v583_v29 = vsel %vm581_vm9, %v582_v26, %v580_v28 }
 0x15b   : >>> { %v584_v30 = vxor.u32 2147483648, %v583_v29 }
 0x15d   : >>> { %v585_v31 = vsel %vm574_vm10, %v583_v29, %v584_v30 }
 0x15e   : >>> { %v586_v32 = vadd.f32 %v585_v31, %v573_v22 }
 0x160   : >>> { %1747 = vrcp.f32 %v586_v32 }
 0x16d   : >>> { %v1748_v38 = vpop.eup %1747 }
 0x16e   : >>> { %v594_v39 = vsel %vm593_vm11, 0.0, %v1748_v38 }
 0x16f   : >>> { %v595_v40 = vmul.f32 %v594_v39, %v594_v39  ;;  %v599_v41 = vmul.f32 %v594_v39, %v567_v16 }
 0x171   : >>> { %v596_v42 = vadd.f32 1.0, %v595_v40  ;;  %v600_v43 = vsub.f32 %v565_v18, %v599_v41  ;;  %v602_v44 = vadd.f32 %v599_v41, %v569_v19 }
 0x173   : >>> { %1749 = vrsqrt.f32 %v596_v42  ;;  %604 = vst [vmem:[%s603_s21] sm:$0xff] %v600_v43  ;;  %606 = vst [vmem:[%s605_s23] sm:$0xff] %v602_v44  ;;  %s641_s21 = smov [#allocation31]  ;;  %s2016_s23 = smov [#allocation20] }
 0x174   : >>> { %v649_v53 = vld [vmem:[%s2016_s23] sm:$0x3] }
 0x180   : >>> { %v1750_v45 = vpop.eup %1749 }
 0x181   : >>> { %608 = vst [vmem:[%s607_s24] sm:$0xff] %v1750_v45  ;;  %v598_v46 = vmul.f32 %v1750_v45, %v594_v39  ;;  %s639_s24 = smov [#allocation32] }
 0x183   : >>> { %610 = vst [vmem:[%s609_s25] sm:$0xff] %v598_v46  ;;  %s2018_s25 = smov [#allocation21] }
 0x184   : >>> { %v650_v54 = vld [vmem:[%s2018_s25] sm:$0x3] }
 0x188   : >>> { %v612_v47 = vld [vmem:[%s611_s27] ss:$0 sm:$0xff]  ;;  %s2022_s27 = smov [#allocation23] }
 0x189   : >>> { %v621_v48 = vsel %vm620_vm12, %v612_v47, 0.0  ;;  %v652_v56 = vld [vmem:[%s2022_s27] sm:$0x3] }
 0x18a   : >>> { %622 = vadd.xlane.f32.xlu0 %v621_v48  ;;  %v627_v49 = vld [vmem:[%s626_s30] ss:$0 sm:$0xff]  ;;  %s2024_s30 = smov [#allocation12] }
 0x18b   : >>> { %v636_v50 = vsel %vm635_vm13, %v627_v49, 0.0  ;;  %v873_v57 = vld [vmem:[%s2024_s30] sm:$0x3] }
 0x18e   : >>> { %637 = vadd.xlane.f32.xlu0 %v636_v50 }
 0x213   : >>> { %v623_v51 = vpop.xlane.xlu0 %622 }
 0x214   : >>> { %625 = vst [vmem:[%s624_s20] sm:$0xff] %v623_v51  ;;  %s2028_s20 = smov [#allocation16] }
 0x215   : >>> { %v875_v59 = vld [vmem:[%s2028_s20] sm:$0x3] }
 0x217   : >>> { %v638_v52 = vpop.xlane.xlu0 %637 }
 0x218   : >>> { %640 = vst [vmem:[%s639_s24] sm:$0xff] %v638_v52  ;;  %s2052_s24 = smov [#allocation23] }
 0x21b   : >>> { %v642_v60 = vld [vmem:[%s641_s21] sm:$0xff]  ;;  %s2050_s21 = smov [#allocation22] }
 0x21c   : >>> { %v866_v62 = vld [vmem:[%s865_s19] sm:$0xff]  ;;  %v653_v63 = vmul.f32 %v649_v53, %v642_v60  ;;  %v656_v0 = vmul.f32 %v650_v54, %v642_v60  ;;  %v660_v1 = vmul.f32 %v651_v55, %v642_v60  ;;  %v663_v2 = vmul.f32 %v652_v56, %v642_v60  ;;  %s2048_s19 = smov [#allocation12] }
 0x21d   : >>> { %v877_v3 = vmul.f32 %v873_v57, %v866_v62  ;;  %v880_v4 = vmul.f32 %v874_v58, %v866_v62  ;;  %v884_v5 = vmul.f32 %v875_v59, %v866_v62  ;;  %v887_v8 = vmul.f32 %v876_v61, %v866_v62 }
 0x21f   : >>> { %v644_v9 = vld [vmem:[%s643_s9] sm:$0xff]  ;;  %s671_s9 = smov [#allocation30] }
 0x220   : >>> { %v868_v10 = vld [vmem:[%s867_s10] sm:$0xff]  ;;  %v654_v11 = vmul.f32 %v651_v55, %v644_v9  ;;  %v657_v12 = vmul.f32 %v652_v56, %v644_v9  ;;  %v659_v13 = vmul.f32 %v649_v53, %v644_v9  ;;  %v662_v14 = vmul.f32 %v650_v54, %v644_v9  ;;  %s669_s10 = smov [#allocation29] }
 0x221   : >>> { %v878_v15 = vmul.f32 %v875_v59, %v868_v10  ;;  %v881_v16 = vmul.f32 %v876_v61, %v868_v10  ;;  %v883_v17 = vmul.f32 %v873_v57, %v868_v10  ;;  %v886_v18 = vmul.f32 %v874_v58, %v868_v10  ;;  %v670_v27 = vld [vmem:[%s669_s10] ss:$0 sm:$0xff]  ;;  %s698_s10 = smov [#allocation27] }
 0x222   : >>> { %v655_v19 = vsub.f32 %v653_v63, %v654_v11  ;;  %v658_v20 = vsub.f32 %v656_v0, %v657_v12  ;;  %v661_v21 = vadd.f32 %v660_v1, %v659_v13  ;;  %v664_v22 = vadd.f32 %v663_v2, %v662_v14  ;;  %v672_v28 = vld [vmem:[%s671_s9] ss:$0 sm:$0xff]  ;;  %s697_s9 = smov [#allocation20] }
 0x223   : >>> { %v879_v23 = vsub.f32 %v877_v3, %v878_v15  ;;  %v882_v24 = vsub.f32 %v880_v4, %v881_v16  ;;  %v885_v25 = vadd.f32 %v884_v5, %v883_v17  ;;  %v888_v26 = vadd.f32 %v887_v8, %v886_v18  ;;  %v705_v63 = vld [vmem:[%s698_s10] ss:$0 sm:$0xff]  ;;  %s941_s10 = sadd.s32 (%p498_p11), 1, %s1817_s28  }
 0x224   : >>> { %666 = vst [vmem:[%s2018_s25] sm:$0x3] %v658_v20  ;;  %668 = vst [vmem:[%s2022_s27] sm:$0x3] %v664_v22  ;;  %s2054_s25 = smov [#allocation20]  ;;  %s739_s27 = smov [#allocation28] }
 0x225   : >>> { %665 = vst [vmem:[%s2016_s23] sm:$0x3] %v655_v19  ;;  %667 = vst [vmem:[%s2020_s17] sm:$0x3] %v661_v21  ;;  %s2056_s17 = smov [#allocation16]  ;;  %s2064_s23 = smov [#allocation21]  ;;  %v746_v59 = vld [vmem:[%s739_s27] ss:$0 sm:$0xff] }
 0x226   : >>> { %889 = vst [vmem:[%s2024_s30] sm:$0x3] %v879_v23  ;;  %890 = vst [vmem:[%s2026_s18] sm:$0x3] %v882_v24  ;;  %s2058_s18 = smov [#allocation14]  ;;  %s725_s30 = smov [#allocation22] }
 0x227   : >>> { %891 = vst [vmem:[%s2028_s20] sm:$0x3] %v885_v25  ;;  %892 = vst [vmem:[%s2032_s14] sm:$0x3] %v888_v26  ;;  %s2062_s14 = smov [#allocation18]  ;;  %s738_s20 = smov [#allocation23] }
 0x228   : >>> { %s841_s27 = smov [#allocation21]  ;;  %p494_p12 = scmp.ge.s32.totalorder (%p498_p11), %s941_s10, 15 }
 0x229   : >> { %s2266_s28 = smov (%p498_p11), %s941_s10 }
 0x22b   : >>> { %v680_v30 = vld [vmem:[%s2052_s24] sm:$0x3] }
 0x22c   : >>> { %v679_v29 = vld [vmem:[%s2050_s21] sm:$0x3]  ;;  %v688_v36 = vmul.f32 %v680_v30, %v672_v28  ;;  %v691_v42 = vmul.f32 %v680_v30, %v670_v27 }
 0x22d   : >>> { %v677_v31 = vld [vmem:[%s2054_s25] sm:$0x3]  ;;  %v687_v35 = vmul.f32 %v679_v29, %v670_v27  ;;  %v690_v37 = vmul.f32 %v679_v29, %v672_v28 }
 0x22e   : >>> { %v895_v32 = vld [vmem:[%s2048_s19] ss:$0 sm:$0xff]  ;;  %v1635_v34 = vld [vmem:[%s2048_s19 + $0x1] ss:$0 sm:$0xff]  ;;  %v681_v48 = vmul.f32 %v677_v31, %v670_v27  ;;  %v684_v49 = vmul.f32 %v677_v31, %v672_v28 }
 0x22f   : >>> { %v1634_v33 = vld [vmem:[%s2048_s19 - $0x1] sm:$0x2]  ;;  %v1637_v40 = vld [vmem:[%s2056_s17 + $0x1] sm:$0x1]  ;;  %v689_v47 = vsub.f32 %v687_v35, %v688_v36  ;;  %v692_v53 = vadd.f32 %v691_v42, %v690_v37 }
 0x230   : >>> { %v902_v38 = vsel %vm825_vm14, %v895_v32, %v1634_v33  ;;  %v906_v39 = vld [vmem:[%s2056_s17] ss:$0 sm:$0xff]  ;;  %v914_v43 = vsel %vm837_vm15, %v1635_v34, %v1637_v40  ;;  %v1639_v45 = vld [vmem:[%s2058_s18 + $0x1] ss:$0 sm:$0xff] }
 0x231   : >>> { %v919_v41 = vld [vmem:[%s2058_s18] ss:$0 sm:$0xff]  ;;  %905 = vst [vmem:[%s2048_s19] sm:$0x3] %v902_v38  ;;  %916 = vst [vmem:[%s2056_s17] sm:$0x3] %v914_v43  ;;  %v1641_v51 = vld [vmem:[%s2062_s14 + $0x1] sm:$0x1] }
 0x232   : >>> { %v1638_v44 = vld [vmem:[%s2058_s18 - $0x1] sm:$0x2]  ;;  %1636 = vst [vmem:[%s2048_s19 + $0x1] sm:$0x1] %v906_v39  ;;  %v938_v54 = vsel %vm837_vm15, %v1639_v45, %v1641_v51  ;;  %695 = vst [vmem:[%s2050_s21] sm:$0x3] %v689_v47  ;;  %s712_s19 = smov [#allocation21] }
 0x233   : >>> { %v930_v46 = vld [vmem:[%s2062_s14] ss:$0 sm:$0xff]  ;;  %v926_v50 = vsel %vm825_vm14, %v919_v41, %v1638_v44  ;;  %696 = vst [vmem:[%s2052_s24] sm:$0x3] %v692_v53  ;;  %s2106_s21 = smov [#allocation22]  ;;  %s1824_s24 = smov 1  }
 0x234   : >>> { %v678_v52 = vld [vmem:[%s2064_s23] sm:$0x3]  ;;  %929 = vst [vmem:[%s2058_s18] sm:$0x3] %v926_v50  ;;  %940 = vst [vmem:[%s2062_s14] sm:$0x3] %v938_v54  ;;  %s754_s17 = smov [#allocation21]  ;;  %s2109_s14 = smov [#allocation23] }
 0x235   : >>> { %v682_v55 = vmul.f32 %v678_v52, %v672_v28  ;;  %v685_v56 = vmul.f32 %v678_v52, %v670_v27  ;;  %1640 = vst [vmem:[%s2058_s18 + $0x1] sm:$0x1] %v930_v46  ;;  %s1825_s18 = smov 127  }
 0x237   : >>> { %v683_v57 = vsub.f32 %v681_v48, %v682_v55  ;;  %v686_v58 = vadd.f32 %v685_v56, %v684_v49 }
 0x239   : >>> { %693 = vst [vmem:[%s2054_s25] sm:$0x3] %v683_v57  ;;  %694 = vst [vmem:[%s2064_s23] sm:$0x3] %v686_v58  ;;  %v732_v60 = vld [vmem:[%s725_s30] sm:$0x3]  ;;  %s753_s25 = smov [#allocation20]  ;;  %s817_s23 = smov [#allocation20] }
 0x23a   : >>> { %v736_v61 = vsel %vm735_vm0, 0.0, %v732_v60  ;;  %v747_v62 = vld [vmem:[%s738_s20] sm:$0x3] }
 0x23b   : >>> { %737 = vst [vmem:[%s725_s30] sm:$0x3] %v736_v61  ;;  %v751_v0 = vsel %vm750_vm1, %v746_v59, %v747_v62  ;;  %s818_s30 = smov [#allocation22] }
 0x23c   : >>> { %752 = vst [vmem:[%s738_s20] sm:$0x3] %v751_v0  ;;  %s842_s20 = smov [#allocation23] }
 0x240   : >>> { %v706_v1 = vld [vmem:[%s697_s9] sm:$0x3] }
 0x241   : >>> { %v719_v2 = vld [vmem:[%s712_s19] sm:$0x3]  ;;  %v710_v3 = vsel %vm709_vm3, %v705_v63, %v706_v1 }
 0x242   : >>> { %v723_v4 = vsel %vm722_vm4, 0.0, %v719_v2  ;;  %711 = vst [vmem:[%s697_s9] sm:$0x3] %v710_v3  ;;  %v791_v5 = vld [vmem:[%s2106_s21] sm:$0x3]  ;;  %s406_s9 = smov (%p498_p11), [#allocation20] }
 0x243   : >>> { %724 = vst [vmem:[%s712_s19] sm:$0x3] %v723_v4  ;;  %792 = vrot.lane.b32.xlu0 %v791_v5, %s1824_s24  ;;  %v787_v11 = vld [vmem:[%s2109_s14] sm:$0x3]  ;;  %s425_s19 = smov (%p498_p11), [#allocation21] }
 0x244   : >>> { %v808_v12 = vld [vmem:[%s2109_s14] sm:$0x3] }
 0x245   : >>> { %v790_v30 = vld [vmem:[%s2106_s21] sm:$0x3] }
 0x249   : >>> { %v759_v8 = vld [vmem:[%s753_s25] sm:$0x3] }
 0x24a   : >>> { %760 = vrot.lane.b32.xlu1 %v759_v8, %s1824_s24  ;;  %v755_v9 = vld [vmem:[%s754_s17] sm:$0x3] }
 0x24b   : >>> { %v776_v10 = vld [vmem:[%s754_s17] sm:$0x3] }
 0x24c   : >>> { %v758_v18 = vld [vmem:[%s753_s25] sm:$0x3] }
 0x24e   : >>> { %756 = vrot.lane.b32.xlu1 %v755_v9, %s1824_s24 }
 0x252   : >>> { %777 = vrot.lane.b32.xlu1 %v776_v10, %s1825_s18 }
 0x256   : >>> { %788 = vrot.lane.b32.xlu1 %v787_v11, %s1824_s24  ;;  %s459_s24 = smov (%p498_p11), [#allocation23] }
 0x25a   : >>> { %809 = vrot.lane.b32.xlu1 %v808_v12, %s1825_s18 }
 0x2b5   : >>> { %v793_v20 = vpop.permute.xlu0 %792 }
 0x2b6   : >>> { %v797_v22 = vsel %vm764_vm5, %v791_v5, %v793_v20 }
 0x2bc   : >>> { %v761_v13 = vpop.permute.xlu1 %760 }
 0x2bd   : >>> { %v765_v14 = vsel %vm764_vm5, %v759_v8, %v761_v13 }
 0x2c0   : >>> { %v757_v15 = vpop.permute.xlu1 %756 }
 0x2c1   : >>> { %v769_v16 = vsel %vm768_vm6, %v757_v15, %v765_v14 }
 0x2c2   : >>> { %v775_v17 = vsel %vm1479_vm2, %v769_v16, 0.0 }
 0x2c3   : >>> { %783 = vst [vmem:[%s753_s25] sm:$0x3] %v775_v17 }
 0x2c4   : >>> { %v778_v19 = vpop.permute.xlu1 %777 }
 0x2c5   : >>> { %v782_v21 = vsel %vm768_vm6, %v758_v18, %v778_v19 }
 0x2c6   : >>> { %784 = vst [vmem:[%s754_s17] sm:$0x3] %v782_v21 }
 0x2c8   : >>> { %v789_v23 = vpop.permute.xlu1 %788 }
 0x2c9   : >>> { %v801_v24 = vsel %vm768_vm6, %v789_v23, %v797_v22 }
 0x2ca   : >>> { %v819_v25 = vld [vmem:[%s817_s23] ss:$0 sm:$0xff]  ;;  %v1627_v27 = vld [vmem:[%s817_s23 + $0x1] ss:$0 sm:$0xff]  ;;  %v807_v29 = vsel %vm1479_vm2, %v801_v24, 0.0 }
 0x2cb   : >>> { %v1626_v26 = vld [vmem:[%s817_s23 - $0x1] sm:$0x2]  ;;  %815 = vst [vmem:[%s2106_s21] sm:$0x3] %v807_v29  ;;  %s442_s21 = smov (%p498_p11), [#allocation22] }
 0x2cc   : >>> { %v826_v28 = vsel %vm825_vm14, %v819_v25, %v1626_v26  ;;  %v810_v31 = vpop.permute.xlu1 %809 }
 0x2cd   : >>> { %829 = vst [vmem:[%s817_s23] sm:$0x3] %v826_v28  ;;  %v843_v32 = vld [vmem:[%s841_s27] ss:$0 sm:$0xff]  ;;  %v1631_v34 = vld [vmem:[%s841_s27 + $0x1] ss:$0 sm:$0xff]  ;;  %v814_v35 = vsel %vm768_vm6, %v790_v30, %v810_v31 }
 0x2ce   : >>> { %v1630_v33 = vld [vmem:[%s841_s27 - $0x1] sm:$0x2]  ;;  %816 = vst [vmem:[%s2109_s14] sm:$0x3] %v814_v35 }
 0x2cf   : >>> { %v850_v36 = vsel %vm825_vm14, %v843_v32, %v1630_v33 }
 0x2d0   : >>> { %853 = vst [vmem:[%s841_s27] sm:$0x3] %v850_v36 }
 0x2d2   : >>> { %v830_v37 = vld [vmem:[%s818_s30] ss:$0 sm:$0xff]  ;;  %v1629_v38 = vld [vmem:[%s818_s30 + $0x1] sm:$0x1] }
 0x2d3   : >>> { %1628 = vst [vmem:[%s817_s23 + $0x1] sm:$0x1] %v830_v37  ;;  %v838_v39 = vsel %vm837_vm15, %v1627_v27, %v1629_v38 }
 0x2d4   : >>> { %840 = vst [vmem:[%s818_s30] sm:$0x3] %v838_v39 }
 0x2d5   : >>> { %v854_v40 = vld [vmem:[%s842_s20] ss:$0 sm:$0xff]  ;;  %v1633_v41 = vld [vmem:[%s842_s20 + $0x1] sm:$0x1] }
 0x2d6   : >>> { %1632 = vst [vmem:[%s841_s27 + $0x1] sm:$0x1] %v854_v40  ;;  %v862_v42 = vsel %vm837_vm15, %v1631_v34, %v1633_v41 }
 0x2d7   : >>> { %864 = vst [vmem:[%s842_s20] sm:$0x3] %v862_v42  ;;  %500 = sbr.rel (!%p498_p11) target bundleno = 283 (0x11b), region = 462 }
 0x2da   : >> { %v412_v43 = vld [vmem:[%s406_s9] sm:$0x3] (%p498_p11) }
 0x2db   : >> { %v413_v45 = vsel (%p498_p11), %vm1479_vm2, %v412_v43, 0.0  ;;  %v448_v47 = vld [vmem:[%s442_s21] sm:$0x3] (%p498_p11) }
 0x2dc   : >> { %v414_v49 = vmul.f32 %v413_v45, %v413_v45  ;;  %v449_v51 = vsel %vm1479_vm2, %v448_v47, 0.0 }
 0x2dd   : >> { %v431_v44 = vld [vmem:[%s425_s19] sm:$0x3]  ;;  %v450_v53 = vmul.f32 %v449_v51, %v449_v51 }
 0x2de   : >> { %v432_v46 = vsel %vm1479_vm2, %v431_v44, 0.0  ;;  %v465_v48 = vld [vmem:[%s459_s24] sm:$0x3]  ;;  %v418_v56 = vsel %vm417_vm7, 0.0, %v414_v49 }
 0x2df   : >> { %v433_v50 = vmul.f32 %v432_v46, %v432_v46  ;;  %v466_v52 = vsel %vm1479_vm2, %v465_v48, 0.0 }
 0x2e0   : >> { %v467_v55 = vmul.f32 %v466_v52, %v466_v52 }
 0x2e1   : >> { %v435_v54 = vadd.f32 %v433_v50, %v414_v49  ;;  %v434_v57 = vadd.f32 %v433_v50, %v418_v56 }
 0x2e2   : >> { %v471_v60 = vsel %vm470_vm8, 0.0, %v467_v55 }
 0x2e3   : >> { %v452_v58 = vadd.f32 %v450_v53, %v435_v54  ;;  %v451_v59 = vadd.f32 %v450_v53, %v434_v57 }
 0x2e5   : >> { %v473_v61 = vadd.f32 %v467_v55, %v452_v58  ;;  %v472_v62 = vadd.f32 %v471_v60, %v451_v59 }
 0x2e7   : >> { %474 = vadd.xlane.f32.xlu0 %v473_v61 }
 0x2eb   : >> { %482 = vadd.xlane.f32.xlu0 %v472_v62 }
 0x370   : >> { %v475_v63 = vpop.xlane.xlu0 %474 }
 0x371   : >> { %v476_v0 = vrot.slane %v475_v63, 4 }
 0x373   : >> { %v477_v1 = vadd.f32 %v476_v0, %v475_v63 }
 0x374   : >> { %v483_v2 = vpop.xlane.xlu0 %482 }
 0x375   : >> { %v478_v3 = vrot.slane %v477_v1, 2  ;;  %v484_v4 = vrot.slane %v483_v2, 4 }
 0x377   : >> { %v485_v5 = vadd.f32 %v484_v4, %v483_v2  ;;  %v479_v8 = vadd.f32 %v478_v3, %v477_v1 }
 0x379   : >> { %v486_v9 = vrot.slane %v485_v5, 2  ;;  %v480_v11 = vrot.slane %v479_v8, 1 }
 0x37b   : >> { %v487_v10 = vadd.f32 %v486_v9, %v485_v5  ;;  %v481_v14 = vadd.f32 %v480_v11, %v479_v8 }
 0x37d   : >> { %v488_v12 = vrot.slane %v487_v10, 1 }
 0x37f   : >> { %v489_v13 = vadd.f32 %v488_v12, %v487_v10 }
 0x381   : >> { %1664 = vpush %v489_v13 }
 0x382   : >> { %1666 = vpush %v481_v14 }
 0x3b2   : >> { %s1665_s16 = spop %1664 }
 0x3b3   : >> { %s1667_s25 = spop %1666 }
 0x3b4   : >> { %s492_s17 = smul.f32 1e-10, %s1667_s25 }
 0x3b6   : >> { %p493_p13 = scmp.le.f32.partialorder %s1665_s16, %s492_s17 }
 0x3b8   : >> { %p495_p0 = por %p494_p12, %p493_p13 }
 0x3ba   : > { %943 = sbr.rel (!%p495_p0) target bundleno = 282 (0x11a), region = 473 }
 0x3bf PF: > { %s948_s18 = smov [#allocation20]  ;;  %v952_v6 = vmov %v1960_v6  ;;  %v955_v7 = vmov %v1962_v7  ;;  %v1008_v15 = vld [vmem:[#allocation12] sm:$0x3]  ;;  %v1016_v16 = vld [vmem:[#allocation14] sm:$0x3]  ;;  %s2267_s28 = scalar_lea.vmem [#allocation13], %s1956_s26 }
 0x3c0   : > { %v972_v6 = vmov %v1960_v6  ;;  %v975_v7 = vmov %v1962_v7  ;;  %v956_v17 = vld [vmem:[%s948_s18] sm:$0x3]  ;;  %vm959_vm9 = vcmp.eq.s32.totalorder %v955_v7, %v952_v6  ;;  %1011 = vst [vmem:[%s2267_s28] sm:$0x3] %v1008_v15  ;;  %s2268_s14 = scalar_lea.vmem [#allocation15], %s1956_s26  ;;  %s968_s23 = smov [#allocation23] }
 0x3c1   : > { %vm979_vm10 = vcmp.eq.s32.totalorder %v975_v7, %v972_v6  ;;  %1019 = vst [vmem:[%s2268_s14] sm:$0x3] %v1016_v16  ;;  %v1024_v18 = vld [vmem:[#allocation16] sm:$0x3]  ;;  %v960_v19 = vsel %vm959_vm9, %v956_v17, 0.0  ;;  %s2269_s27 = scalar_lea.vmem [#allocation17], %s1956_s26  ;;  %s2270_s30 = scalar_lea.vmem [#allocation19], %s1956_s26 }
 0x3c2   : > { %1027 = vst [vmem:[%s2269_s27] sm:$0x3] %v1024_v18  ;;  %v1032_v20 = vld [vmem:[#allocation18] sm:$0x3]  ;;  %v961_v21 = vrot.slane %v960_v19, 4  ;;  %v976_v22 = vld [vmem:[%s968_s23] sm:$0x3] }
 0x3c3   : > { %1035 = vst [vmem:[%s2270_s30] sm:$0x3] %v1032_v20  ;;  %v980_v23 = vsel %vm979_vm10, %v976_v22, 0.0  ;;  %s944_s20 = sand.u32 7, %s1797_s11   ;;  %s2271_s19 = scalar_lea.vmem [#allocation9], %s1958_s29 }
 0x3c4   : > { %v962_v24 = vadd.f32 %v961_v21, %v960_v19  ;;  %v981_v25 = vrot.slane %v980_v23, 4  ;;  %s945_s10 = scalar_lea.vmem [#allocation8], %s944_s20  ;;  %s947_s9 = scalar_lea.vmem [#allocation10], %s944_s20 }
 0x3c5   : > { %s949_s10 = smov %s945_s10  ;;  %s969_s9 = smov %s947_s9 }
 0x3c6   : > { %v963_v26 = vrot.slane %v962_v24, 2  ;;  %v982_v6 = vadd.f32 %v981_v25, %v980_v23  ;;  %s2272_s21 = scalar_lea.vmem [#allocation11], %s1958_s29  ;;  %s1063_s24 = sshrl.u32 (%p1925_p4), %s1797_s11, 3 }
 0x3c7   : > { %s1064_s16 = sadd.s32 (%p1925_p4), %s1801_s12, %s1063_s24  ;;  %s2273_s25 = scalar_lea.vmem (%p1925_p4), [#allocation9], %s1958_s29 }
 0x3c8   : > { %v964_v7 = vadd.f32 %v963_v26, %v962_v24  ;;  %v983_v27 = vrot.slane %v982_v6, 2  ;;  %s1648_s17 = sshll.u32 (%p1925_p4), %s1064_s16, 1 }
 0x3c9   : > { %s1066_s14 = scalar_lea.vmem (%p1925_p4), %s2247_s4, %s1648_s17 }
 0x3ca   : > { %v965_v28 = vrot.slane %v964_v7, 1  ;;  %v984_v29 = vadd.f32 %v983_v27, %v982_v6 }
 0x3cc   : > { %v966_v30 = vadd.f32 %v965_v28, %v964_v7  ;;  %v985_v31 = vrot.slane %v984_v29, 1 }
 0x3ce   : > { %967 = vst [vmem:[%s949_s10] sm:$0x1] %v966_v30  ;;  %v986_v32 = vadd.f32 %v985_v31, %v984_v29 }
 0x3d0   : > { %987 = vst [vmem:[%s969_s9] sm:$0x1] %v986_v32 }
 0x3d4   : > { %1062 = sbr.rel (!%p1925_p4) target bundleno = 991 (0x3df), region = 158 }
 0x3d5   : > { %v992_v33 = vld [vmem:[#allocation8] sm:$0x3] }
 0x3d6   : > { %995 = vst [vmem:[%s2271_s19] sm:$0x3] %v992_v33 }
 0x3d7   : > { %v1000_v34 = vld [vmem:[#allocation10] sm:$0x3] }
 0x3d8   : > { %1003 = vst [vmem:[%s2272_s21] sm:$0x3] %v1000_v34 }
 0x3dd   : > { %v1083_v35 = vld [vmem:[%s2273_s25] sm:$0x3] }
 0x3de   : > { %1084 = vst [vmem:[%s1066_s14] sm:$0x3] %v1083_v35 }
 0x3df PF: > { %1102 = sbr.rel (!%p1925_p4) target bundleno = 999 (0x3e7), region = 192  ;;  %s1103_s23 = sshrl.u32 (%p1925_p4), %s1797_s11, 3 }
 0x3e0   : > { %s1104_s27 = sadd.s32 (%p1925_p4), %s1801_s12, %s1103_s23  ;;  %s2274_s30 = scalar_lea.vmem (%p1925_p4), [#allocation11], %s1958_s29 }
 0x3e1   : > { %s1649_s20 = sshll.u32 (%p1925_p4), %s1104_s27, 1 }
 0x3e2   : > { %s1106_s19 = scalar_lea.vmem (%p1925_p4), %s2248_s5, %s1649_s20 }
 0x3e5   : > { %v1123_v36 = vld [vmem:[%s2274_s30] sm:$0x3] }
 0x3e6   : > { %1124 = vst [vmem:[%s1106_s19] sm:$0x3] %v1123_v36 }
 0x3e7 PF: > { %s1650_s22 = sshll.u32 %s1801_s12, 1  ;;  %s2275_s24 = scalar_lea.vmem [#allocation13], %s1956_s26 }
 0x3e8   : > { %s1141_s21 = sadd.s32 %s1797_s11, %s1650_s22  ;;  %v1160_v37 = vld [vmem:[%s2275_s24] sm:$0x3]  ;;  %s2276_s16 = scalar_lea.vmem [#allocation15], %s1956_s26 }
 0x3e9   : > { %v1197_v38 = vld [vmem:[%s2276_s16] sm:$0x3]  ;;  %s1651_s29 = sshll.u32 %s1141_s21, 1  ;;  %s2277_s25 = scalar_lea.vmem [#allocation17], %s1956_s26 }
 0x3ea   : > { %v1234_v39 = vld [vmem:[%s2277_s25] sm:$0x3]  ;;  %s2278_s17 = scalar_lea.vmem [#allocation19], %s1956_s26  ;;  %s1143_s14 = scalar_lea.vmem %s2249_s6, %s1651_s29 }
 0x3eb   : > { %v1271_v40 = vld [vmem:[%s2278_s17] sm:$0x3]  ;;  %s1180_s30 = scalar_lea.vmem %s2250_s7, %s1651_s29  ;;  %1161 = vst [vmem:[%s1143_s14] sm:$0x3] %v1160_v37  ;;  %s1217_s20 = scalar_lea.vmem %s2251_s8, %s1651_s29 }
 0x3ec   : > { %1198 = vst [vmem:[%s1180_s30] sm:$0x3] %v1197_v38  ;;  %s2279_s19 = sld [smem:[#allocation38_spill]]  ;;  %1235 = vst [vmem:[%s1217_s20] sm:$0x3] %v1234_v39 }
 0x3f2   : > { %s1254_s22 = scalar_lea.vmem %s2279_s19, %s1651_s29 }
 0x3f3   : > { %1272 = vst [vmem:[%s1254_s22] sm:$0x3] %v1271_v40 }
 0x3f4 PF: > { %s16_s15 = sadd.s32 1, %s1813_s15   ;;  %s2280_s30 = sld [smem:[#allocation33_spill]] }
 0x3f5   : > { %p13_p1 = scmp.ge.s32.totalorder %s16_s15, 6   ;;  %s2281_s10 = sld [smem:[#allocation37_spill]] }
 0x3f6   : > { %s2282_s12 = sld [smem:[#allocation34_spill]]  ;;  %s2285_s11 = smov %s1805_s13 }
 0x3f7   : > { %s2283_s26 = sld [smem:[#allocation35_spill]] }
 0x3f8   : > { %s2284_s14 = sld [smem:[#allocation36_spill]] }
 0x3f9   :  { %15 = sbr.rel (!%p13_p1) target bundleno = 6 (0x6), region = 484 }
 0x3fd   : > { %s2286_s13 = smov %s2283_s26 }

// kernel: custom-call.16
= control target key start
LH: loop header
LB: loop body
LE: loop exit
PB: predicated region body
PF: predicated region fallthrough
CT: control target
= control target key end

     0   :  { %s723_s9 = smov 0   ;;  %s725_s10 = smov 0   ;;  %s894_s0 = inlined_call_operand.vmem [shape: f32[2,2,3,3], index: 0, kind: input, shape index: {}]   ;;  %s895_s1 = inlined_call_operand.vmem [shape: f32[2,2,3,3], index: 1, kind: output, shape index: {0}]   ;;  %s896_s2 = inlined_call_operand.vmem [shape: f32[2,2,3], index: 2, kind: output, shape index: {1}]  }
   0x1   :  { %s727_s11 = smov 0   ;;  %s729_s12 = smov 0  }
   0x2   :  { %s731_s13 = smov 0   ;;  %s733_s14 = smov 0  }
   0x3   :  { %s735_s15 = smov 0  }
   0x4 LB: > { %s31_s16 = sadd.s32 1, %s692_s13  ;;  %s35_s17 = sadd.s32 1, %s696_s14  ;;  %s700_s15 = sphi %s735_s15, %s9_s15   ;;  %s696_s14 = sphi %s733_s14, %s905_s14   ;;  %s692_s13 = sphi %s731_s13, %s904_s13   ;;  %s688_s12 = sphi %s729_s12, %s903_s12   ;;  %s684_s11 = sphi %s727_s11, %s902_s11   ;;  %s680_s10 = sphi %s725_s10, %s901_s10   ;;  %s676_s9 = sphi %s723_s9, %s900_s9  }
   0x5   : > { %p33_p0 = scmp.ge.s32.totalorder %s31_s16, 2  ;;  %s40_s18 = ssub.s32 0, %s692_s13 }
   0x6   : > { %s546_s19 = smin.u32 %s692_s13, %s40_s18  ;;  %s544_s22 = sadd.s32 4294967295, %s700_s15  }
   0x7   : > { %s907_s16 = smov (%p33_p0, %s31_s16), 0  ;;  %s909_s17 = smov (!%p33_p0, %s35_s17), %s696_s14 }
   0x8   : > { %p37_p1 = scmp.ge.s32.totalorder %s909_s17, 2  ;;  %s42_s20 = sshrl.u32 %s546_s19, 3 }
   0x9   : > { %s46_s21 = ssub.s32 0, %s907_s16  ;;  %p66_p2 = scmp.ne.s32.totalorder %s680_s10, %s676_s9 }
   0xa   : > { %s911_s17 = smov (%p37_p1, %s909_s17), 0  ;;  %s547_s23 = smin.u32 %s46_s21, %s907_s16 }
   0xb   : > { %s48_s24 = sshrl.u32 %s547_s23, 3  ;;  %s51_s25 = ssub.s32 %s696_s14, %s911_s17 }
   0xc   : > { %p67_p3 = scmp.eq.s32.totalorder %s544_s22, 3  ;;  %s52_s26 = ssub.s32 %s42_s20, %s48_s24 }
   0xd   : > { %s56_s27 = sadd.s32 1, %s680_s10  ;;  %s53_s28 = sor.u32 %s52_s26, %s51_s25 }
   0xe   : > { %p775_p4 = por %p67_p3, %p66_p2  ;;  %p54_p5 = scmp.eq.s32.totalorder %s53_s28, 0 }
   0xf   : > { %p549_p6 = scmp.ge.s32.totalorder %s700_s15, 4 }
  0x10   : > { %s780_s30 = scalar_select %p54_p5, %s680_s10, %s56_s27  }
  0x11   : > { %89 = sbr.rel (%p549_p6) target bundleno = 24 (0x18), region = 16  ;;  %s91_s3 = sand.u32 (!%p549_p6), 1, %s700_s15  }
  0x12   : > { %s551_s4 = sshll.u32 (!%p549_p6), %s696_s14, 1  ;;  %s550_s5 = sshll.u32 (!%p549_p6), %s91_s3, 2 }
  0x13   : > { %s97_s6 = sadd.s32 (!%p549_p6), %s692_s13, %s551_s4  ;;  %s93_s20 = scalar_lea.vmem (!%p549_p6), [#allocation1], %s550_s5 }
  0x14   : > { %s552_s7 = sshll.u32 (!%p549_p6), %s97_s6, 2 }
  0x15   : > { %s99_s19 = scalar_lea.vmem (!%p549_p6), %s894_s0, %s552_s7 }
  0x16   : > { %v116_v0 = vld [vmem:[%s99_s19] sm:$0xf] }
  0x17   : > { %117 = vst [vmem:[%s93_s20] sm:$0xf] %v116_v0 }
  0x18 PF: > { %p553_p7 = scmp.ge.s32.totalorder %s700_s15, 1  ;;  %p134_p8 = scmp.lt.s32.totalorder %s700_s15, 5 }
  0x1a   : > { %p135_p9 = pnand %p553_p7, %p134_p8 }
  0x1c   : > { %138 = sbr.rel (%p135_p9) target bundleno = 358 (0x166), region = 50 }
  0x21   : > { %s145_s21 = sand.u32 1, %s544_s22   ;;  %s155_s23 = sand.u32 1, %s676_s9   ;;  %v706_v2 = vmov 0.0  }
  0x22   : > { %s554_s24 = sshll.u32 %s145_s21, 2  ;;  %s792_s25 = sshll.u32 %s155_s23, 1 }
  0x23   : > { %s147_s26 = scalar_lea.vmem [#allocation1], %s554_s24  ;;  %s169_s27 = sand.u32 7, %s684_s11  }
  0x24   : > { %v161_v1 = vld [vmem:[%s147_s26] sm:$0xf]  ;;  %s795_s28 = scalar_lea.vmem [#allocation4], %s169_s27  ;;  %s798_s3 = scalar_lea.vmem [#allocation3], %s554_s24 }
  0x25   : > { %162 = vst [vmem:[#allocation0] sm:$0xf] %v161_v1  ;;  %173 = vst [vmem:[%s795_s28] sm:$0x1] %v706_v2  ;;  %s157_s22 = scalar_lea.vmem [#allocation5], %s792_s25  ;;  %s801_s4 = smov 0  }
  0x2c   : > { %v171_v3 = vld [vmem:[#allocation0] sm:$0xff] }
  0x2d   : > { %172 = vst [vmem:[#allocation2] sm:$0xff] %v171_v3 }
  0x2e LB: >> { %v181_v4 = vlaneseq  ;;  %v810_v6 = vstv %s704_s4  ;;  %s208_s9 = scalar_lea.vmem [#allocation2], %s704_s4  ;;  %s244_s5 = smov [#allocation2]  ;;  %v707_v60 = vmov 1.0   ;;  %v279_v61 = vld [vmem:[%s795_s28] ss:$0 sm:$0xff]  ;;  %s704_s4 = sphi %s801_s4, %s179_s4  }
  0x2f   : >> { %s266_s6 = scalar_lea.vmem [#allocation6], %s704_s4  ;;  %s282_s7 = smov [#allocation2] }
  0x30   : >> { %v807_v5 = vshrl.u32 %v181_v4, 7  ;;  %v260_v49 = vand.u32 127, %v181_v4  ;;  %s283_s8 = smov [#allocation6] }
  0x32   : >> { %vm185_vm0 = vcmp.gt.s32.totalorder %v807_v5, %v810_v6  ;;  %vm186_vm1 = vcmp.lt.s32.totalorder %v807_v5, 3  ;;  %v247_v5 = vmov %v807_v5  ;;  %vm825_vm12 = vcmp.eq.s32.totalorder %v260_v49, %v810_v6 }
  0x33   : >> { %vm187_vm2 = vmand %vm185_vm0, %vm186_vm1  ;;  %vm251_vm9 = vcmp.gt.s32.totalorder %v247_v5, %v810_v6  ;;  %vm252_vm10 = vcmp.lt.s32.totalorder %v247_v5, 3  ;;  %v286_v5 = vmov %v807_v5  ;;  %vm312_vm15 = vcmp.gt.s32.totalorder %v260_v49, %v810_v6 }
  0x34   : >> { %v180_v7 = vld [vmem:[#allocation2] sm:$0xff]  ;;  %v209_v16 = vld [vmem:[%s208_s9] ss:$0 sm:$0xff]  ;;  %vm253_vm11 = vmand %vm251_vm9, %vm252_vm10  ;;  %vm291_vm13 = vcmp.lt.s32.totalorder %v286_v5, 3  ;;  %v303_v5 = vmov %v807_v5 }
  0x35   : >> { %v188_v8 = vsel %vm187_vm2, %v180_v7, 0.0  ;;  %v210_v17 = vand.u32 2147483647, %v209_v16  ;;  %vm235_vm8 = vcmp.lt.f32.partialorder %v209_v16, 0.0  ;;  %v248_v46 = vld [vmem:[%s244_s5] sm:$0xff]  ;;  %vm320_vm14 = vcmp.ge.s32.totalorder %v303_v5, %v810_v6 }
  0x36   : >> { %v189_v9 = vmul.f32 %v188_v8, %v188_v8  ;;  %v254_v50 = vsel %vm253_vm11, %v248_v46, 0.0  ;;  %v289_v0 = vld [vmem:[%s282_s7] sm:$0xff]  ;;  %s299_s7 = smov %s282_s7  ;;  %vm321_vm0 = vmand %vm825_vm12, %vm320_vm14 }
  0x37   : >> { %v211_v22 = vmax.f32 %v210_v17, 0.0  ;;  %s324_s18 = scalar_lea.vmem %s299_s7, %s704_s4  ;;  %s179_s4 = sadd.s32 1, %s704_s4  }
  0x38   : >> { %v190_v10 = vrot.slane %v189_v9, 4  ;;  %p176_p10 = scmp.ge.s32.totalorder %s179_s4, 3  }
  0x39   : > { %s560_s19 = sshll.u32 (%p176_p10), %s688_s12, 1 }
  0x3a   : >> { %v191_v11 = vadd.f32 %v190_v10, %v189_v9  ;;  %s359_s20 = sadd.s32 (%p176_p10), %s684_s11, %s560_s19 }
  0x3b   : > { %s561_s21 = sshll.u32 (%p176_p10), %s359_s20, 2 }
  0x3c   : >> { %v192_v12 = vrot.slane %v191_v11, 2  ;;  %s361_s26 = scalar_lea.vmem (%p176_p10), %s895_s1, %s561_s21 }
  0x3e   : >> { %v193_v13 = vadd.f32 %v192_v12, %v191_v11 }
  0x40   : >> { %v194_v14 = vrot.slane %v193_v13, 1 }
  0x42   : >> { %v195_v15 = vadd.f32 %v194_v14, %v193_v13  ;;  %v310_v14 = vld [vmem:[%s299_s7] sm:$0xff] }
  0x44   : >> { %632 = vrsqrt.f32 %v195_v15  ;;  %vm198_vm3 = vcmp.eq.f32.partialorder %v195_v15, inf  ;;  %v201_v19 = vand.u32 2147483648, %v195_v15  ;;  %vm200_vm4 = vcmp.eq.f32.partialorder %v195_v15, 0.0 }
  0x51   : >> { %v633_v18 = vpop.eup %632 }
  0x52   : >> { %v197_v20 = vmul.f32 %v633_v18, %v195_v15 }
  0x54   : >> { %v199_v21 = vsel %vm198_vm3, %v195_v15, %v197_v20 }
  0x55   : >> { %v202_v23 = vsel %vm200_vm4, %v201_v19, %v199_v21 }
  0x56   : >> { %v212_v24 = vand.u32 2147483647, %v202_v23 }
  0x58   : >> { %v213_v25 = vmax.f32 %v211_v22, %v212_v24 }
  0x5a   : >> { %634 = vrcp.f32 %v213_v25  ;;  %vm225_vm7 = vcmp.eq.f32.partialorder %v213_v25, 0.0 }
  0x67   : >> { %v635_v26 = vpop.eup %634 }
  0x68   : >> { %v215_v27 = vmul.f32 %v635_v26, %v210_v17  ;;  %v218_v28 = vmul.f32 0.0, %v635_v26  ;;  %v222_v29 = vmul.f32 %v635_v26, %v212_v24 }
  0x6a   : >> { %v216_v30 = vmul.f32 %v215_v27, %v215_v27  ;;  %v219_v31 = vmul.f32 %v218_v28, %v218_v28  ;;  %v223_v32 = vmul.f32 %v222_v29, %v222_v29 }
  0x6c   : >> { %v220_v33 = vadd.f32 %v219_v31, %v216_v30 }
  0x6e   : >> { %v224_v34 = vadd.f32 %v223_v32, %v220_v33 }
  0x70   : >> { %636 = vrsqrt.f32 %v224_v34  ;;  %vm228_vm5 = vcmp.eq.f32.partialorder %v224_v34, inf  ;;  %v231_v36 = vand.u32 2147483648, %v224_v34  ;;  %vm230_vm6 = vcmp.eq.f32.partialorder %v224_v34, 0.0 }
  0x7d   : >> { %v637_v35 = vpop.eup %636 }
  0x7e   : >> { %v227_v37 = vmul.f32 %v637_v35, %v224_v34 }
  0x80   : >> { %v229_v38 = vsel %vm228_vm5, %v224_v34, %v227_v37 }
  0x81   : >> { %v232_v39 = vsel %vm230_vm6, %v231_v36, %v229_v38 }
  0x82   : >> { %v233_v40 = vmul.f32 %v232_v39, %v213_v25 }
  0x84   : >> { %v234_v41 = vsel %vm225_vm7, 0.0, %v233_v40 }
  0x85   : >> { %v236_v42 = vxor.u32 2147483648, %v234_v41 }
  0x87   : >> { %v237_v43 = vsel %vm235_vm8, %v234_v41, %v236_v42 }
  0x88   : >> { %v818_v44 = vsel %vm200_vm4, %v209_v16, %v237_v43  ;;  %638 = vrcp.f32 %v237_v43  ;;  %v238_v47 = vsub.f32 %v237_v43, %v209_v16 }
  0x89   : >> { %v243_v45 = vsub.f32 %v209_v16, %v818_v44 }
  0x8b   : >> { %640 = vrcp.f32 %v243_v45 }
  0x95   : >> { %v639_v48 = vpop.eup %638 }
  0x96   : >> { %v240_v51 = vmul.f32 %v639_v48, %v238_v47 }
  0x98   : >> { %v641_v52 = vpop.eup %640  ;;  %v242_v56 = vsel %vm200_vm4, 0.0, %v240_v51 }
  0x99   : >> { %v256_v53 = vmul.f32 %v641_v52, %v254_v50  ;;  %v272_v58 = vsel %vm825_vm12, %v242_v56, 0.0 }
  0x9b   : >> { %v257_v55 = vsel %vm200_vm4, 0.0, %v256_v53 }
  0x9c   : >> { %v262_v57 = vsel %vm825_vm12, %v257_v55, 0.0 }
  0x9d   : >> { %263 = vadd.xlane.f32.xlu0 %v262_v57 }
  0xa1   : >> { %273 = vadd.xlane.f32.xlu0 %v272_v58 }
 0x126   : >> { %v264_v59 = vpop.xlane.xlu0 %263 }
 0x127   : >> { %265 = vst [vmem:[#allocation6] sm:$0xff] %v264_v59 }
 0x128   : >> { %267 = vst [vmem:[%s266_s6] sm:$0x1] %v707_v60 }
 0x12a   : >> { %v274_v62 = vpop.xlane.xlu0 %273 }
 0x12b   : >> { %v280_v63 = vsel %vm825_vm12, %v274_v62, %v279_v61 }
 0x12c   : >> { %281 = vst [vmem:[%s795_s28] sm:$0x1] %v280_v63 }
 0x12f   : >> { %v288_v1 = vld [vmem:[%s283_s8] sm:$0xff]  ;;  %s300_s8 = smov %s283_s8 }
 0x130   : >> { %v290_v2 = vmul.f32 %v289_v0, %v288_v1  ;;  %v308_v13 = vld [vmem:[%s300_s8] sm:$0xff] }
 0x132   : >> { %v292_v3 = vsel %vm291_vm13, %v290_v2, 0.0 }
 0x133   : >> { %v293_v4 = vrot.slane %v292_v3, 4  ;;  %v344_v6 = vld [vmem:[#allocation4] sm:$0x3] (%p176_p10) }
 0x134   : > { %347 = vst [vmem:[%s157_s22] sm:$0x3] (%p176_p10), %v344_v6 }
 0x135   : >> { %v294_v7 = vadd.f32 %v293_v4, %v292_v3 }
 0x137   : >> { %v295_v8 = vrot.slane %v294_v7, 2 }
 0x139   : >> { %v296_v9 = vadd.f32 %v295_v8, %v294_v7 }
 0x13b   : >> { %v297_v10 = vrot.slane %v296_v9, 1 }
 0x13d   : >> { %v298_v11 = vadd.f32 %v297_v10, %v296_v9 }
 0x13f   : >> { %v304_v12 = vmul.f32 %v298_v11, %v274_v62 }
 0x141   : >> { %v309_v15 = vmul.f32 %v308_v13, %v304_v12 }
 0x143   : >> { %v313_v16 = vsub.f32 %v310_v14, %v309_v15 }
 0x145   : >> { %v314_v17 = vsel %vm312_vm15, %v313_v16, %v310_v14 }
 0x146   : >> { %v322_v18 = vsel %vm321_vm0, %v308_v13, %v314_v17 }
 0x147   : >> { %323 = vst [vmem:[%s299_s7] sm:$0xff] %v322_v18 }
 0x14c   : > { %178 = sbr.rel (!%p176_p10) target bundleno = 46 (0x2e), region = 167 }
 0x14e   : >> { %v325_v19 = vld [vmem:[%s324_s18] ss:$0 sm:$0xff] }
 0x14f   : >> { %v330_v20 = vsel %vm825_vm12, %v818_v44, %v325_v19 }
 0x150   : >> { %331 = vst [vmem:[%s324_s18] sm:$0x1] %v330_v20 }
 0x151   : > { %p398_p11 = scmp.lt.s32.totalorder (%p775_p4), %s684_s11, 0  ;;  %s399_s27 = ssub.s32 (%p775_p4), 0, %s684_s11  ;;  %v423_v22 = vld [vmem:[%s157_s22] sm:$0x3] (%p775_p4) }
 0x152   : > { %s562_s28 = smin.u32 (%p775_p4), %s684_s11, %s399_s27 }
 0x153   : > { %s401_s4 = sshrl.u32 (%p775_p4), %s562_s28, 3 }
 0x154   : > { %s402_s9 = ssub.s32 (%p775_p4), 0, %s401_s4 }
 0x157   : > { %v336_v5 = vld [vmem:[#allocation2] sm:$0xf] }
 0x158   : > { %339 = vst [vmem:[%s798_s3] sm:$0xf] %v336_v5 }
 0x15c   : > { %397 = sbr.rel (!%p775_p4) target bundleno = 358 (0x166), region = 91 }
 0x15f   : > { %v378_v21 = vld [vmem:[%s798_s3] sm:$0xf] }
 0x160   : > { %379 = vst [vmem:[%s361_s26] sm:$0xf] %v378_v21 }
 0x161   : > { %s913_s9 = smov (!%p398_p11, %s402_s9), %s401_s4 }
 0x162   : > { %s404_s5 = sadd.s32 %s688_s12, %s913_s9 }
 0x163   : > { %s563_s6 = sshll.u32 %s404_s5, 1 }
 0x164   : > { %s406_s29 = scalar_lea.vmem %s896_s2, %s563_s6 }
 0x165   : > { %424 = vst [vmem:[%s406_s29] sm:$0x3] %v423_v22 }
 0x166 PF: > { %s9_s15 = sadd.s32 1, %s700_s15   ;;  %s900_s9 = smov %s680_s10 }
 0x167   : > { %p6_p12 = scmp.ge.s32.totalorder %s9_s15, 6   ;;  %s901_s10 = smov %s780_s30 }
 0x168   : > { %s902_s11 = smov %s692_s13  ;;  %s903_s12 = smov %s696_s14 }
 0x169   : > { %s904_s13 = smov %s907_s16  ;;  %s905_s14 = smov %s911_s17 }
 0x16a   :  { %8 = sbr.rel (!%p6_p12) target bundleno = 4 (0x4), region = 178 }

// kernel: topological_loss.1
= control target key start
LH: loop header
LB: loop body
LE: loop exit
PB: predicated region body
PF: predicated region fallthrough
CT: control target
= control target key end

     0   :  { %s2371_s15 = smov 0   ;;  %s3549_s0 = inlined_call_operand.vmem [shape: f32[2,3,2,128], index: 0, kind: input, shape index: {}]   ;;  %s3550_s1 = inlined_call_operand.vmem [shape: f32[2,3,2,128], index: 1, kind: input, shape index: {}]   ;;  %s3551_s2 = inlined_call_operand.vmem [shape: f32[2,2,128], index: 2, kind: input, shape index: {}]   ;;  %s3552_s3 = inlined_call_operand.vmem [shape: f32[2,1,128], index: 3, kind: input, shape index: {}]   ;;  %s3553_s4 = inlined_call_operand.vmem [shape: f32[2,2,4], index: 4, kind: output, shape index: {}]  }
   0x1 LB: > { %s1984_s16 = sadd.s32 4294967295, %s2341_s15   ;;  %p1988_p0 = scmp.ge.s32.totalorder %s2341_s15, 1  ;;  %s2341_s15 = sphi %s2371_s15, %s14_s15  }
   0x2   : > { %p189_p1 = scmp.lt.s32.totalorder %s2341_s15, 3 }
   0x4   : > { %p190_p2 = pnand %p1988_p0, %p189_p1 }
   0x6   : > { %193 = sbr.rel (%p190_p2) target bundleno = 776 (0x308), region = 36 }
   0xb   : > { %p226_p3 = scmp.lt.s32.totalorder %s1984_s16, 1  ;;  %v3563_v0 = vmov 0.0   ;;  %vm516_vm0 = vcmask 64512   ;;  %s2344_s28 = smov 1   ;;  %vm267_vm1 = vcmask 1041408  }
   0xc   : > { %450 = vst [vmem:[#allocation2 + $0x5] sm:$0x7] %v3563_v0  ;;  %451 = vst [vmem:[#allocation3 + $0x5] sm:$0x7] %v3563_v0  ;;  %s2345_s29 = smov 127  }
   0xd   : > { %452 = vst [vmem:[#allocation4 + $0x5] sm:$0x7] %v3563_v0  ;;  %453 = vst [vmem:[#allocation5 + $0x5] sm:$0x7] %v3563_v0  ;;  %s3660_s16 = smov (!%p226_p3, %s1984_s16), 1 }
   0xe   : > { %s2239_s17 = smul.u32 6, %s3660_s16  ;;  %s1991_s18 = sshll.u32 %s3660_s16, 1 }
   0xf   : > { %s239_s21 = scalar_lea.vmem %s3551_s2, %s1991_s18  ;;  %s242_s6 = scalar_lea.vmem %s3552_s3, %s3660_s16 }
  0x10   : > { %s230_s24 = scalar_lea.vmem %s3549_s0, %s2239_s17  ;;  %v2395_v1 = vld [vmem:[%s239_s21] sm:$0x3]  ;;  %s235_s27 = scalar_lea.vmem %s3550_s1, %s2239_s17 }
  0x11   : > { %v249_v2 = vld [vmem:[%s230_s24] sm:$0x3]  ;;  %v1993_v3 = vld [vmem:[%s230_s24 + $0x2] sm:$0x3]  ;;  %v1994_v4 = vld [vmem:[%s230_s24 + $0x4] sm:$0x3]  ;;  %s246_s11 = scalar_lea.vmem %s3553_s4, %s1991_s18 }
  0x12   : > { %473 = vst [vmem:[#allocation2 + $0x4] sm:$0x1] %v2395_v1  ;;  %474 = vst [vmem:[#allocation3 + $0x3] sm:$0x1] %v2395_v1  ;;  %v2405_v5 = vmul.f32 %v249_v2, %v2395_v1  ;;  %v2408_v6 = vmul.f32 %v1993_v3, %v2395_v1  ;;  %v2411_v7 = vmul.f32 %v1994_v4, %v2395_v1  ;;  %v257_v8 = vld [vmem:[%s235_s27] sm:$0x3] }
  0x13   : > { %477 = vst [vmem:[#allocation4 + $0x4] sm:$0x1] %v2395_v1  ;;  %478 = vst [vmem:[#allocation5 + $0x3] sm:$0x1] %v2395_v1  ;;  %v1995_v9 = vld [vmem:[%s235_s27 + $0x2] sm:$0x3]  ;;  %v2414_v11 = vmul.f32 %v257_v8, %v2395_v1 }
  0x14   : > { %v1996_v10 = vld [vmem:[%s235_s27 + $0x4] sm:$0x3]  ;;  %v2417_v12 = vmul.f32 %v1995_v9, %v2395_v1  ;;  %v428_v14 = vmul.f32 %v2405_v5, %v2405_v5  ;;  %v432_v15 = vmul.f32 %v2408_v6, %v2408_v6  ;;  %v436_v16 = vmul.f32 %v2411_v7, %v2411_v7  ;;  %454 = vst [vmem:[#allocation2] sm:$0x1] %v2405_v5 }
  0x15   : > { %v2420_v13 = vmul.f32 %v1996_v10, %v2395_v1  ;;  %460 = vst [vmem:[#allocation2 + $0x1] sm:$0x1] %v2408_v6  ;;  %466 = vst [vmem:[#allocation2 + $0x2] sm:$0x1] %v2411_v7  ;;  %v430_v17 = vmul.f32 %v2414_v11, %v2414_v11  ;;  %v455_v22 = vmul.f32 -2.0, %v2405_v5  ;;  %v461_v23 = vmul.f32 -2.0, %v2408_v6 }
  0x16   : > { %v434_v18 = vmul.f32 %v2417_v12, %v2417_v12  ;;  %457 = vst [vmem:[#allocation4] sm:$0x1] %v2414_v11  ;;  %463 = vst [vmem:[#allocation4 + $0x1] sm:$0x1] %v2417_v12  ;;  %v433_v20 = vadd.f32 %v432_v15, %v428_v14  ;;  %v467_v24 = vmul.f32 -2.0, %v2411_v7  ;;  %v458_v31 = vmul.f32 -2.0, %v2414_v11 }
  0x17   : > { %v438_v19 = vmul.f32 %v2420_v13, %v2420_v13  ;;  %469 = vst [vmem:[#allocation4 + $0x2] sm:$0x1] %v2420_v13  ;;  %456 = vst [vmem:[#allocation3] sm:$0x1] %v455_v22  ;;  %v464_v32 = vmul.f32 -2.0, %v2417_v12  ;;  %v470_v33 = vmul.f32 -2.0, %v2420_v13 }
  0x18   : > { %v435_v21 = vadd.f32 %v434_v18, %v430_v17  ;;  %v437_v25 = vadd.f32 %v436_v16, %v433_v20  ;;  %462 = vst [vmem:[#allocation3 + $0x1] sm:$0x1] %v461_v23  ;;  %468 = vst [vmem:[#allocation3 + $0x2] sm:$0x1] %v467_v24  ;;  %v268_v56 = vsel %vm267_vm1, %v2395_v1, 0.0  ;;  %vm397_vm2 = vcmp.gt.f32.partialorder %v2395_v1, 0.5 }
  0x19   : > { %459 = vst [vmem:[#allocation5] sm:$0x1] %v458_v31  ;;  %465 = vst [vmem:[#allocation5 + $0x1] sm:$0x1] %v464_v32 }
  0x1a   : > { %v439_v26 = vadd.f32 %v438_v19, %v435_v21  ;;  %472 = vst [vmem:[#allocation2 + $0x3] sm:$0x1] %v437_v25  ;;  %475 = vst [vmem:[#allocation3 + $0x4] sm:$0x1] %v437_v25 }
  0x1b   : > { %471 = vst [vmem:[#allocation5 + $0x2] sm:$0x1] %v470_v33 }
  0x1c   : > { %476 = vst [vmem:[#allocation4 + $0x3] sm:$0x1] %v439_v26  ;;  %479 = vst [vmem:[#allocation5 + $0x4] sm:$0x1] %v439_v26 }
  0x21   : > { %v481_v27 = vld [vmem:[#allocation2] sm:$0xff]  ;;  %v483_v28 = vld [vmem:[#allocation3] sm:$0xff] }
  0x22   : > { %484 = vxpose.xlu0.b32.start.end [1/1] (short) %v481_v27, 128  ;;  %1179 = vst [vmem:[#allocation2 - $0x1] sm:$0x2] %v2405_v5  ;;  %1183 = vst [vmem:[#allocation2] sm:$0x2] %v2408_v6  ;;  %2135 = vmatprep.subr.mxu0 %v483_v28 }
  0x23   : > { %1187 = vst [vmem:[#allocation2 + $0x1] sm:$0x2] %v2411_v7  ;;  %1191 = vst [vmem:[#allocation2 + $0x2] sm:$0x2] %v437_v25  ;;  %v482_v29 = vld [vmem:[#allocation4] sm:$0xff]  ;;  %2136 = vmatpush3.msra.mxu0 %v483_v28  ;;  %v726_v35 = vld [vmem:[#allocation5] sm:$0xff] }
  0x24   : > { %1192 = vst [vmem:[#allocation2 + $0x3] sm:$0x2] %v2395_v1  ;;  %1180 = vst [vmem:[#allocation3 - $0x1] sm:$0x2] %v455_v22  ;;  %2161 = vmatprep.subr.mxu1 %v726_v35 }
  0x25   : > { %1184 = vst [vmem:[#allocation3] sm:$0x2] %v461_v23  ;;  %1188 = vst [vmem:[#allocation3 + $0x1] sm:$0x2] %v467_v24  ;;  %2162 = vmatpush3.msra.mxu1 %v726_v35 }
  0x26   : > { %1193 = vst [vmem:[#allocation3 + $0x2] sm:$0x2] %v2395_v1  ;;  %1194 = vst [vmem:[#allocation3 + $0x3] sm:$0x2] %v437_v25 }
  0x27   : > { %1181 = vst [vmem:[#allocation4 - $0x1] sm:$0x2] %v2414_v11  ;;  %1185 = vst [vmem:[#allocation4] sm:$0x2] %v2417_v12 }
  0x28   : > { %1189 = vst [vmem:[#allocation4 + $0x1] sm:$0x2] %v2420_v13  ;;  %1195 = vst [vmem:[#allocation4 + $0x2] sm:$0x2] %v439_v26 }
  0x29   : > { %1196 = vst [vmem:[#allocation4 + $0x3] sm:$0x2] %v2395_v1  ;;  %1182 = vst [vmem:[#allocation5 - $0x1] sm:$0x2] %v458_v31 }
  0x2a   : > { %1186 = vst [vmem:[#allocation5] sm:$0x2] %v464_v32  ;;  %1190 = vst [vmem:[#allocation5 + $0x1] sm:$0x2] %v470_v33 }
  0x2b   : > { %v1200_v30 = vld [vmem:[#allocation2] sm:$0xff]  ;;  %1197 = vst [vmem:[#allocation5 + $0x2] sm:$0x2] %v2395_v1  ;;  %1198 = vst [vmem:[#allocation5 + $0x3] sm:$0x2] %v439_v26 }
  0x2c   : > { %1203 = vxpose.xlu1.b32.start.end [1/1] (short) %v1200_v30, 128 }
  0x2d   : > { %v1202_v34 = vld [vmem:[#allocation3] sm:$0xff] }
  0x2e   : > { %2187 = vmatprep.subr.mxu0 %v1202_v34 }
  0x30   : > { %v1201_v36 = vld [vmem:[#allocation4] sm:$0xff] }
  0x32   : > { %v2456_v37 = vld [vmem:[#allocation5] sm:$0xff] }
  0x33   : > { %2213 = vmatprep.subr.mxu1 %v2456_v37 }
  0x5f   : > { %727 = vxpose.xlu0.b32.start.end [1/1] (short) %v482_v29, 128 }
  0x69   : > { %1445 = vxpose.xlu1.b32.start.end [1/1] (short) %v1201_v36, 128 }
  0x9e   : > { %v500_v38 = vpop.trf.xlu0 }
  0x9f   : > { %2137 = vmatprep.mubr.msk.f32.mxu0 %vm516_vm0, %v500_v38 }
  0xa2   : > { %v501_v39 = vpop.trf.xlu0 }
  0xa3   : > { %2138 = vmatmul.mubr.msk.f32.vlgmr.msra.gmra.mxu0 %vm516_vm0, %v501_v39 }
  0xa4   : > { %2188 = vmatpush3.msra.mxu0 %v1202_v34 }
  0xa6   : > { %v502_v40 = vpop.trf.xlu0 }
  0xa7   : > { %2140 = vmatprep.mubr.msk.f32.mxu0 %vm516_vm0, %v502_v40 }
  0xa8   : > { %v1219_v41 = vpop.trf.xlu1 }
  0xaa   : > { %v503_v42 = vpop.trf.xlu0 }
  0xab   : > { %2141 = vmatmul.mubr.msk.f32.gmra.mxu0 %vm516_vm0, %v503_v42 }
  0xac   : > { %v1220_v43 = vpop.trf.xlu1 }
  0xae   : > { %v504_v44 = vpop.trf.xlu0 }
  0xaf   : > { %2143 = vmatprep.mubr.msk.f32.mxu0 %vm516_vm0, %v504_v44 }
  0xb0   : > { %v1221_v45 = vpop.trf.xlu1 }
  0xb2   : > { %v505_v46 = vpop.trf.xlu0 }
  0xb3   : > { %2144 = vmatmul.mubr.msk.f32.gmra.mxu0 %vm516_vm0, %v505_v46 }
  0xb4   : > { %v1222_v47 = vpop.trf.xlu1 }
  0xb6   : > { %v506_v48 = vpop.trf.xlu0 }
  0xb7   : > { %2146 = vmatprep.mubr.msk.f32.mxu0 %vm516_vm0, %v506_v48 }
  0xb8   : > { %v1223_v49 = vpop.trf.xlu1 }
  0xba   : > { %v507_v50 = vpop.trf.xlu0 }
  0xbb   : > { %2147 = vmatmul.mubr.msk.f32.gmra.mxu0 %vm516_vm0, %v507_v50 }
  0xbc   : > { %v1224_v51 = vpop.trf.xlu1 }
  0xbe   : > { %v508_v52 = vpop.trf.xlu0 }
  0xbf   : > { %2149 = vmatprep.mubr.msk.f32.mxu0 %vm516_vm0, %v508_v52 }
  0xc0   : > { %v1225_v53 = vpop.trf.xlu1 }
  0xc2   : > { %v509_v54 = vpop.trf.xlu0 }
  0xc3   : > { %310 = vrot.lane.b32.xlu1 %v2405_v5, %s2344_s28  ;;  %2150 = vmatmul.mubr.msk.f32.gmra.mxu0 %vm516_vm0, %v509_v54 }
  0xc4   : > { %v1226_v55 = vpop.trf.xlu1 }
  0xc6   : > { %v510_v57 = vpop.trf.xlu0 }
  0xc7   : > { %313 = vrot.lane.b32.xlu1 %v2405_v5, %s2345_s29  ;;  %2152 = vmatprep.mubr.msk.f32.mxu0 %vm516_vm0, %v510_v57 }
  0xc8   : > { %v1227_v58 = vpop.trf.xlu1  ;;  %269 = vadd.xlane.f32.xlu0 %v268_v56 }
  0xca   : > { %v511_v59 = vpop.trf.xlu0 }
  0xcb   : > { %322 = vrot.lane.b32.xlu1 %v2408_v6, %s2344_s28  ;;  %2153 = vmatmul.mubr.msk.f32.gmra.mxu0 %vm516_vm0, %v511_v59 }
  0xcc   : > { %v1228_v60 = vpop.trf.xlu1 }
  0xce   : > { %v512_v61 = vpop.trf.xlu0 }
  0xcf   : > { %325 = vrot.lane.b32.xlu1 %v2408_v6, %s2345_s29  ;;  %2155 = vmatprep.mubr.msk.f32.mxu0 %vm516_vm0, %v512_v61 }
  0xd0   : > { %v1229_v62 = vpop.trf.xlu1 }
  0xd2   : > { %v513_v63 = vpop.trf.xlu0 }
  0xd3   : > { %350 = vrot.lane.b32.xlu1 %v2414_v11, %s2344_s28  ;;  %2156 = vmatmul.mubr.msk.f32.gmra.mxu0 %vm516_vm0, %v513_v63  ;;  %v281_v63 = vsub.f32 %v2408_v6, %v2417_v12 }
  0xd4   : > { %v1230_v2 = vpop.trf.xlu1 }
  0xd6   : > { %v514_v3 = vpop.trf.xlu0 }
  0xd7   : > { %362 = vrot.lane.b32.xlu1 %v2417_v12, %s2344_s28  ;;  %2158 = vmatprep.mubr.msk.f32.mxu0 %vm516_vm0, %v514_v3 }
  0xd8   : > { %v1231_v4 = vpop.trf.xlu1 }
  0xda   : > { %v515_v8 = vpop.trf.xlu0 }
  0xdb   : > { %365 = vrot.lane.b32.xlu1 %v2417_v12, %s2345_s29  ;;  %2159 = vmatmul.mubr.msk.f32.gmra.mxu0 %vm516_vm0, %v515_v8 }
  0xdc   : > { %v1232_v9 = vpop.trf.xlu1  ;;  %2189 = vmatprep.mubr.msk.f32.mxu0 %vm516_vm0, %v1219_v41 }
  0xde   : > { %v743_v10 = vpop.trf.xlu0  ;;  %353 = vrot.lane.b32.xlu0 %v2414_v11, %s2345_s29 }
  0xdf   : > { %334 = vrot.lane.b32.xlu1 %v2411_v7, %s2344_s28  ;;  %2163 = vmatprep.mubr.msk.f32.mxu1 %vm516_vm0, %v743_v10  ;;  %v284_v10 = vsub.f32 %v2411_v7, %v2420_v13 }
  0xe0   : > { %v1233_v14 = vpop.trf.xlu1  ;;  %2190 = vmatmul.mubr.msk.f32.vlgmr.msra.gmra.mxu0 %vm516_vm0, %v1220_v43 }
  0xe1   : > { %2192 = vmatprep.mubr.msk.f32.mxu0 %vm516_vm0, %v1221_v45 }
  0xe2   : > { %v744_v15 = vpop.trf.xlu0  ;;  %298 = vrot.lane.b32.xlu0 %v2395_v1, %s2344_s28 }
  0xe3   : > { %337 = vrot.lane.b32.xlu1 %v2411_v7, %s2345_s29  ;;  %2164 = vmatmul.mubr.msk.f32.vlgmr.msra.gmra.mxu1 %vm516_vm0, %v744_v15 }
  0xe4   : > { %v1234_v16 = vpop.trf.xlu1  ;;  %2193 = vmatmul.mubr.msk.f32.gmra.mxu0 %vm516_vm0, %v1222_v47  ;;  %2214 = vmatpush3.msra.mxu1 %v2456_v37 }
  0xe5   : > { %2195 = vmatprep.mubr.msk.f32.mxu0 %vm516_vm0, %v1223_v49 }
  0xe6   : > { %v745_v17 = vpop.trf.xlu0 }
  0xe7   : > { %374 = vrot.lane.b32.xlu1 %v2420_v13, %s2344_s28  ;;  %2166 = vmatprep.mubr.msk.f32.mxu1 %vm516_vm0, %v745_v17  ;;  %v285_v17 = vmul.f32 %v284_v10, %v284_v10 }
  0xe8   : > { %v1461_v18 = vpop.trf.xlu1  ;;  %2196 = vmatmul.mubr.msk.f32.gmra.mxu0 %vm516_vm0, %v1224_v51 }
  0xe9   : > { %2198 = vmatprep.mubr.msk.f32.mxu0 %vm516_vm0, %v1225_v53 }
  0xea   : > { %v746_v19 = vpop.trf.xlu0 }
  0xeb   : > { %377 = vrot.lane.b32.xlu1 %v2420_v13, %s2345_s29  ;;  %2167 = vmatmul.mubr.msk.f32.gmra.mxu1 %vm516_vm0, %v746_v19 }
  0xec   : > { %v1462_v20 = vpop.trf.xlu1  ;;  %2199 = vmatmul.mubr.msk.f32.gmra.mxu0 %vm516_vm0, %v1226_v55 }
  0xed   : > { %2201 = vmatprep.mubr.msk.f32.mxu0 %vm516_vm0, %v1227_v58 }
  0xee   : > { %v747_v21 = vpop.trf.xlu0 }
  0xef   : > { %300 = vrot.lane.b32.xlu1 %v2395_v1, %s2345_s29  ;;  %2169 = vmatprep.mubr.msk.f32.mxu1 %vm516_vm0, %v747_v21 }
  0xf0   : > { %v1463_v22 = vpop.trf.xlu1  ;;  %2202 = vmatmul.mubr.msk.f32.gmra.mxu0 %vm516_vm0, %v1228_v60 }
  0xf1   : > { %2204 = vmatprep.mubr.msk.f32.mxu0 %vm516_vm0, %v1229_v62  ;;  %v278_v62 = vsub.f32 %v2405_v5, %v2414_v11 }
  0xf2   : > { %v748_v23 = vpop.trf.xlu0 }
  0xf3   : > { %2170 = vmatmul.mubr.msk.f32.gmra.mxu1 %vm516_vm0, %v748_v23  ;;  %v279_v8 = vmul.f32 %v278_v62, %v278_v62 }
  0xf4   : > { %v1464_v24 = vpop.trf.xlu1  ;;  %2205 = vmatmul.mubr.msk.f32.gmra.mxu0 %vm516_vm0, %v1230_v2 }
  0xf5   : > { %2207 = vmatprep.mubr.msk.f32.mxu0 %vm516_vm0, %v1231_v4 }
  0xf6   : > { %v749_v25 = vpop.trf.xlu0 }
  0xf7   : > { %2172 = vmatprep.mubr.msk.f32.mxu1 %vm516_vm0, %v749_v25 }
  0xf8   : > { %v1465_v26 = vpop.trf.xlu1  ;;  %2208 = vmatmul.mubr.msk.f32.gmra.mxu0 %vm516_vm0, %v1232_v9  ;;  %v282_v9 = vmul.f32 %v281_v63, %v281_v63 }
  0xf9   : > { %2210 = vmatprep.mubr.msk.f32.mxu0 %vm516_vm0, %v1233_v14 }
  0xfa   : > { %v750_v27 = vpop.trf.xlu0 }
  0xfb   : > { %2173 = vmatmul.mubr.msk.f32.gmra.mxu1 %vm516_vm0, %v750_v27 }
  0xfc   : > { %2211 = vmatmul.mubr.msk.f32.gmra.mxu0 %vm516_vm0, %v1234_v16  ;;  %v1466_v28 = vpop.trf.xlu1  ;;  %v283_v16 = vadd.f32 %v282_v9, %v279_v8 }
  0xfe   : > { %v751_v29 = vpop.trf.xlu0  ;;  %v2602_v27 = vadd.f32 %v285_v17, %v283_v16 }
  0xff   : > { %2175 = vmatprep.mubr.msk.f32.mxu1 %vm516_vm0, %v751_v29 }
 0x100   : > { %v1467_v31 = vpop.trf.xlu1  ;;  %2255 = vrsqrt.f32 %v2602_v27  ;;  %vm289_vm3 = vcmp.eq.f32.partialorder %v2602_v27, inf  ;;  %vm291_vm4 = vcmp.eq.f32.partialorder %v2602_v27, 0.0 }
 0x102   : > { %v752_v30 = vpop.trf.xlu0 }
 0x103   : > { %2176 = vmatmul.mubr.msk.f32.gmra.mxu1 %vm516_vm0, %v752_v30 }
 0x104   : > { %v1468_v33 = vpop.trf.xlu1 }
 0x106   : > { %v753_v32 = vpop.trf.xlu0 }
 0x107   : > { %2178 = vmatprep.mubr.msk.f32.mxu1 %vm516_vm0, %v753_v32 }
 0x108   : > { %v1469_v36 = vpop.trf.xlu1 }
 0x10a   : > { %v754_v34 = vpop.trf.xlu0 }
 0x10b   : > { %2179 = vmatmul.mubr.msk.f32.gmra.mxu1 %vm516_vm0, %v754_v34 }
 0x10c   : > { %v1470_v38 = vpop.trf.xlu1 }
 0x10d   : > { %v2256_v10 = vpop.eup %2255 }
 0x10e   : > { %v755_v35 = vpop.trf.xlu0 }
 0x10f   : > { %2181 = vmatprep.mubr.msk.f32.mxu1 %vm516_vm0, %v755_v35 }
 0x110   : > { %v1471_v41 = vpop.trf.xlu1 }
 0x112   : > { %v756_v37 = vpop.trf.xlu0 }
 0x113   : > { %2182 = vmatmul.mubr.msk.f32.gmra.mxu1 %vm516_vm0, %v756_v37 }
 0x114   : > { %v1472_v42 = vpop.trf.xlu1 }
 0x116   : > { %v757_v39 = vpop.trf.xlu0 }
 0x117   : > { %2184 = vmatprep.mubr.msk.f32.mxu1 %vm516_vm0, %v757_v39 }
 0x118   : > { %v1473_v43 = vpop.trf.xlu1 }
 0x11a   : > { %v758_v40 = vpop.trf.xlu0 }
 0x11b   : > { %2185 = vmatmul.mubr.msk.f32.gmra.mxu1 %vm516_vm0, %v758_v40 }
 0x11c   : > { %2215 = vmatprep.mubr.msk.f32.mxu1 %vm516_vm0, %v1461_v18  ;;  %v1474_v44 = vpop.trf.xlu1 }
 0x11f   : > { %2216 = vmatmul.mubr.msk.f32.vlgmr.msra.gmra.mxu1 %vm516_vm0, %v1462_v20 }
 0x120   : > { %2218 = vmatprep.mubr.msk.f32.mxu1 %vm516_vm0, %v1463_v22  ;;  %v1475_v45 = vpop.trf.xlu1 }
 0x123   : > { %2219 = vmatmul.mubr.msk.f32.gmra.mxu1 %vm516_vm0, %v1464_v24 }
 0x124   : > { %2221 = vmatprep.mubr.msk.f32.mxu1 %vm516_vm0, %v1465_v26  ;;  %v1476_v46 = vpop.trf.xlu1 }
 0x127   : > { %2222 = vmatmul.mubr.msk.f32.gmra.mxu1 %vm516_vm0, %v1466_v28 }
 0x128   : > { %2224 = vmatprep.mubr.msk.f32.mxu1 %vm516_vm0, %v1467_v31 }
 0x12b   : > { %2225 = vmatmul.mubr.msk.f32.gmra.mxu1 %vm516_vm0, %v1468_v33 }
 0x12c   : > { %2227 = vmatprep.mubr.msk.f32.mxu1 %vm516_vm0, %v1469_v36  ;;  %v1999_v36 = vld [vmem:[%s242_s6] ss:$0 sm:$0xff] }
 0x12f   : > { %2228 = vmatmul.mubr.msk.f32.gmra.mxu1 %vm516_vm0, %v1470_v38 }
 0x130   : > { %2230 = vmatprep.mubr.msk.f32.mxu1 %vm516_vm0, %v1471_v41 }
 0x133   : > { %2231 = vmatmul.mubr.msk.f32.gmra.mxu1 %vm516_vm0, %v1472_v42 }
 0x134   : > { %2233 = vmatprep.mubr.msk.f32.mxu1 %vm516_vm0, %v1473_v43 }
 0x135   : > { %v311_v47 = vpop.permute.xlu1 %310 }
 0x136   : > { %v2583_v19 = vsub.f32 %v311_v47, %v2405_v5 }
 0x137   : > { %2234 = vmatmul.mubr.msk.f32.gmra.mxu1 %vm516_vm0, %v1474_v44 }
 0x138   : > { %2236 = vmatprep.mubr.msk.f32.mxu1 %vm516_vm0, %v1475_v45 }
 0x139   : > { %v314_v48 = vpop.permute.xlu1 %313 }
 0x13a   : > { %v2586_v20 = vsub.f32 %v314_v48, %v2405_v5 }
 0x13b   : > { %2237 = vmatmul.mubr.msk.f32.gmra.mxu1 %vm516_vm0, %v1476_v46 }
 0x13c   : > { %v318_v29 = vmul.f32 %v2586_v20, %v2586_v20 }
 0x13d   : > { %v323_v49 = vpop.permute.xlu1 %322 }
 0x13e   : > { %v2591_v23 = vsub.f32 %v323_v49, %v2408_v6 }
 0x141   : > { %v326_v50 = vpop.permute.xlu1 %325 }
 0x142   : > { %v2594_v24 = vsub.f32 %v326_v50, %v2408_v6  ;;  %v316_v6 = vmul.f32 %v2583_v19, %v2583_v19 }
 0x145   : > { %v351_v51 = vpop.permute.xlu1 %350 }
 0x146   : > { %v2597_v25 = vsub.f32 %v351_v51, %v2414_v11 }
 0x148   : > { %v356_v32 = vmul.f32 %v2597_v25, %v2597_v25 }
 0x149   : > { %v363_v53 = vpop.permute.xlu1 %362 }
 0x14a   : > { %v2600_v26 = vsub.f32 %v363_v53, %v2417_v12 }
 0x14c   : > { %v368_v34 = vmul.f32 %v2600_v26, %v2600_v26 }
 0x14d   : > { %v366_v56 = vpop.permute.xlu1 %365 }
 0x14e   : > { %v2605_v5 = vsub.f32 %v366_v56, %v2417_v12  ;;  %v328_v12 = vmul.f32 %v2591_v23, %v2591_v23  ;;  %v369_v47 = vadd.f32 %v368_v34, %v356_v32 }
 0x150   : > { %v370_v38 = vmul.f32 %v2605_v5, %v2605_v5  ;;  %v329_v42 = vadd.f32 %v328_v12, %v316_v6 }
 0x151   : > { %v335_v59 = vpop.permute.xlu1 %334  ;;  %v2574_v4 = vpop.xlane.xlu0 %269 }
 0x152   : > { %3575 = vst [vmem:[#allocation7_spill] sm:$0xff] %v2574_v4  ;;  %v2627_v33 = vsub.f32 %v335_v59, %v2411_v7 }
 0x154   : > { %v340_v44 = vmul.f32 %v2627_v33, %v2627_v33 }
 0x155   : > { %v338_v2 = vpop.permute.xlu1 %337  ;;  %v354_v21 = vpop.permute.xlu0 %353 }
 0x156   : > { %v2608_v28 = vsub.f32 %v354_v21, %v2414_v11  ;;  %v330_v11 = vmul.f32 %v2594_v24, %v2594_v24  ;;  %v2632_v35 = vsub.f32 %v338_v2, %v2411_v7  ;;  %v2650_v7 = vsel %vm397_vm2, %v1999_v36, 0.0 }
 0x157   : > { %3576 = vst [vmem:[#allocation8_spill] sm:$0xff] %v2650_v7  ;;  %v412_v50 = vand.u32 2147483647, %v2650_v7  ;;  %v341_v53 = vadd.f32 %v340_v44, %v329_v42  ;;  %v292_v36 = vand.u32 2147483648, %v2602_v27 }
 0x158   : > { %v358_v40 = vmul.f32 %v2608_v28, %v2608_v28  ;;  %v331_v43 = vadd.f32 %v330_v11, %v318_v29  ;;  %v342_v45 = vmul.f32 %v2632_v35, %v2632_v35 }
 0x159   : > { %v375_v15 = vpop.permute.xlu1 %374  ;;  %v413_v2 = vsub.f32 0.0, %v412_v50  ;;  %v360_v50 = vmul.f32 %v2608_v28, %v2597_v25 }
 0x15a   : > { %v2641_v39 = vsub.f32 %v375_v15, %v2420_v13  ;;  %v343_v56 = vadd.f32 %v342_v45, %v331_v43 }
 0x15b   : > { %v414_v17 = vmul.f32 1.442695, %v413_v2 }
 0x15c   : > { %v380_v48 = vmul.f32 %v2641_v39, %v2641_v39  ;;  %v346_v9 = vmul.f32 %v343_v56, %v341_v53 }
 0x15d   : > { %v378_v30 = vpop.permute.xlu1 %377  ;;  %2257 = vpow2.f32 %v414_v17 }
 0x15e   : > { %v2646_v41 = vsub.f32 %v378_v30, %v2420_v13  ;;  %v371_v13 = vadd.f32 %v370_v38, %v358_v40  ;;  %v381_v62 = vadd.f32 %v380_v48, %v369_v47  ;;  %v347_v29 = vmax.f32 %v346_v9, 1e-12 }
 0x15f   : > { %v288_v30 = vmul.f32 %v2256_v10, %v2602_v27  ;;  %v3556_v10 = vlaneseq }
 0x160   : > { %v382_v49 = vmul.f32 %v2646_v41, %v2646_v41  ;;  %2259 = vrsqrt.f32 %v347_v29  ;;  %v384_v9 = vmul.f32 %v2646_v41, %v2641_v39 }
 0x161   : > { %v290_v38 = vsel %vm289_vm3, %v2602_v27, %v288_v30  ;;  %v332_v27 = vmul.f32 %v2594_v24, %v2591_v23 }
 0x162   : > { %v383_v63 = vadd.f32 %v382_v49, %v371_v13  ;;  %v2695_v48 = vsel %vm291_vm4, %v292_v36, %v290_v38  ;;  %v320_v13 = vmul.f32 %v2586_v20, %v2583_v19  ;;  %v372_v49 = vmul.f32 %v2605_v5, %v2600_v26 }
 0x163   : > { %v2554_v52 = vpop.f32.mrf.mxu0  ;;  %3577 = vst [vmem:[#allocation9_spill] sm:$0xff] %v2695_v48  ;;  %v398_v20 = vmul.f32 -1.0, %v2695_v48  ;;  %v344_v5 = vmul.f32 %v2632_v35, %v2627_v33 }
 0x164   : > { %v386_v16 = vmul.f32 %v383_v63, %v381_v62  ;;  %v711_v53 = vmax.f32 %v2554_v52, 0.0  ;;  %v333_v26 = vadd.f32 %v332_v27, %v320_v13  ;;  %v373_v28 = vadd.f32 %v372_v49, %v360_v50 }
 0x165   : > { %v2556_v54 = vpop.f32.mrf.mxu0  ;;  %v2754_v27 = vand.u32 127, %v3556_v10 }
 0x166   : > { %v387_v11 = vmax.f32 %v386_v16, 1e-12  ;;  %v710_v43 = vmax.f32 %v2556_v54, 0.0  ;;  %v399_v16 = vmul.f32 1.442695, %v398_v20  ;;  %v345_v30 = vadd.f32 %v344_v5, %v333_v26 }
 0x167   : > { %v385_v36 = vadd.f32 %v384_v9, %v373_v28  ;;  %3579 = vst [vmem:[#allocation11_spill] sm:$0xff] %v2754_v27  ;;  %vm302_vm5 = vcmp.ge.s32.totalorder %v2754_v27, 1  ;;  %vm303_vm6 = vcmp.le.s32.totalorder %v2754_v27, 14 }
 0x168   : > { %2261 = vrsqrt.f32 %v387_v11  ;;  %vm304_vm7 = vmand %vm302_vm5, %vm303_vm6 }
 0x16a   : > { %v2258_v17 = vpop.eup %2257 }
 0x16b   : > { %v2558_v55 = vpop.f32.mrf.mxu0  ;;  %v416_v49 = vadd.f32 1.0, %v2258_v17 }
 0x16c   : > { %v3560_v29 = vmax.f32 %v2558_v55, 0.0 }
 0x16d   : > { %v2560_v57 = vpop.f32.mrf.mxu0  ;;  %v2260_v11 = vpop.eup %2259 }
 0x16e   : > { %v3555_v23 = vmax.f32 %v2560_v57, 0.0  ;;  %v2763_v9 = vmul.f32 %v2260_v11, %v345_v30  ;;  %v301_v11 = vpop.permute.xlu1 %300 }
 0x173   : > { %v2562_v58 = vpop.f32.mrf.mxu0 }
 0x174   : > { %v3562_v50 = vmax.f32 %v2562_v58, 0.0  ;;  %v3593_v27 = vmax.f32 %v2562_v58, 0.0 }
 0x175   : > { %v2564_v60 = vpop.f32.mrf.mxu0  ;;  %v2262_v38 = vpop.eup %2261 }
 0x176   : > { %v3559_v20 = vmax.f32 %v2564_v60, 0.0  ;;  %v389_v17 = vmul.f32 %v2262_v38, %v385_v36 }
 0x178   : > { %v390_v30 = vsub.f32 %v2763_v9, %v389_v17  ;;  %v3582_v17 = vmax.f32 %v2558_v55, 0.0 }
 0x17a   : > { %v2868_v9 = vand.u32 2147483647, %v390_v30 }
 0x17b   : > { %v2566_v61 = vpop.f32.mrf.mxu0 }
 0x17c   : > { %v3568_v5 = vmax.f32 %v2566_v61, 0.0  ;;  %3584 = vst [vmem:[#allocation13_spill] sm:$0xff] %v2868_v9 }
 0x17d   : > { %v2572_v3 = vpop.f32.mrf.mxu0 }
 0x183   : > { %v2578_v14 = vpop.f32.mrf.mxu0 }
 0x185   : > { %v2580_v18 = vpop.f32.mrf.mxu0 }
 0x18b   : > { %v2588_v22 = vpop.f32.mrf.mxu0 }
 0x18d   : > { %v2618_v31 = vpop.f32.mrf.mxu0 }
 0x193   : > { %v2636_v37 = vpop.f32.mrf.mxu0 }
 0x195   : > { %v2656_v46 = vpop.f32.mrf.mxu0 }
 0x19b   : > { %v2663_v51 = vpop.f32.mrf.mxu0 }
 0x19d   : > { %v2665_v59 = vpop.f32.mrf.mxu0 }
 0x1a0   : > { %v2667_v8 = vpop.f32.mrf.mxu0 }
 0x1a2   : > { %v2669_v15 = vpop.f32.mrf.mxu0 }
 0x1a3   : > { %v2671_v21 = vpop.f32.mrf.mxu1 }
 0x1a4   : > { %v2673_v6 = vpop.f32.mrf.mxu0  ;;  %v953_v44 = vmax.f32 %v2671_v21, 0.0 }
 0x1a5   : > { %v2679_v32 = vpop.f32.mrf.mxu1 }
 0x1a6   : > { %v2676_v12 = vpop.f32.mrf.mxu0  ;;  %v952_v40 = vmax.f32 %v2679_v32, 0.0  ;;  %v2721_v24 = vmul.f32 %v953_v44, %v711_v53  ;;  %v3580_v32 = vmov 0.0  }
 0x1a8   : > { %v2681_v34 = vpop.f32.mrf.mxu0  ;;  %v2710_v56 = vmul.f32 %v952_v40, %v710_v43  ;;  %vm1009_vm8 = vcmp.eq.f32.partialorder %v2721_v24, inf  ;;  %v2818_v0 = vadd.f32 %v952_v40, %v710_v43  ;;  %v1998_v40 = vsel %vm304_vm7, 1.0, %v3580_v32 }
 0x1a9   : > { %vm1011_vm9 = vcmp.eq.f32.partialorder %v2721_v24, 0.0 }
 0x1aa   : > { %v2687_v42 = vpop.f32.mrf.mxu0  ;;  %2263 = vrsqrt.f32 %v2710_v56  ;;  %vm1002_vm10 = vcmp.eq.f32.partialorder %v2710_v56, inf  ;;  %vm1004_vm11 = vcmp.eq.f32.partialorder %v2710_v56, 0.0 }
 0x1ab   : > { %v2691_v45 = vpop.f32.mrf.mxu1  ;;  %2265 = vrsqrt.f32 %v2721_v24 }
 0x1ac   : > { %v2693_v47 = vpop.f32.mrf.mxu0  ;;  %v3557_v63 = vmax.f32 %v2691_v45, 0.0 }
 0x1ad   : > { %v2712_v62 = vpop.f32.mrf.mxu1 }
 0x1ae   : > { %v3554_v19 = vmax.f32 %v2712_v62, 0.0  ;;  %v2723_v25 = vpop.f32.mrf.mxu0  ;;  %v2748_v39 = vmul.f32 %v3557_v63, %v3560_v29 }
 0x1b0   : > { %v2733_v2 = vmul.f32 %v3554_v19, %v3555_v23  ;;  %v2739_v33 = vpop.f32.mrf.mxu0  ;;  %v3566_v19 = vmax.f32 %v2572_v3, 0.0  ;;  %v299_v23 = vpop.permute.xlu0 %298  ;;  %vm1023_vm12 = vcmp.eq.f32.partialorder %v2748_v39, inf  ;;  %vm1025_vm13 = vcmp.eq.f32.partialorder %v2748_v39, 0.0 }
 0x1b1   : > { %3578 = vst [vmem:[#allocation10_spill] sm:$0xff] %v2739_v33  ;;  %v307_v38 = vmul.f32 %v299_v23, %v2395_v1 }
 0x1b2   : > { %2267 = vrsqrt.f32 %v2733_v2  ;;  %v2758_v26 = vpop.f32.mrf.mxu0  ;;  %vm1016_vm14 = vcmp.eq.f32.partialorder %v2733_v2, inf  ;;  %vm1018_vm15 = vcmp.eq.f32.partialorder %v2733_v2, 0.0  ;;  %v1019_v9 = vand.u32 2147483648, %v2733_v2 }
 0x1b3   : > { %v2741_v35 = vpop.f32.mrf.mxu1  ;;  %2269 = vpow2.f32 %v399_v16  ;;  %v308_v21 = vmul.f32 %v307_v38, %v301_v11  ;;  %v3583_v38 = vmax.f32 %v2691_v45, 0.0  ;;  %v1026_v45 = vand.u32 2147483648, %v2748_v39 }
 0x1b4   : > { %v3561_v28 = vmax.f32 %v2741_v35, 0.0  ;;  %2271 = vrsqrt.f32 %v2748_v39  ;;  %v2779_v10 = vpop.f32.mrf.mxu0 }
 0x1b5   : > { %v2750_v41 = vpop.f32.mrf.mxu1  ;;  %2273 = vlog2.f32 %v416_v49  ;;  %v2851_v29 = vmul.f32 %v1998_v40, %v308_v21  ;;  %v2858_v32 = vadd.f32 %v3583_v38, %v3582_v17  ;;  %v3585_v38 = vmax.f32 %v2560_v57, 0.0 }
 0x1b6   : > { %v3558_v13 = vmax.f32 %v2750_v41, 0.0  ;;  %v2790_v49 = vmul.f32 %v3561_v28, %v3562_v50  ;;  %v2807_v28 = vadd.f32 %v953_v44, %v711_v53  ;;  %v1012_v50 = vand.u32 2147483648, %v2721_v24  ;;  %v2820_v52 = vpop.f32.mrf.mxu0 }
 0x1b7   : > { %3581 = vst [vmem:[#allocation12_spill] sm:$0xff] %v2851_v29 }
 0x1b8   : > { %v2772_v63 = vmul.f32 %v3558_v13, %v3559_v20  ;;  %v2264_v20 = vpop.eup %2263  ;;  %v2846_v4 = vpop.f32.mrf.mxu0  ;;  %vm1037_vm0 = vcmp.eq.f32.partialorder %v2790_v49, inf  ;;  %vm1039_vm3 = vcmp.eq.f32.partialorder %v2790_v49, 0.0 }
 0x1b9   : > { %v2266_v44 = vpop.eup %2265  ;;  %v1001_v11 = vmul.f32 %v2264_v20, %v2710_v56 }
 0x1ba   : > { %2275 = vrsqrt.f32 %v2772_v63  ;;  %v2886_v21 = vpop.f32.mrf.mxu0  ;;  %vm1032_vm4 = vcmp.eq.f32.partialorder %v2772_v63, 0.0 }
 0x1bb   : > { %v2781_v36 = vpop.f32.mrf.mxu1  ;;  %2277 = vrsqrt.f32 %v2790_v49  ;;  %v1003_v48 = vsel %vm1002_vm10, %v2710_v56, %v1001_v11 }
 0x1bc   : > { %v3567_v23 = vmax.f32 %v2781_v36, 0.0 }
 0x1bd   : > { %v2797_v13 = vpop.f32.mrf.mxu1 }
 0x1be   : > { %v3565_v16 = vmax.f32 %v2797_v13, 0.0  ;;  %v2827_v53 = vmul.f32 %v3567_v23, %v3568_v5  ;;  %v1008_v5 = vmul.f32 %v2266_v44, %v2721_v24 }
 0x1bf   : > { %v2268_v43 = vpop.eup %2267 }
 0x1c0   : > { %v2833_v54 = vmul.f32 %v3565_v16, %v3566_v19  ;;  %v1005_v16 = vand.u32 2147483648, %v2710_v56  ;;  %v2270_v23 = vpop.eup %2269  ;;  %v1015_v19 = vmul.f32 %v2268_v43, %v2733_v2  ;;  %v3586_v43 = vmax.f32 %v2712_v62, 0.0 }
 0x1c1   : > { %v2272_v55 = vpop.eup %2271  ;;  %v401_v11 = vsel %vm397_vm2, %v2270_v23, 0.5  ;;  %v1010_v30 = vsel %vm1009_vm8, %v2721_v24, %v1008_v5  ;;  %v3587_v62 = vmax.f32 %v2578_v14, 0.0  ;;  %v2922_v24 = vpop.f32.mrf.mxu0  ;;  %vm1030_vm2 = vcmp.eq.f32.partialorder %v2772_v63, inf }
 0x1c2   : > { %2279 = vrsqrt.f32 %v2833_v54  ;;  %v2875_v17 = vadd.f32 %v3586_v43, %v3585_v38  ;;  %v2274_v29 = vpop.eup %2273  ;;  %v1006_v1 = vsel %vm1004_vm11, %v1005_v16, %v1003_v48  ;;  %v1017_v23 = vsel %vm1016_vm14, %v2733_v2, %v1015_v19 }
 0x1c3   : > { %v2849_v20 = vpop.f32.mrf.mxu1  ;;  %2281 = vrsqrt.f32 %v2827_v53  ;;  %v1022_v57 = vmul.f32 %v2272_v55, %v2748_v39  ;;  %v2903_v33 = vmul.f32 %v2650_v7, %v401_v11  ;;  %v1013_v56 = vsel %vm1011_vm9, %v1012_v50, %v1010_v30 }
 0x1c4   : > { %v3588_v38 = vmax.f32 %v2849_v20, 0.0  ;;  %v3590_v19 = vmax.f32 %v2580_v18, 0.0  ;;  %v1112_v55 = vmul.f32 2.0, %v1006_v1  ;;  %v1020_v2 = vsel %vm1018_vm15, %v1019_v9, %v1017_v23 }
 0x1c5   : > { %v2866_v40 = vpop.f32.mrf.mxu1  ;;  %3589 = vst [vmem:[#allocation14_spill] sm:$0xff] %v2903_v33  ;;  %v3594_v11 = vmax.f32 %v2741_v35, 0.0  ;;  %v1113_v58 = vmul.f32 2.0, %v1013_v56  ;;  %v1024_v35 = vsel %vm1023_vm12, %v2748_v39, %v1022_v57  ;;  %v1114_v1 = vmul.f32 2.0, %v1020_v2 }
 0x1c6   : > { %v2892_v43 = vmul.f32 %v3588_v38, %v3587_v62  ;;  %v3591_v16 = vmax.f32 %v2866_v40, 0.0  ;;  %v2914_v38 = vmul.f32 0.6931472, %v2274_v29  ;;  %v3595_v23 = vmax.f32 %v2564_v60, 0.0 }
 0x1c7   : > { %v2276_v44 = vpop.eup %2275  ;;  %v2920_v5 = vadd.f32 %v3594_v11, %v3593_v27  ;;  %v1128_v57 = vsub.f32 %v2818_v0, %v1112_v55  ;;  %v1033_v29 = vand.u32 2147483648, %v2772_v63  ;;  %v3597_v2 = vmax.f32 %v2588_v22, 0.0 }
 0x1c8   : > { %v1029_v48 = vmul.f32 %v2276_v44, %v2772_v63  ;;  %v2912_v62 = vmul.f32 %v3591_v16, %v3590_v19  ;;  %3592 = vst [vmem:[#allocation15_spill] sm:$0xff] %v2914_v38  ;;  %2283 = vrsqrt.f32 %v2892_v43  ;;  %v1040_v44 = vand.u32 2147483648, %v2790_v49  ;;  %v2278_v9 = vpop.eup %2277  ;;  %v2950_v38 = vpop.f32.mrf.mxu0 }
 0x1c9   : > { %v3596_v19 = vmax.f32 %v2750_v41, 0.0  ;;  %v3599_v0 = vmax.f32 %v2618_v31, 0.0  ;;  %v1129_v27 = vsub.f32 %v2807_v28, %v1113_v58  ;;  %v1130_v39 = vsub.f32 %v2875_v17, %v1114_v1 }
 0x1ca   : > { %2285 = vrsqrt.f32 %v2912_v62  ;;  %v1031_v56 = vsel %vm1030_vm2, %v2772_v63, %v1029_v48  ;;  %v1027_v48 = vsel %vm1025_vm13, %v1026_v45, %v1024_v35  ;;  %v1443_v45 = vmax.f32 %v2922_v24, 0.0 }
 0x1cb   : > { %v2925_v50 = vpop.f32.mrf.mxu1  ;;  %v2943_v16 = vadd.f32 %v3596_v19, %v3595_v23  ;;  %v1036_v23 = vmul.f32 %v2278_v9, %v2790_v49  ;;  %v1034_v33 = vsel %vm1032_vm4, %v1033_v29, %v1031_v56  ;;  %v1144_v9 = vadd.f32 %v1129_v27, %v1128_v57 }
 0x1cc   : > { %v3598_v60 = vmax.f32 %v2925_v50, 0.0  ;;  %v1115_v35 = vmul.f32 2.0, %v1027_v48  ;;  %vm1044_vm5 = vcmp.eq.f32.partialorder %v2833_v54, inf  ;;  %v1116_v58 = vmul.f32 2.0, %v1034_v33 }
 0x1cd   : > { %v2936_v30 = vpop.f32.mrf.mxu1  ;;  %v1038_v29 = vsel %vm1037_vm0, %v2790_v49, %v1036_v23  ;;  %v3600_v56 = vmax.f32 %v2566_v61, 0.0  ;;  %v3601_v27 = vmax.f32 %v2781_v36, 0.0  ;;  %v3603_v48 = vmax.f32 %v2797_v13, 0.0 }
 0x1ce   : > { %v962_v11 = vmax.f32 %v2936_v30, 0.0  ;;  %v2956_v7 = vmul.f32 %v3598_v60, %v3597_v2  ;;  %v1440_v2 = vmax.f32 %v2886_v21, 0.0  ;;  %v1047_v63 = vand.u32 2147483648, %v2833_v54 }
 0x1cf   : > { %v2280_v41 = vpop.eup %2279  ;;  %v2988_v57 = vadd.f32 %v3601_v27, %v3600_v56  ;;  %vm1051_vm6 = vcmp.eq.f32.partialorder %v2827_v53, inf  ;;  %vm1046_vm7 = vcmp.eq.f32.partialorder %v2833_v54, 0.0  ;;  %vm1053_vm8 = vcmp.eq.f32.partialorder %v2827_v53, 0.0 }
 0x1d0   : > { %v2966_v55 = vmul.f32 %v962_v11, %v3599_v0  ;;  %v2282_v19 = vpop.eup %2281  ;;  %v1043_v60 = vmul.f32 %v2280_v41, %v2833_v54  ;;  %2287 = vrsqrt.f32 %v2956_v7  ;;  %v3602_v41 = vmax.f32 %v2572_v3, 0.0 }
 0x1d1   : > { %v1050_v17 = vmul.f32 %v2282_v19, %v2827_v53  ;;  %v1145_v19 = vadd.f32 %v1144_v9, %v1130_v39  ;;  %v1041_v3 = vsel %vm1039_vm3, %v1040_v44, %v1038_v29  ;;  %v3604_v36 = vmax.f32 %v2636_v37, 0.0 }
 0x1d2   : > { %2289 = vrsqrt.f32 %v2966_v55  ;;  %v1045_v1 = vsel %vm1044_vm5, %v2833_v54, %v1043_v60  ;;  %v2994_v0 = vadd.f32 %v3603_v48, %v3602_v41  ;;  %v1131_v39 = vsub.f32 %v2858_v32, %v1115_v35 }
 0x1d3   : > { %v2977_v28 = vpop.f32.mrf.mxu1  ;;  %v1048_v13 = vsel %vm1046_vm7, %v1047_v63, %v1045_v1  ;;  %v1132_v9 = vsub.f32 %v2943_v16, %v1116_v58  ;;  %v1052_v54 = vsel %vm1051_vm6, %v2827_v53, %v1050_v17  ;;  %v3605_v27 = vmax.f32 %v2656_v46, 0.0 }
 0x1d4   : > { %v965_v33 = vmax.f32 %v2977_v28, 0.0  ;;  %v1054_v63 = vand.u32 2147483648, %v2827_v53  ;;  %v3606_v29 = vmax.f32 %v2578_v14, 0.0  ;;  %v3607_v1 = vmax.f32 %v2849_v20, 0.0 }
 0x1d5   : > { %v2998_v23 = vpop.f32.mrf.mxu1  ;;  %v2284_v56 = vpop.eup %2283  ;;  %vm1065_vm9 = vcmp.eq.f32.partialorder %v2892_v43, inf  ;;  %v1117_v32 = vmul.f32 2.0, %v1041_v3  ;;  %v1146_v16 = vadd.f32 %v1145_v19, %v1131_v39  ;;  %v1118_v35 = vmul.f32 2.0, %v1048_v13 }
 0x1d6   : > { %v964_v61 = vmax.f32 %v2998_v23, 0.0  ;;  %v3010_v60 = vmul.f32 %v965_v33, %v3604_v36  ;;  %v3026_v41 = vadd.f32 %v3607_v1, %v3606_v29  ;;  %v1055_v17 = vsel %vm1053_vm8, %v1054_v63, %v1052_v54 }
 0x1d7   : > { %v2286_v44 = vpop.eup %2285  ;;  %vm1058_vm10 = vcmp.eq.f32.partialorder %v2912_v62, inf  ;;  %v1061_v14 = vand.u32 2147483648, %v2912_v62  ;;  %v1147_v48 = vadd.f32 %v1146_v16, %v1132_v9  ;;  %v1064_v36 = vmul.f32 %v2284_v56, %v2892_v43 }
 0x1d8   : > { %v3019_v49 = vmul.f32 %v964_v61, %v3605_v27  ;;  %2291 = vrsqrt.f32 %v3010_v60  ;;  %v1057_v58 = vmul.f32 %v2286_v44, %v2912_v62  ;;  %vm1060_vm11 = vcmp.eq.f32.partialorder %v2912_v62, 0.0 }
 0x1d9   : > { %vm1067_vm12 = vcmp.eq.f32.partialorder %v2892_v43, 0.0  ;;  %v1068_v53 = vand.u32 2147483648, %v2892_v43  ;;  %v3608_v19 = vmax.f32 %v2580_v18, 0.0  ;;  %v3609_v13 = vmax.f32 %v2866_v40, 0.0 }
 0x1da   : > { %2293 = vrsqrt.f32 %v3019_v49  ;;  %v1059_v3 = vsel %vm1058_vm10, %v2912_v62, %v1057_v58  ;;  %v1133_v9 = vsub.f32 %v2920_v5, %v1117_v32  ;;  %v1119_v44 = vmul.f32 2.0, %v1055_v17 }
 0x1db   : > { %v3036_v20 = vpop.f32.mrf.mxu1  ;;  %v976_v39 = vadd.f32 %v3609_v13, %v3608_v19  ;;  %v1062_v54 = vsel %vm1060_vm11, %v1061_v14, %v1059_v3  ;;  %v1134_v56 = vsub.f32 %v2994_v0, %v1118_v35  ;;  %v3610_v29 = vmax.f32 %v2588_v22, 0.0 }
 0x1dc   : > { %v3611_v1 = vmax.f32 %v2925_v50, 0.0  ;;  %vm1079_vm13 = vcmp.eq.f32.partialorder %v2956_v7, inf  ;;  %v1082_v18 = vand.u32 2147483648, %v2956_v7  ;;  %v3612_v40 = vmax.f32 %v2618_v31, 0.0 }
 0x1dd   : > { %v3047_v27 = vpop.f32.mrf.mxu1  ;;  %v2288_v62 = vpop.eup %2287  ;;  %v1148_v35 = vadd.f32 %v1147_v48, %v1133_v9  ;;  %v1066_v22 = vsel %vm1065_vm9, %v2892_v43, %v1064_v36  ;;  %v1120_v50 = vmul.f32 2.0, %v1062_v54  ;;  %vm1081_vm14 = vcmp.eq.f32.partialorder %v2956_v7, 0.0 }
 0x1de   : > { %v966_v63 = vmax.f32 %v3047_v27, 0.0  ;;  %v3056_v16 = vadd.f32 %v3611_v1, %v3610_v29  ;;  %v3064_v5 = vadd.f32 %v962_v11, %v3612_v40  ;;  %v3613_v58 = vmax.f32 %v2665_v59, 0.0 }
 0x1df   : > { %v3066_v0 = vpop.f32.mrf.mxu1  ;;  %v2290_v32 = vpop.eup %2289  ;;  %vm1072_vm15 = vcmp.eq.f32.partialorder %v2966_v55, inf  ;;  %vm1074_vm0 = vcmp.eq.f32.partialorder %v2966_v55, 0.0  ;;  %v1135_v14 = vsub.f32 %v2988_v57, %v1119_v44  ;;  %v1149_v48 = vadd.f32 %v1148_v35, %v1134_v56 }
 0x1e0   : > { %v3076_v31 = vmul.f32 %v966_v63, %v3613_v58  ;;  %v1071_v30 = vmul.f32 %v2290_v32, %v2966_v55  ;;  %v1671_v11 = vmax.f32 %v3066_v0, 0.0  ;;  %v1078_v36 = vmul.f32 %v2288_v62, %v2956_v7 }
 0x1e1   : > { %v3082_v17 = vpop.f32.mrf.mxu1  ;;  %v1075_v3 = vand.u32 2147483648, %v2966_v55  ;;  %v1069_v19 = vsel %vm1067_vm12, %v1068_v53, %v1066_v22  ;;  %v3614_v54 = vmax.f32 %v2636_v37, 0.0  ;;  %v967_v29 = vmax.f32 %v3036_v20, 0.0 }
 0x1e2   : > { %v1073_v13 = vsel %vm1072_vm15, %v2966_v55, %v1071_v30  ;;  %v1136_v57 = vsub.f32 %v976_v39, %v1120_v50  ;;  %2295 = vrsqrt.f32 %v3076_v31  ;;  %v3615_v56 = vmax.f32 %v2667_v8, 0.0 }
 0x1e3   : > { %v3094_v9 = vadd.f32 %v965_v33, %v3614_v54  ;;  %v3097_v1 = vpop.f32.mrf.mxu1  ;;  %v1076_v44 = vsel %vm1074_vm0, %v1075_v3, %v1073_v13  ;;  %vm1093_vm2 = vcmp.eq.f32.partialorder %v3010_v60, inf  ;;  %v3616_v37 = vmax.f32 %v2656_v46, 0.0 }
 0x1e4   : > { %v3104_v43 = vmul.f32 %v1671_v11, %v3615_v56  ;;  %v1670_v28 = vmax.f32 %v3082_v17, 0.0  ;;  %v1673_v33 = vmax.f32 %v3097_v1, 0.0  ;;  %v1121_v39 = vmul.f32 2.0, %v1069_v19 }
 0x1e5   : > { %v3111_v55 = vadd.f32 %v964_v61, %v3616_v37  ;;  %v3115_v20 = vpop.f32.mrf.mxu1  ;;  %v2292_v53 = vpop.eup %2291  ;;  %v1150_v62 = vadd.f32 %v1149_v48, %v1135_v14  ;;  %v1080_v40 = vsel %vm1079_vm13, %v2956_v7, %v1078_v36  ;;  %v1122_v46 = vmul.f32 2.0, %v1076_v44 }
 0x1e6   : > { %2297 = vrsqrt.f32 %v3104_v43  ;;  %v1092_v23 = vmul.f32 %v2292_v53, %v3010_v60  ;;  %vm1095_vm3 = vcmp.eq.f32.partialorder %v3010_v60, 0.0  ;;  %v3617_v61 = vmax.f32 %v2669_v15, 0.0 }
 0x1e7   : > { %v3127_v35 = vpop.f32.mrf.mxu1  ;;  %v2294_v22 = vpop.eup %2293  ;;  %v1151_v50 = vadd.f32 %v1150_v62, %v1136_v57  ;;  %v1096_v58 = vand.u32 2147483648, %v3010_v60  ;;  %v3618_v30 = vmax.f32 %v2663_v51, 0.0  ;;  %v3619_v14 = vmax.f32 %v2673_v6, 0.0 }
 0x1e8   : > { %v3125_v32 = vmul.f32 %v1670_v28, %v3617_v61  ;;  %v1083_v36 = vsel %vm1081_vm14, %v1082_v18, %v1080_v40  ;;  %v1085_v3 = vmul.f32 %v2294_v22, %v3019_v49  ;;  %v1672_v19 = vmax.f32 %v3115_v20, 0.0 }
 0x1e9   : > { %v3132_v17 = vmul.f32 %v967_v29, %v3618_v30  ;;  %v3136_v48 = vmul.f32 %v1673_v33, %v3619_v14  ;;  %v3143_v13 = vpop.f32.mrf.mxu1  ;;  %v1137_v54 = vsub.f32 %v3026_v41, %v1121_v39  ;;  %vm1086_vm4 = vcmp.eq.f32.partialorder %v3019_v49, inf }
 0x1ea   : > { %2299 = vrsqrt.f32 %v3125_v32  ;;  %vm1088_vm5 = vcmp.eq.f32.partialorder %v3019_v49, 0.0  ;;  %v1675_v1 = vmax.f32 %v3127_v35, 0.0  ;;  %v1138_v57 = vsub.f32 %v3064_v5, %v1122_v46 }
 0x1eb   : > { %v1094_v7 = vsel %vm1093_vm2, %v3010_v60, %v1092_v23  ;;  %v1089_v18 = vand.u32 2147483648, %v3019_v49  ;;  %2301 = vrsqrt.f32 %v3136_v48  ;;  %v3155_v44 = vpop.f32.mrf.mxu1  ;;  %v1123_v56 = vmul.f32 2.0, %v1083_v36 }
 0x1ec   : > { %v1087_v41 = vsel %vm1086_vm4, %v3019_v49, %v1085_v3  ;;  %v3620_v37 = vmov %v3618_v30  ;;  %2303 = vrsqrt.f32 %v3132_v17  ;;  %v1152_v5 = vadd.f32 %v1151_v50, %v1137_v54 }
 0x1ed   : > { %v3160_v20 = vadd.f32 %v967_v29, %v3620_v37  ;;  %v3621_v53 = vmax.f32 %v2665_v59, 0.0  ;;  %v1103_v62 = vand.u32 2147483648, %v3076_v31  ;;  %v3622_v40 = vmax.f32 %v2676_v12, 0.0  ;;  %v3174_v23 = vpop.f32.mrf.mxu1 }
 0x1ee   : > { %v1097_v51 = vsel %vm1095_vm3, %v1096_v58, %v1094_v7  ;;  %v3623_v29 = vmax.f32 %v2681_v34, 0.0  ;;  %v1674_v59 = vmax.f32 %v3143_v13, 0.0  ;;  %v1677_v27 = vmax.f32 %v3155_v44, 0.0 }
 0x1ef   : > { %v3167_v39 = vadd.f32 %v966_v63, %v3621_v53  ;;  %v3172_v46 = vmul.f32 %v1672_v19, %v3622_v40  ;;  %v1153_v63 = vadd.f32 %v1152_v5, %v1138_v57  ;;  %v1090_v35 = vsel %vm1088_vm5, %v1089_v18, %v1087_v41  ;;  %v3194_v50 = vpop.f32.mrf.mxu1  ;;  %v2296_v49 = vpop.eup %2295 }
 0x1f0   : > { %v3180_v61 = vmul.f32 %v1675_v1, %v3623_v29  ;;  %vm1100_vm6 = vcmp.eq.f32.partialorder %v3076_v31, inf  ;;  %v3624_v22 = vmax.f32 %v2667_v8, 0.0  ;;  %v1139_v58 = vsub.f32 %v3056_v16, %v1123_v56 }
 0x1f1   : > { %2305 = vrsqrt.f32 %v3172_v46  ;;  %vm1727_vm7 = vcmp.eq.f32.partialorder %v3104_v43, inf  ;;  %v1730_v30 = vand.u32 2147483648, %v3104_v43  ;;  %v3200_v14 = vmul.f32 2.0, %v1097_v51  ;;  %v3229_v18 = vpop.f32.mrf.mxu1 }
 0x1f2   : > { %v3191_v60 = vadd.f32 %v1671_v11, %v3624_v22  ;;  %2307 = vrsqrt.f32 %v3180_v61  ;;  %vm1729_vm8 = vcmp.eq.f32.partialorder %v3104_v43, 0.0  ;;  %v3625_v8 = vmax.f32 %v2669_v15, 0.0 }
 0x1f3   : > { %vm1720_vm9 = vcmp.eq.f32.partialorder %v3125_v32, inf  ;;  %v3626_v11 = vmax.f32 %v2673_v6, 0.0  ;;  %v1124_v36 = vmul.f32 2.0, %v1090_v35  ;;  %vm1102_vm10 = vcmp.eq.f32.partialorder %v3076_v31, 0.0  ;;  %v2298_v6 = vpop.eup %2297 }
 0x1f4   : > { %v3205_v0 = vadd.f32 %v1670_v28, %v3625_v8  ;;  %vm1722_vm11 = vcmp.eq.f32.partialorder %v3125_v32, 0.0  ;;  %v3627_v3 = vmax.f32 %v2687_v42, 0.0  ;;  %v3628_v15 = vmax.f32 %v2693_v47, 0.0 }
 0x1f5   : > { %v3210_v16 = vadd.f32 %v1673_v33, %v3626_v11  ;;  %v1154_v33 = vadd.f32 %v1153_v63, %v1139_v58  ;;  %v1723_v57 = vand.u32 2147483648, %v3125_v32  ;;  %vm1741_vm12 = vcmp.eq.f32.partialorder %v3136_v48, inf  ;;  %v3632_v11 = vld [vmem:[#allocation10_spill] sm:$0xff] }
 0x1f6   : > { %v3218_v54 = vmul.f32 %v1674_v59, %v3627_v3  ;;  %v3224_v28 = vmul.f32 %v1677_v27, %v3628_v15  ;;  %v1676_v7 = vmax.f32 %v3174_v23, 0.0  ;;  %v1099_v56 = vmul.f32 %v2296_v49, %v3076_v31 }
 0x1f7   : > { %v1726_v41 = vmul.f32 %v2298_v6, %v3104_v43  ;;  %v1679_v37 = vmax.f32 %v3194_v50, 0.0  ;;  %v1141_v5 = vsub.f32 %v3094_v9, %v3200_v14  ;;  %vm1743_vm13 = vcmp.eq.f32.partialorder %v3136_v48, 0.0  ;;  %v2300_v40 = vpop.eup %2299 }
 0x1f8   : > { %2309 = vrsqrt.f32 %v3218_v54  ;;  %v1744_v53 = vand.u32 2147483648, %v3136_v48  ;;  %v1140_v51 = vsub.f32 %v3111_v55, %v1124_v36  ;;  %v3629_v29 = vmax.f32 %v2676_v12, 0.0  ;;  %v2302_v8 = vpop.eup %2301 }
 0x1f9   : > { %2311 = vrsqrt.f32 %v3224_v28  ;;  %vm1734_vm14 = vcmp.eq.f32.partialorder %v3172_v46, inf  ;;  %v3630_v35 = vmax.f32 %v2681_v34, 0.0  ;;  %v1728_v58 = vsel %vm1727_vm7, %v3104_v43, %v1726_v41  ;;  %v3274_v6 = vpop.eup %2303 }
 0x1fa   : > { %v3243_v63 = vadd.f32 %v1672_v19, %v3629_v29  ;;  %v1719_v49 = vmul.f32 %v2300_v40, %v3125_v32  ;;  %vm1736_vm15 = vcmp.eq.f32.partialorder %v3172_v46, 0.0  ;;  %v3631_v55 = vmax.f32 %v2723_v25, 0.0  ;;  %v3261_v19 = vpop.f32.mrf.mxu1 }
 0x1fb   : > { %v3248_v22 = vadd.f32 %v1675_v1, %v3630_v35  ;;  %v1101_v34 = vsel %vm1100_vm6, %v3076_v31, %v1099_v56  ;;  %v1737_v1 = vand.u32 2147483648, %v3172_v46  ;;  %v3633_v36 = vmax.f32 %v3632_v11, 0.0 }
 0x1fc   : > { %v3259_v12 = vmul.f32 %v1676_v7, %v3631_v55  ;;  %v1678_v15 = vmax.f32 %v3229_v18, 0.0  ;;  %v1721_v41 = vsel %vm1720_vm9, %v3125_v32, %v1719_v49  ;;  %v1740_v40 = vmul.f32 %v2302_v8, %v3136_v48 }
 0x1fd   : > { %v3271_v3 = vmul.f32 %v1679_v37, %v3633_v36  ;;  %vm1755_vm0 = vcmp.eq.f32.partialorder %v3180_v61, inf  ;;  %v3282_v56 = vadd.f32 %v1154_v33, %v1140_v51  ;;  %v1731_v29 = vsel %vm1729_vm8, %v1730_v30, %v1728_v58  ;;  %v3297_v33 = vpop.f32.mrf.mxu1 }
 0x1fe   : > { %2313 = vrsqrt.f32 %v3259_v12  ;;  %v1724_v35 = vsel %vm1722_vm11, %v1723_v57, %v1721_v41  ;;  %vm1757_vm2 = vcmp.eq.f32.partialorder %v3180_v61, 0.0  ;;  %v1104_v49 = vsel %vm1102_vm10, %v1103_v62, %v1101_v34  ;;  %v2306_v43 = vpop.eup %2305 }
 0x1ff   : > { %v1830_v55 = vmul.f32 2.0, %v1724_v35  ;;  %v1742_v8 = vsel %vm1741_vm12, %v3136_v48, %v1740_v40  ;;  %2315 = vrsqrt.f32 %v3271_v3  ;;  %v1758_v32 = vand.u32 2147483648, %v3180_v61  ;;  %v2308_v34 = vpop.eup %2307 }
 0x200   : > { %v3634_v30 = vmax.f32 %v2687_v42, 0.0  ;;  %v3635_v31 = vmax.f32 %v2693_v47, 0.0  ;;  %v3636_v51 = vmax.f32 %v2758_v26, 0.0  ;;  %v1831_v36 = vmul.f32 2.0, %v1731_v29 }
 0x201   : > { %v1745_v42 = vsel %vm1743_vm13, %v1744_v53, %v1742_v8  ;;  %v1733_v13 = vmul.f32 %v2306_v43, %v3172_v46  ;;  %v3322_v47 = vmul.f32 2.0, %v1104_v49  ;;  %v1754_v44 = vmul.f32 %v2308_v34, %v3180_v61  ;;  %v3333_v53 = vpop.f32.mrf.mxu1 }
 0x202   : > { %v3304_v57 = vadd.f32 %v1674_v59, %v3634_v30  ;;  %v3310_v62 = vadd.f32 %v1677_v27, %v3635_v31  ;;  %v3316_v58 = vmul.f32 %v1678_v15, %v3636_v51  ;;  %v1681_v59 = vmax.f32 %v3261_v19, 0.0 }
 0x203   : > { %vm1748_vm3 = vcmp.eq.f32.partialorder %v3218_v54, inf  ;;  %v1846_v27 = vsub.f32 %v3205_v0, %v1830_v55  ;;  %v1735_v41 = vsel %vm1734_vm14, %v3172_v46, %v1733_v13  ;;  %vm1750_vm4 = vcmp.eq.f32.partialorder %v3218_v54, 0.0 }
 0x204   : > { %2317 = vrsqrt.f32 %v3316_v58  ;;  %v1751_v48 = vand.u32 2147483648, %v3218_v54  ;;  %v1833_v40 = vmul.f32 2.0, %v1745_v42  ;;  %v1738_v29 = vsel %vm1736_vm15, %v1737_v1, %v1735_v41 }
 0x205   : > { %v1756_v35 = vsel %vm1755_vm0, %v3180_v61, %v1754_v44  ;;  %v3637_v0 = vmax.f32 %v2779_v10, 0.0  ;;  %v2310_v55 = vpop.eup %2309  ;;  %v1847_v8 = vsub.f32 %v3191_v60, %v1831_v36  ;;  %v1832_v43 = vmul.f32 2.0, %v1738_v29  ;;  %v3358_v36 = vpop.f32.mrf.mxu1 }
 0x206   : > { %vm1769_vm5 = vcmp.eq.f32.partialorder %v3224_v28, inf  ;;  %v1680_v30 = vmax.f32 %v3297_v33, 0.0  ;;  %v2312_v46 = vpop.eup %2311  ;;  %v1142_v1 = vsub.f32 %v3167_v39, %v3322_v47  ;;  %v1759_v31 = vsel %vm1757_vm2, %v1758_v32, %v1756_v35  ;;  %v3650_v33 = vld [vmem:[#allocation12_spill] sm:$0xff] }
 0x207   : > { %v3344_v49 = vmul.f32 %v1681_v59, %v3637_v0  ;;  %v1747_v51 = vmul.f32 %v2310_v55, %v3218_v54  ;;  %v1862_v34 = vadd.f32 %v1847_v8, %v1846_v27  ;;  %v1848_v42 = vsub.f32 %v3243_v63, %v1832_v43 }
 0x208   : > { %v1768_v60 = vmul.f32 %v2312_v46, %v3224_v28  ;;  %vm1771_vm6 = vcmp.eq.f32.partialorder %v3224_v28, 0.0  ;;  %v1849_v13 = vsub.f32 %v3210_v16, %v1833_v40  ;;  %v3638_v32 = vmax.f32 %v2820_v52, 0.0 }
 0x209   : > { %2319 = vrsqrt.f32 %v3344_v49  ;;  %v1749_v61 = vsel %vm1748_vm3, %v3218_v54, %v1747_v51  ;;  %v1683_v63 = vmax.f32 %v3333_v53, 0.0  ;;  %v1863_v27 = vadd.f32 %v1862_v34, %v1848_v42  ;;  %v3385_v54 = vpop.f32.mrf.mxu1 }
 0x20a   : > { %v3368_v44 = vmul.f32 %v1680_v30, %v3638_v32  ;;  %v1835_v41 = vmul.f32 2.0, %v1759_v31  ;;  %v1752_v29 = vsel %vm1750_vm4, %v1751_v48, %v1749_v61  ;;  %v1770_v16 = vsel %vm1769_vm5, %v3224_v28, %v1768_v60 }
 0x20b   : > { %v2314_v40 = vpop.eup %2313  ;;  %v1834_v35 = vmul.f32 2.0, %v1752_v29  ;;  %v1772_v0 = vand.u32 2147483648, %v3224_v28  ;;  %v3639_v55 = vmax.f32 %v2723_v25, 0.0  ;;  %v1864_v43 = vadd.f32 %v1863_v27, %v1849_v13 }
 0x20c   : > { %2321 = vrsqrt.f32 %v3368_v44  ;;  %v1761_v46 = vmul.f32 %v2314_v40, %v3259_v12  ;;  %vm1762_vm7 = vcmp.eq.f32.partialorder %v3259_v12, inf  ;;  %vm1764_vm8 = vcmp.eq.f32.partialorder %v3259_v12, 0.0  ;;  %v2316_v48 = vpop.eup %2315 }
 0x20d   : > { %v1692_v8 = vadd.f32 %v1676_v7, %v3639_v55  ;;  %v1850_v31 = vsub.f32 %v3304_v57, %v1834_v35  ;;  %v1773_v25 = vsel %vm1771_vm6, %v1772_v0, %v1770_v16  ;;  %v1765_v23 = vand.u32 2147483648, %v3259_v12 }
 0x20e   : > { %v3640_v7 = vmax.f32 %v2846_v4, 0.0  ;;  %vm1107_vm9 = vcmp.eq.f32.partialorder %v3132_v17, inf  ;;  %v1851_v34 = vsub.f32 %v3248_v22, %v1835_v41  ;;  %v1763_v42 = vsel %vm1762_vm7, %v3259_v12, %v1761_v46 }
 0x20f   : > { %v1782_v60 = vmul.f32 %v2316_v48, %v3271_v3  ;;  %v1682_v57 = vmax.f32 %v3358_v36, 0.0  ;;  %v1865_v28 = vadd.f32 %v1864_v43, %v1850_v31  ;;  %v1766_v13 = vsel %vm1764_vm8, %v1765_v23, %v1763_v42 }
 0x210   : > { %v3395_v51 = vmul.f32 %v1683_v63, %v3640_v7  ;;  %v1685_v61 = vmax.f32 %v3385_v54, 0.0  ;;  %v1837_v27 = vmul.f32 2.0, %v1773_v25  ;;  %v1836_v29 = vmul.f32 2.0, %v1766_v13 }
 0x211   : > { %v2318_v32 = vpop.eup %2317  ;;  %vm1783_vm10 = vcmp.eq.f32.partialorder %v3271_v3, inf  ;;  %vm1785_vm11 = vcmp.eq.f32.partialorder %v3271_v3, 0.0  ;;  %v1866_v22 = vadd.f32 %v1865_v28, %v1851_v34  ;;  %v1786_v12 = vand.u32 2147483648, %v3271_v3 }
 0x212   : > { %2323 = vrsqrt.f32 %v3395_v51  ;;  %v1775_v41 = vmul.f32 %v2318_v32, %v3316_v58  ;;  %vm1776_vm12 = vcmp.eq.f32.partialorder %v3316_v58, inf  ;;  %v1852_v16 = vsub.f32 %v1692_v8, %v1836_v29 }
 0x213   : > { %v1784_v40 = vsel %vm1783_vm10, %v3271_v3, %v1782_v60  ;;  %v1779_v35 = vand.u32 2147483648, %v3316_v58  ;;  %v3415_v0 = vmul.f32 %v1682_v57, %v1440_v2  ;;  %vm1778_vm13 = vcmp.eq.f32.partialorder %v3316_v58, 0.0  ;;  %v3436_v60 = vpop.f32.mrf.mxu1 }
 0x214   : > { %v1777_v55 = vsel %vm1776_vm12, %v3316_v58, %v1775_v41  ;;  %v3423_v43 = vmul.f32 %v1685_v61, %v1443_v45  ;;  %v1106_v8 = vmul.f32 %v3274_v6, %v3132_v17  ;;  %v1853_v48 = vsub.f32 %v3310_v62, %v1837_v27 }
 0x215   : > { %v1867_v31 = vadd.f32 %v1866_v22, %v1852_v16  ;;  %v1780_v25 = vsel %vm1778_vm13, %v1779_v35, %v1777_v55  ;;  %2325 = vrsqrt.f32 %v3415_v0  ;;  %v1787_v23 = vsel %vm1785_vm11, %v1786_v12, %v1784_v40  ;;  %v3645_v55 = vld [vmem:[#allocation14_spill] sm:$0xff] }
 0x216   : > { %v2320_v46 = vpop.eup %2319  ;;  %v3641_v58 = vmax.f32 %v2758_v26, 0.0  ;;  %v1838_v34 = vmul.f32 2.0, %v1780_v25  ;;  %v3642_v6 = vmax.f32 %v3632_v11, 0.0  ;;  %2327 = vrsqrt.f32 %v3423_v43 }
 0x217   : > { %v1796_v42 = vmul.f32 %v2320_v46, %v3344_v49  ;;  %v1868_v28 = vadd.f32 %v1867_v31, %v1853_v48  ;;  %v1108_v26 = vsel %vm1107_vm9, %v3132_v17, %v1106_v8  ;;  %vm1797_vm14 = vcmp.eq.f32.partialorder %v3344_v49, inf  ;;  %v3646_v8 = vld [vmem:[#allocation8_spill] sm:$0xff] }
 0x218   : > { %v1694_v7 = vadd.f32 %v1678_v15, %v3641_v58  ;;  %v1695_v62 = vadd.f32 %v1679_v37, %v3642_v6  ;;  %vm1790_vm15 = vcmp.eq.f32.partialorder %v3368_v44, inf  ;;  %v1110_v18 = vand.u32 2147483648, %v3132_v17  ;;  %v3652_v6 = vld [vmem:[#allocation15_spill] sm:$0xff] }
 0x219   : > { %v2322_v15 = vpop.eup %2321  ;;  %v1839_v13 = vmul.f32 2.0, %v1787_v23  ;;  %vm1109_vm0 = vcmp.eq.f32.partialorder %v3132_v17, 0.0  ;;  %v1156_v50 = vadd.f32 %v3282_v56, %v1141_v5  ;;  %v1684_v37 = vmax.f32 %v3436_v60, 0.0  ;;  %v3648_v23 = vld [vmem:[#allocation11_spill] sm:$0xff] }
 0x21a   : > { %v1854_v3 = vsub.f32 %v1694_v7, %v1838_v34  ;;  %v1798_v11 = vsel %vm1797_vm14, %v3344_v49, %v1796_v42  ;;  %v1789_v32 = vmul.f32 %v2322_v15, %v3368_v44  ;;  %v1793_v27 = vand.u32 2147483648, %v3368_v44  ;;  %v3649_v7 = vld [vmem:[#allocation9_spill] sm:$0xff] }
 0x21b   : > { %v1111_v29 = vsel %vm1109_vm0, %v1110_v18, %v1108_v26  ;;  %v1157_v17 = vadd.f32 %v1156_v50, %v1142_v1  ;;  %v3643_v41 = vmax.f32 %v2950_v38, 0.0  ;;  %vm1799_vm2 = vcmp.eq.f32.partialorder %v3344_v49, 0.0 }
 0x21c   : > { %v1869_v22 = vadd.f32 %v1868_v28, %v1854_v3  ;;  %v1127_v12 = vmul.f32 2.0, %v1111_v29  ;;  %v1800_v14 = vand.u32 2147483648, %v3344_v49  ;;  %v1791_v5 = vsel %vm1790_vm15, %v3368_v44, %v1789_v32 }
 0x21d   : > { %v3465_v9 = vmul.f32 %v1684_v37, %v3643_v41  ;;  %vm1792_vm3 = vcmp.eq.f32.partialorder %v3368_v44, 0.0  ;;  %v1855_v16 = vsub.f32 %v1695_v62, %v1839_v13  ;;  %v3644_v40 = vmax.f32 %v2820_v52, 0.0 }
 0x21e   : > { %v1794_v39 = vsel %vm1792_vm3, %v1793_v27, %v1791_v5  ;;  %v1143_v47 = vsub.f32 %v3160_v20, %v1127_v12  ;;  %v1801_v1 = vsel %vm1799_vm2, %v1800_v14, %v1798_v11  ;;  %v3647_v46 = vmax.f32 %v3646_v8, 0.0 }
 0x21f   : > { %v2324_v56 = vpop.eup %2323  ;;  %2329 = vrsqrt.f32 %v3465_v9  ;;  %v1696_v35 = vadd.f32 %v1680_v30, %v3644_v40  ;;  %v1840_v49 = vmul.f32 2.0, %v1794_v39  ;;  %v1870_v31 = vadd.f32 %v1869_v22, %v1855_v16  ;;  %v3651_v30 = vld [vmem:[#allocation13_spill] sm:$0xff] }
 0x220   : > { %v411_v48 = vsub.f32 %v3647_v46, %v3645_v55  ;;  %v1810_v44 = vmul.f32 %v2324_v56, %v3395_v51  ;;  %v1158_v25 = vadd.f32 %v1157_v17, %v1143_v47  ;;  %vm420_vm4 = vcmp.lt.s32.totalorder %v3648_v23, 16 }
 0x221   : > { %v1856_v20 = vsub.f32 %v1696_v35, %v1840_v49  ;;  %v1841_v58 = vmul.f32 2.0, %v1801_v1  ;;  %v294_v52 = vsel %vm267_vm1, %v3649_v7, 0.0  ;;  %vm1811_vm5 = vcmp.eq.f32.partialorder %v3395_v51, inf }
 0x222   : > { %1163 = vadd.xlane.f32.xlu0 %v1158_v25  ;;  %v2326_v34 = vpop.eup %2325  ;;  %v392_v42 = vmul.f32 %v3651_v30, %v3650_v33  ;;  %v419_v62 = vadd.f32 %v3652_v6, %v411_v48  ;;  %v3653_v28 = vmov 0.0   ;;  %v3654_v3 = vmax.f32 %v2779_v10, 0.0 }
 0x223   : > { %v2000_v26 = vsel %vm420_vm4, 1.0, %v3653_v28  ;;  %v1871_v15 = vadd.f32 %v1870_v31, %v1856_v20  ;;  %v1812_v13 = vsel %vm1811_vm5, %v3395_v51, %v1810_v44  ;;  %v1803_v50 = vmul.f32 %v2326_v34, %v3415_v0  ;;  %v2328_v11 = vpop.eup %2327 }
 0x224   : > { %v1697_v18 = vadd.f32 %v1681_v59, %v3654_v3  ;;  %vm1813_vm6 = vcmp.eq.f32.partialorder %v3395_v51, 0.0  ;;  %v1814_v32 = vand.u32 2147483648, %v3395_v51  ;;  %vm1804_vm7 = vcmp.eq.f32.partialorder %v3415_v0, inf }
 0x225   : > { %v1807_v27 = vand.u32 2147483648, %v3415_v0  ;;  %v1805_v10 = vsel %vm1804_vm7, %v3415_v0, %v1803_v50  ;;  %vm1806_vm8 = vcmp.eq.f32.partialorder %v3415_v0, 0.0  ;;  %v1824_v19 = vmul.f32 %v2328_v11, %v3423_v43 }
 0x226   : > { %v1857_v29 = vsub.f32 %v1697_v18, %v1841_v58  ;;  %295 = vadd.xlane.f32.xlu0 %v294_v52  ;;  %v1815_v59 = vsel %vm1813_vm6, %v1814_v32, %v1812_v13  ;;  %v393_v12 = vsel %vm267_vm1, %v392_v42, 0.0  ;;  %v423_v17 = vmul.f32 %v2000_v26, %v419_v62 }
 0x227   : > { %v1808_v22 = vsel %vm1806_vm8, %v1807_v27, %v1805_v10  ;;  %v1698_v51 = vadd.f32 %v1682_v57, %v1440_v2  ;;  %vm1825_vm9 = vcmp.eq.f32.partialorder %v3423_v43, inf  ;;  %v1843_v5 = vmul.f32 2.0, %v1815_v59 }
 0x228   : > { %v1842_v41 = vmul.f32 2.0, %v1808_v22  ;;  %v1872_v14 = vadd.f32 %v1871_v15, %v1857_v29  ;;  %v1826_v0 = vsel %vm1825_vm9, %v3423_v43, %v1824_v19  ;;  %v424_v39 = vsel %vm267_vm1, %v423_v17, 0.0 }
 0x229   : > { %v1828_v47 = vand.u32 2147483648, %v3423_v43  ;;  %v3655_v1 = vmax.f32 %v2846_v4, 0.0  ;;  %vm1827_vm10 = vcmp.eq.f32.partialorder %v3423_v43, 0.0  ;;  %vm1818_vm11 = vcmp.eq.f32.partialorder %v3465_v9, inf }
 0x22a   : > { %v1858_v56 = vsub.f32 %v1698_v51, %v1842_v41  ;;  %394 = vadd.xlane.f32.xlu0 %v393_v12  ;;  %v1821_v57 = vand.u32 2147483648, %v3465_v9  ;;  %vm1820_vm1 = vcmp.eq.f32.partialorder %v3465_v9, 0.0  ;;  %v3656_v53 = vmax.f32 %v2950_v38, 0.0 }
 0x22b   : > { %v1699_v21 = vadd.f32 %v1683_v63, %v3655_v1  ;;  %v1829_v40 = vsel %vm1827_vm10, %v1828_v47, %v1826_v0  ;;  %v1701_v46 = vadd.f32 %v1685_v61, %v1443_v45  ;;  %v3657_v61 = vld [vmem:[#allocation7_spill] sm:$0xff]  ;;  %v3658_v3 = vlaneseq }
 0x22c   : > { %v2330_v16 = vpop.eup %2329  ;;  %v1873_v2 = vadd.f32 %v1872_v14, %v1858_v56  ;;  %v1700_v63 = vadd.f32 %v1684_v37, %v3656_v53  ;;  %v1845_v8 = vmul.f32 2.0, %v1829_v40  ;;  %v271_v42 = vmax.f32 %v3657_v61, 2.0 }
 0x22d   : > { %v1817_v36 = vmul.f32 %v2330_v16, %v3465_v9  ;;  %v1859_v35 = vsub.f32 %v1699_v21, %v1843_v5  ;;  %v441_v18 = vshrl.u32 %v3658_v3, 7  ;;  %vm1172_vm12 = vcmp.eq.s32.totalorder %v3648_v23, 1 }
 0x22e   : > { %425 = vadd.xlane.f32.xlu0 %v424_v39  ;;  %v1861_v31 = vsub.f32 %v1701_v46, %v1845_v8  ;;  %v1997_v6 = vadd.f32 -1.0, %v271_v42  ;;  %2331 = vrcp.f32 %v271_v42  ;;  %vm444_vm14 = vcmp.eq.s32.totalorder %v3648_v23, 2 }
 0x22f   : > { %v1819_v49 = vsel %vm1818_vm11, %v3465_v9, %v1817_v36  ;;  %v1874_v43 = vadd.f32 %v1873_v2, %v1859_v35  ;;  %vm1173_vm13 = vcmp.eq.s32.totalorder %v441_v18, 0  ;;  %vm442_vm0 = vcmp.eq.s32.totalorder %v3648_v23, 0 }
 0x230   : > { %v1822_v4 = vsel %vm1820_vm1, %v1821_v57, %v1819_v49  ;;  %v275_v28 = vmul.f32 %v1997_v6, %v271_v42  ;;  %vm1174_vm15 = vmand %vm1172_vm12, %vm1173_vm13  ;;  %vm447_vm2 = vcmp.eq.s32.totalorder %v3648_v23, 3  ;;  %vm1890_vm3 = vcmp.eq.s32.totalorder %v441_v18, 1 }
 0x231   : > { %v1844_v55 = vmul.f32 2.0, %v1822_v4  ;;  %vm1891_vm4 = vmand %vm1172_vm12, %vm1890_vm3  ;;  %vm1896_vm5 = vcmask 25600  }
 0x232   : > { %2333 = vrcp.f32 %v275_v28 }
 0x233   : > { %v1860_v48 = vsub.f32 %v1700_v63, %v1844_v55 }
 0x235   : > { %v1875_v44 = vadd.f32 %v1874_v43, %v1860_v48 }
 0x237   : > { %v1876_v25 = vadd.f32 %v1875_v44, %v1861_v31 }
 0x239   : > { %1881 = vadd.xlane.f32.xlu1 %v1876_v25 }
 0x23b   : > { %v2332_v15 = vpop.eup %2331 }
 0x23f   : > { %v2334_v19 = vpop.eup %2333 }
 0x2ab   : > { %v1164_v9 = vpop.xlane.xlu0 %1163 }
 0x2ac   : > { %v1165_v20 = vrot.slane %v1164_v9, 4 }
 0x2ae   : > { %v1166_v58 = vadd.f32 %v1165_v20, %v1164_v9 }
 0x2af   : > { %v296_v62 = vpop.xlane.xlu0 %295 }
 0x2b0   : > { %v1167_v38 = vrot.slane %v1166_v58, 2  ;;  %v297_v32 = vmul.f32 %v2332_v15, %v296_v62 }
 0x2b2   : > { %v1168_v7 = vadd.f32 %v1167_v38, %v1166_v58  ;;  %v443_v59 = vsel %vm442_vm0, %v297_v32, 0.0 }
 0x2b3   : > { %v395_v26 = vpop.xlane.xlu0 %394 }
 0x2b4   : > { %v1169_v60 = vrot.slane %v1168_v7, 1  ;;  %v396_v50 = vmul.f32 %v2332_v15, %v395_v26 }
 0x2b6   : > { %v1170_v37 = vadd.f32 %v1169_v60, %v1168_v7  ;;  %v445_v29 = vsel %vm444_vm14, %v396_v50, 0.0 }
 0x2b7   : > { %v426_v13 = vpop.xlane.xlu0 %425  ;;  %v446_v12 = vadd.f32 %v445_v29, %v443_v59 }
 0x2b8   : > { %2240 = vpush %v1170_v37  ;;  %v427_v27 = vmul.f32 %v2332_v15, %v426_v13 }
 0x2ba   : > { %v448_v22 = vsel %vm447_vm2, %v427_v27, 0.0 }
 0x2bb   : > { %v449_v51 = vadd.f32 %v448_v22, %v446_v12 }
 0x2c2   : > { %v1882_v52 = vpop.xlane.xlu1 %1881 }
 0x2c3   : > { %v1883_v34 = vrot.slane %v1882_v52, 4 }
 0x2c5   : > { %v1884_v33 = vadd.f32 %v1883_v34, %v1882_v52 }
 0x2c7   : > { %v1885_v24 = vrot.slane %v1884_v33, 2 }
 0x2c9   : > { %v1886_v30 = vadd.f32 %v1885_v24, %v1884_v33 }
 0x2cb   : > { %v1887_v54 = vrot.slane %v1886_v30, 1 }
 0x2cd   : > { %v1888_v45 = vadd.f32 %v1887_v54, %v1886_v30 }
 0x2cf   : > { %2242 = vpush %v1888_v45 }
 0x2e9   : > { %s2241_s7 = spop %2240 }
 0x2ea   : > { %v1175_v11 = vstv %s2241_s7 }
 0x2eb   : > { %v1176_v10 = vsel %vm1174_vm15, %v1175_v11, 0.0 }
 0x2ec   : > { %v1177_v17 = vmul.f32 %v2334_v19, %v1176_v10 }
 0x2ee   : > { %v1178_v5 = vadd.f32 %v1177_v17, %v449_v51 }
 0x300   : > { %s2243_s8 = spop %2242 }
 0x301   : > { %v1892_v41 = vstv %s2243_s8 }
 0x302   : > { %v1893_v14 = vsel %vm1891_vm4, %v1892_v41, 0.0 }
 0x303   : > { %v1894_v56 = vmul.f32 %v2334_v19, %v1893_v14 }
 0x305   : > { %v1895_v0 = vadd.f32 %v1894_v56, %v1178_v5 }
 0x307   : > { %1897 = vst.msk [vmem:[%s246_s11] sm:$0x3] %vm1896_vm5, %v1895_v0 }
 0x308 PF: > { %s14_s15 = sadd.s32 1, %s2341_s15  }
 0x309   : > { %p11_p4 = scmp.ge.s32.totalorder %s14_s15, 4  }
 0x30b   :  { %13 = sbr.rel (!%p11_p4) target bundleno = 1 (0x1), region = 79 }

</bundles_post_ra>
